<compile_context>
chip_gen: v5e
topology: v5e:2x2
jax: 0.10.0
libtpu: 0.0.40
codegen_flags: <defaults>
</compile_context>

<pallas_src>
import math
from functools import partial

import jax
import jax.numpy as jnp
from jax.experimental import pallas as pl
from jax.experimental.pallas import tpu as pltpu


# ----------------------------- Pallas kernel ------------------------------- #
def hyena_filter_kernel(zT_ref, w0t_ref, bias_ref, w12_ref, woutT_ref,
                        table_ref, base_ref, o_ref, *, shift, mxu_dtype):
    z = zT_ref[...]                                # (E, tL)  feature-major
    E, tL = z.shape

    # ---- Layer 0: Linear(E, O) + Sin (freq pre-folded into weights/bias) ---
    w0t = w0t_ref[...]                             # (O, E)
    if E <= 8:
        # K is tiny (emb_dim, typically 3): VPU broadcast-FMAs, skip the MXU.
        # (a stride-0 sublane-broadcast load zT_ref[pl.ds(e, O, stride=0), :]
        #  is a further micro-opt if the XLU ever binds)
        h = bias_ref[0]                            # (O, 1) -> broadcasts over lanes
        for e in range(E):                         # static, unrolled
            h = h + w0t[:, e:e + 1] * z[e:e + 1, :]
    else:
        h = jnp.dot(w0t.astype(mxu_dtype), z.astype(mxu_dtype),
                    preferred_element_type=jnp.float32) + bias_ref[0]
    h = jnp.sin(h)                                 # (O, tL)

    # ---- Inner MLP: 2 x (Linear(O, O) + Sin) on the MXU --------------------
    # (at realistic sizes these K=O contractions are MXU-padded; a VPU
    #  broadcast-FMA path is an option if the vext slot ever binds)
    h = jnp.dot(w12_ref[0].astype(mxu_dtype), h.astype(mxu_dtype),
                preferred_element_type=jnp.float32) + bias_ref[1]
    h = jnp.sin(h)
    h = jnp.dot(w12_ref[1].astype(mxu_dtype), h.astype(mxu_dtype),
                preferred_element_type=jnp.float32) + bias_ref[2]
    h = jnp.sin(h)

    # ---- Output projection directly in (C*D, tL) layout (no bias) ----------
    h = jnp.dot(woutT_ref[...].astype(mxu_dtype), h.astype(mxu_dtype),
                preferred_element_type=jnp.float32)            # (C*D, tL)

    C, D, _ = table_ref.shape
    h = h.reshape(C, D, tL)                        # leading-dim split: free (D % 8 == 0)

    # ---- ExponentialModulation, fully factorized (no in-kernel exp) --------
    # decay[c,d,l0+j] = exp(nad*t[l0]) * exp(nad*t[j]) = base * table
    base = base_ref[0]                             # (C, D)
    decay = base[:, :, None] * table_ref[...]      # (C, D, tL), cheap VPU muls
    if shift != 0.0:                               # static: skip the add when 0
        decay = decay + shift

    o_ref[...] = (h * decay).astype(o_ref.dtype)   # (C, D, tL), lane-dense store


# ------------------------------ tile picking ------------------------------- #
def _pick_tile(L, max_tile=1024):
    """Largest L-tile <= max_tile.  grid=(1,) for small L removes all
    per-step pipeline overhead; otherwise pick the largest multiple of 128
    dividing L.  (On v7x prefer an even grid so both TensorCores stay busy.)"""
    if L <= max_tile:
        return L
    cap = max_tile - (max_tile % 128)
    for cand in range(cap, 127, -128):
        if L % cand == 0:
            return cand
    # TODO(synk): ragged L needs a masked last tile; fall back to one big tile.
    return L


# ------------------------------- wrapper ----------------------------------- #
def hyena_filter_forward(L, params, *, shift=0.0, tL=None, max_tile=1024,
                         out_dtype=jnp.float32, mxu_dtype=jnp.float32):
    """Returns k of shape (channels, d_model, L).

    tL=None auto-picks the L-tile (see _pick_tile). For large L sweep
    max_tile in 512..2048 per chip generation (keep grid even on v7x).
    out_dtype / mxu_dtype can be set to bfloat16 on v5e/v6e/v7x if the
    downstream FFT conv tolerates it (diverges slightly from the f32 reference).
    """
    z_full, t_full = params["z"], params["t"]             # (S, E), (S, 1)
    z = z_full[:L]                                        # (L, E)
    t = t_full[:L, 0]                                     # (L,)
    freq = params["freq"]                                 # (1, O)

    # Fold Sin's freq into the Linears: sin(f*(xW+b)) == sin(x(W*f)+(b*f)).
    # Everything is stored feature-major (out_features leading) for the kernel.
    w0t = (params["w0"] * freq).T                         # (O, E)
    b0t = (params["b0"] * freq).T                         # (O, 1)
    w1t = (params["w1"] * freq).T                         # (O, O)
    b1t = (params["b1"] * freq).T                         # (O, 1)
    w2t = (params["w2"] * freq).T                         # (O, O)
    b2t = (params["b2"] * freq).T                         # (O, 1)
    woutT = params["wout"].T                              # (C*D, O)
    nad = -jnp.abs(params["deltas"])                      # (C, D) = -|deltas|

    zT = z.T                                              # (E, L)
    E = zT.shape[0]
    O = w1t.shape[0]
    C, D = nad.shape

    if tL is None:
        tL = _pick_tile(L, max_tile)
    assert L % tL == 0, "L must be a multiple of the L-tile"  # TODO(synk): masked last tile for ragged L
    assert D % 8 == 0, \
        "d_model must be a multiple of 8 so the (C*D,tL)->(C,D,tL) split is a free relayout"
    num_tiles = L // tL

    # Pack the small constant operands (fewer pipelined operands per step).
    bias = jnp.stack([b0t, b1t, b2t], axis=0)             # (3, O, 1)
    w12 = jnp.stack([w1t, w2t], axis=0)                   # (2, O, O)

    # Factorized ExponentialModulation (t is linspace(0,1,seq_len), t[0]==0):
    #   exp(nad * t[i*tL + j]) == exp(nad * t[i*tL]) * exp(nad * t[j])
    table = jnp.exp(nad[:, :, None] * t[:tL][None, None, :])      # (C, D, tL)
    t0 = t[::tL]                                                   # (num_tiles,)
    base = jnp.exp(nad[None, :, :] * t0[:, None, None])            # (num_tiles, C, D)

    # Explicit VMEM budget (lifts the scoped default; stays within v7x 64 MiB).
    blocked_bytes = 4 * tL * (E + 2 * C * D)                       # z + table + out block
    const_bytes = 4 * (O * E + 3 * O + 2 * O * O + C * D * O + C * D * num_tiles)
    tmp_bytes = 4 * tL * (4 * O + 3 * C * D)                       # in-kernel temporaries
    est = 2 * (blocked_bytes + const_bytes) + tmp_bytes + (1 << 20)
    vmem_limit_bytes = int(min(64 << 20, max(32 << 20, 2 * est)))

    grid = (num_tiles,)
    full2 = lambda i: (0, 0)
    full3 = lambda i: (0, 0, 0)

    out = pl.pallas_call(
        partial(hyena_filter_kernel, shift=float(shift), mxu_dtype=mxu_dtype),
        out_shape=jax.ShapeDtypeStruct((C, D, L), out_dtype),
        grid_spec=pltpu.PrefetchScalarGridSpec(
            num_scalar_prefetch=0,
            grid=grid,
            in_specs=[
                pl.BlockSpec((E, tL), lambda i: (0, i)),        # z^T, blocked over L
                pl.BlockSpec((O, E), full2),                    # w0^T (freq folded)
                pl.BlockSpec((3, O, 1), full3),                 # b0^T,b1^T,b2^T packed
                pl.BlockSpec((2, O, O), full3),                 # w1^T,w2^T packed
                pl.BlockSpec((C * D, O), full2),                # wout^T
                pl.BlockSpec((C, D, tL), full3),                # intra-tile decay table
                pl.BlockSpec((1, C, D), lambda i: (i, 0, 0)),   # per-tile decay base
            ],
            out_specs=pl.BlockSpec((C, D, tL), lambda i: (0, 0, i)),
        ),
        compiler_params=pltpu.CompilerParams(
            dimension_semantics=("parallel",),
            vmem_limit_bytes=vmem_limit_bytes),
    )(zT, w0t, bias, w12, woutT, table, base)
    return out


# ------------------------- parameter construction -------------------------- #
def make_params(key, *, d_model, channels, emb_dim, order, seq_len, w=1.0,
                fast_decay_pct=0.3, slow_decay_pct=1.5, target=0.01):
    # PositionalEmbedding buffers
    t_lin = jnp.linspace(0.0, 1.0, seq_len)[:, None]                     # (S, 1)
    bands = (emb_dim - 1) // 2
    t_rescaled = jnp.linspace(0.0, seq_len - 1, seq_len)[:, None]        # (S, 1)
    w_ang = 2.0 * math.pi * t_rescaled / seq_len                         # (S, 1)
    f = jnp.linspace(1e-4, float(bands - 1), bands)[None, :]             # (1, bands)
    theta = f * w_ang                                                    # (S, bands)
    z_real = jnp.cos(theta)                                              # Re(exp(-i f w))
    z_imag = -jnp.sin(theta)                                             # Im(exp(-i f w))
    z = jnp.concatenate([t_lin, z_real, z_imag], axis=-1)                # (S, emb_dim)

    # MLP weights (deterministic, PyTorch-Linear-like uniform init), stored as (in, out)
    k0, k1, k2, k3, k4, k5, k6 = jax.random.split(key, 7)
    def lin_w(k, fan_in, fan_out):
        bound = 1.0 / math.sqrt(fan_in)
        return jax.random.uniform(k, (fan_in, fan_out), jnp.float32, -bound, bound)
    def lin_b(k, fan_in, fan_out):
        bound = 1.0 / math.sqrt(fan_in)
        return jax.random.uniform(k, (1, fan_out), jnp.float32, -bound, bound)

    params = dict(
        z=z.astype(jnp.float32),
        t=t_lin.astype(jnp.float32),
        w0=lin_w(k0, emb_dim, order), b0=lin_b(k1, emb_dim, order),
        w1=lin_w(k2, order, order),   b1=lin_b(k3, order, order),
        w2=lin_w(k4, order, order),   b2=lin_b(k5, order, order),
        wout=lin_w(k6, order, d_model * channels),
        freq=(w * jnp.ones((1, order), jnp.float32)),
    )
    # ExponentialModulation deltas: (channels, d_model)
    max_decay = math.log(target) / fast_decay_pct
    min_decay = math.log(target) / slow_decay_pct
    deltas = jnp.linspace(min_decay, max_decay, d_model)[None, :].repeat(channels, axis=0)
    params["deltas"] = deltas.astype(jnp.float32)
    return params


# --------------------------- pure-JAX reference ----------------------------- #
def reference_forward(L, params, *, shift=0.0):
    z, t = params["z"][:L], params["t"][:L]
    freq = params["freq"]
    h = jnp.sin(freq * (z @ params["w0"] + params["b0"]))
    h = jnp.sin(freq * (h @ params["w1"] + params["b1"]))
    h = jnp.sin(freq * (h @ params["w2"] + params["b2"]))
    h = h @ params["wout"]                                   # (L, C*D)
    C, D = params["deltas"].shape
    h = h.reshape(L, C, D).transpose(1, 0, 2)                # (C, L, D)
    decay = jnp.exp(-t[None, :, :] * jnp.abs(params["deltas"])[:, None, :])
    h = h * (decay + shift)
    return jnp.transpose(h, (0, 2, 1))                       # (C, D, L)


# ----------------------------------- main ----------------------------------- #
if __name__ == "__main__":
    d_model, channels, emb_dim, order = 32, 2, 3, 16
    seq_len = 256
    L = 256

    params = make_params(jax.random.PRNGKey(0),
                         d_model=d_model, channels=channels,
                         emb_dim=emb_dim, order=order, seq_len=seq_len)

    ref0 = reference_forward(L, params, shift=0.0)
    refs = reference_forward(L, params, shift=0.25)

    # 1) Auto tile: small L collapses to grid=(1,), tL=L (no per-step overhead).
    k = hyena_filter_forward(L, params, shift=0.0)
    k = jax.block_until_ready(k)
    assert k.shape == (channels, d_model, L), k.shape
    assert jnp.allclose(k, ref0, rtol=1e-3, atol=1e-3), \
        float(jnp.max(jnp.abs(k - ref0)))

    # 2) Multi-tile path (exercises the factorized decay across grid steps).
    k2 = hyena_filter_forward(L, params, shift=0.0, tL=128)
    k2 = jax.block_until_ready(k2)
    assert jnp.allclose(k2, ref0, rtol=1e-3, atol=1e-3), \
        float(jnp.max(jnp.abs(k2 - ref0)))

    # 3) Non-zero shift branch.
    k3 = hyena_filter_forward(L, params, shift=0.25, tL=128)
    k3 = jax.block_until_ready(k3)
    assert jnp.allclose(k3, refs, rtol=1e-3, atol=1e-3), \
        float(jnp.max(jnp.abs(k3 - refs)))

    print("KERNEL_OK")
</pallas_src>

<mosaic_0001>
module attributes {stable_mosaic.version = 11 : i64} {
  func.func @hyena_filter_kernel(%arg0: i32, %arg1: memref<3x256xf32, #tpu.memory_space<vmem>>, %arg2: memref<16x3xf32, #tpu.memory_space<vmem>>, %arg3: memref<3x16x1xf32, #tpu.memory_space<vmem>>, %arg4: memref<2x16x16xf32, #tpu.memory_space<vmem>>, %arg5: memref<64x16xf32, #tpu.memory_space<vmem>>, %arg6: memref<2x32x256xf32, #tpu.memory_space<vmem>>, %arg7: memref<1x2x32xf32, #tpu.memory_space<vmem>>, %arg8: memref<2x32x256xf32, #tpu.memory_space<vmem>>) attributes {dimension_semantics = [#tpu.dimension_semantics<parallel>], iteration_bounds = array<i64: 1>, scalar_prefetch = 0 : i64, scratch_operands = 0 : i64, tpu.core_type = #tpu.core_type<tc>, window_params = [{transform_indices = @transform_0, window_bounds = array<i64: 3, 256>}, {pipeline_mode = #tpu.pipeline_mode<synchronous>, transform_indices = @transform_1, window_bounds = array<i64: 16, 3>}, {pipeline_mode = #tpu.pipeline_mode<synchronous>, transform_indices = @transform_2, window_bounds = array<i64: 3, 16, 1>}, {pipeline_mode = #tpu.pipeline_mode<synchronous>, transform_indices = @transform_3, window_bounds = array<i64: 2, 16, 16>}, {pipeline_mode = #tpu.pipeline_mode<synchronous>, transform_indices = @transform_4, window_bounds = array<i64: 64, 16>}, {pipeline_mode = #tpu.pipeline_mode<synchronous>, transform_indices = @transform_5, window_bounds = array<i64: 2, 32, 256>}, {transform_indices = @transform_6, window_bounds = array<i64: 1, 2, 32>}, {transform_indices = @transform_7, window_bounds = array<i64: 2, 32, 256>}]} {
    %c0 = arith.constant 0 : index
    %c0_0 = arith.constant 0 : index
    %0 = vector.load %arg1[%c0, %c0_0] : memref<3x256xf32, #tpu.memory_space<vmem>>, vector<3x256xf32>
    %c0_1 = arith.constant 0 : index
    %c0_2 = arith.constant 0 : index
    %1 = vector.load %arg2[%c0_1, %c0_2] : memref<16x3xf32, #tpu.memory_space<vmem>>, vector<16x3xf32>
    %c0_3 = arith.constant 0 : index
    %c0_4 = arith.constant 0 : index
    %c0_5 = arith.constant 0 : index
    %2 = vector.load %arg3[%c0_3, %c0_4, %c0_5] : memref<3x16x1xf32, #tpu.memory_space<vmem>>, vector<1x16x1xf32>
    %3 = vector.shape_cast %2 : vector<1x16x1xf32> to vector<16x1xf32>
    %4 = vector.extract_strided_slice %1 {offsets = [0, 0], sizes = [16, 1], strides = [1, 1]} : vector<16x3xf32> to vector<16x1xf32>
    %5 = vector.extract_strided_slice %0 {offsets = [0, 0], sizes = [1, 256], strides = [1, 1]} : vector<3x256xf32> to vector<1x256xf32>
    %6 = vector.broadcast %4 : vector<16x1xf32> to vector<16x256xf32>
    %7 = vector.broadcast %5 : vector<1x256xf32> to vector<16x256xf32>
    %8 = arith.mulf %6, %7 : vector<16x256xf32>
    %9 = vector.broadcast %3 : vector<16x1xf32> to vector<16x256xf32>
    %10 = arith.addf %9, %8 : vector<16x256xf32>
    %11 = vector.extract_strided_slice %1 {offsets = [0, 1], sizes = [16, 1], strides = [1, 1]} : vector<16x3xf32> to vector<16x1xf32>
    %12 = vector.extract_strided_slice %0 {offsets = [1, 0], sizes = [1, 256], strides = [1, 1]} : vector<3x256xf32> to vector<1x256xf32>
    %13 = vector.broadcast %11 : vector<16x1xf32> to vector<16x256xf32>
    %14 = vector.broadcast %12 : vector<1x256xf32> to vector<16x256xf32>
    %15 = arith.mulf %13, %14 : vector<16x256xf32>
    %16 = arith.addf %10, %15 : vector<16x256xf32>
    %17 = vector.extract_strided_slice %1 {offsets = [0, 2], sizes = [16, 1], strides = [1, 1]} : vector<16x3xf32> to vector<16x1xf32>
    %18 = vector.extract_strided_slice %0 {offsets = [2, 0], sizes = [1, 256], strides = [1, 1]} : vector<3x256xf32> to vector<1x256xf32>
    %19 = vector.broadcast %17 : vector<16x1xf32> to vector<16x256xf32>
    %20 = vector.broadcast %18 : vector<1x256xf32> to vector<16x256xf32>
    %21 = arith.mulf %19, %20 : vector<16x256xf32>
    %22 = arith.addf %16, %21 : vector<16x256xf32>
    %23 = math.sin %22 : vector<16x256xf32>
    %c0_6 = arith.constant 0 : index
    %c0_7 = arith.constant 0 : index
    %c0_8 = arith.constant 0 : index
    %24 = vector.load %arg4[%c0_6, %c0_7, %c0_8] : memref<2x16x16xf32, #tpu.memory_space<vmem>>, vector<1x16x16xf32>
    %25 = vector.shape_cast %24 : vector<1x16x16xf32> to vector<16x16xf32>
    %cst = arith.constant dense<0.000000e+00> : vector<16x256xf32>
    %26 = tpu.matmul %25, %23, %cst {dimension_numbers = #tpu.dot_dimension_numbers<[1], [0], [0], [1], [0, 0, 1, 1], [], []>} : vector<16x16xf32>, vector<16x256xf32>, vector<16x256xf32> -> vector<16x256xf32>
    %c1 = arith.constant 1 : index
    %c0_9 = arith.constant 0 : index
    %c0_10 = arith.constant 0 : index
    %27 = vector.load %arg3[%c1, %c0_9, %c0_10] : memref<3x16x1xf32, #tpu.memory_space<vmem>>, vector<1x16x1xf32>
    %28 = vector.shape_cast %27 : vector<1x16x1xf32> to vector<16x1xf32>
    %29 = vector.broadcast %28 : vector<16x1xf32> to vector<16x256xf32>
    %30 = arith.addf %26, %29 : vector<16x256xf32>
    %31 = math.sin %30 : vector<16x256xf32>
    %c1_11 = arith.constant 1 : index
    %c0_12 = arith.constant 0 : index
    %c0_13 = arith.constant 0 : index
    %32 = vector.load %arg4[%c1_11, %c0_12, %c0_13] : memref<2x16x16xf32, #tpu.memory_space<vmem>>, vector<1x16x16xf32>
    %33 = vector.shape_cast %32 : vector<1x16x16xf32> to vector<16x16xf32>
    %cst_14 = arith.constant dense<0.000000e+00> : vector<16x256xf32>
    %34 = tpu.matmul %33, %31, %cst_14 {dimension_numbers = #tpu.dot_dimension_numbers<[1], [0], [0], [1], [0, 0, 1, 1], [], []>} : vector<16x16xf32>, vector<16x256xf32>, vector<16x256xf32> -> vector<16x256xf32>
    %c2 = arith.constant 2 : index
    %c0_15 = arith.constant 0 : index
    %c0_16 = arith.constant 0 : index
    %35 = vector.load %arg3[%c2, %c0_15, %c0_16] : memref<3x16x1xf32, #tpu.memory_space<vmem>>, vector<1x16x1xf32>
    %36 = vector.shape_cast %35 : vector<1x16x1xf32> to vector<16x1xf32>
    %37 = vector.broadcast %36 : vector<16x1xf32> to vector<16x256xf32>
    %38 = arith.addf %34, %37 : vector<16x256xf32>
    %39 = math.sin %38 : vector<16x256xf32>
    %c0_17 = arith.constant 0 : index
    %c0_18 = arith.constant 0 : index
    %40 = vector.load %arg5[%c0_17, %c0_18] : memref<64x16xf32, #tpu.memory_space<vmem>>, vector<64x16xf32>
    %cst_19 = arith.constant dense<0.000000e+00> : vector<64x256xf32>
    %41 = tpu.matmul %40, %39, %cst_19 {dimension_numbers = #tpu.dot_dimension_numbers<[1], [0], [0], [1], [0, 0, 1, 1], [], []>} : vector<64x16xf32>, vector<16x256xf32>, vector<64x256xf32> -> vector<64x256xf32>
    %42 = vector.shape_cast %41 : vector<64x256xf32> to vector<2x32x256xf32>
    %c0_20 = arith.constant 0 : index
    %c0_21 = arith.constant 0 : index
    %c0_22 = arith.constant 0 : index
    %43 = vector.load %arg7[%c0_20, %c0_21, %c0_22] : memref<1x2x32xf32, #tpu.memory_space<vmem>>, vector<1x2x32xf32>
    %44 = vector.shape_cast %43 : vector<1x2x32xf32> to vector<2x32xf32>
    %45 = vector.shape_cast %44 : vector<2x32xf32> to vector<2x32x1xf32>
    %c0_23 = arith.constant 0 : index
    %c0_24 = arith.constant 0 : index
    %c0_25 = arith.constant 0 : index
    %46 = vector.load %arg6[%c0_23, %c0_24, %c0_25] : memref<2x32x256xf32, #tpu.memory_space<vmem>>, vector<2x32x256xf32>
    %47 = vector.broadcast %45 : vector<2x32x1xf32> to vector<2x32x256xf32>
    %48 = arith.mulf %47, %46 : vector<2x32x256xf32>
    %49 = arith.mulf %42, %48 : vector<2x32x256xf32>
    %c0_26 = arith.constant 0 : index
    %c0_27 = arith.constant 0 : index
    %c0_28 = arith.constant 0 : index
    %50 = vector.load %arg8[%c0_26, %c0_27, %c0_28] : memref<2x32x256xf32, #tpu.memory_space<vmem>>, vector<2x32x256xf32>
    tpu.vector_store %arg8[%c0_26, %c0_27, %c0_28], %49 {strides = array<i32>} : memref<2x32x256xf32, #tpu.memory_space<vmem>>, vector<2x32x256xf32>,
    return
  }
  func.func @transform_0(%arg0: i32) -> (i32, i32) {
    %c0_i32 = arith.constant 0 : i32
    %c0_i32_0 = arith.constant 0 : i32
    return %c0_i32, %arg0 : i32, i32
  }
  func.func @transform_1(%arg0: i32) -> (i32, i32) {
    %c0_i32 = arith.constant 0 : i32
    %c0_i32_0 = arith.constant 0 : i32
    %c0_i32_1 = arith.constant 0 : i32
    return %c0_i32, %c0_i32_0 : i32, i32
  }
  func.func @transform_2(%arg0: i32) -> (i32, i32, i32) {
    %c0_i32 = arith.constant 0 : i32
    %c0_i32_0 = arith.constant 0 : i32
    %c0_i32_1 = arith.constant 0 : i32
    %c0_i32_2 = arith.constant 0 : i32
    return %c0_i32, %c0_i32_0, %c0_i32_1 : i32, i32, i32
  }
  func.func @transform_3(%arg0: i32) -> (i32, i32, i32) {
    %c0_i32 = arith.constant 0 : i32
    %c0_i32_0 = arith.constant 0 : i32
    %c0_i32_1 = arith.constant 0 : i32
    %c0_i32_2 = arith.constant 0 : i32
    return %c0_i32, %c0_i32_0, %c0_i32_1 : i32, i32, i32
  }
  func.func @transform_4(%arg0: i32) -> (i32, i32) {
    %c0_i32 = arith.constant 0 : i32
    %c0_i32_0 = arith.constant 0 : i32
    %c0_i32_1 = arith.constant 0 : i32
    return %c0_i32, %c0_i32_0 : i32, i32
  }
  func.func @transform_5(%arg0: i32) -> (i32, i32, i32) {
    %c0_i32 = arith.constant 0 : i32
    %c0_i32_0 = arith.constant 0 : i32
    %c0_i32_1 = arith.constant 0 : i32
    %c0_i32_2 = arith.constant 0 : i32
    return %c0_i32, %c0_i32_0, %c0_i32_1 : i32, i32, i32
  }
  func.func @transform_6(%arg0: i32) -> (i32, i32, i32) {
    %c0_i32 = arith.constant 0 : i32
    %c0_i32_0 = arith.constant 0 : i32
    %c0_i32_1 = arith.constant 0 : i32
    return %arg0, %c0_i32, %c0_i32_0 : i32, i32, i32
  }
  func.func @transform_7(%arg0: i32) -> (i32, i32, i32) {
    %c0_i32 = arith.constant 0 : i32
    %c0_i32_0 = arith.constant 0 : i32
    %c0_i32_1 = arith.constant 0 : i32
    return %c0_i32, %c0_i32_0, %arg0 : i32, i32, i32
  }
}

</mosaic_0001>

<bundles_post_ra>
// kernel: tpu_custom_call.1
= control target key start
LH: loop header
LB: loop body
LE: loop exit
PB: predicated region body
PF: predicated region fallthrough
CT: control target
= control target key end

     0   :  { %12 = vsyncpa [#allocation3], 0  ;;  %s4082_s0 = inlined_call_operand.vmem [shape: f32[3,256], index: 0, kind: input, shape index: {}]   ;;  %s4083_s1 = inlined_call_operand.vmem [shape: f32[16,3], index: 1, kind: input, shape index: {}]   ;;  %s4084_s2 = inlined_call_operand.vmem [shape: f32[3,16,1], index: 2, kind: input, shape index: {}]   ;;  %s4085_s3 = inlined_call_operand.vmem [shape: f32[2,16,16], index: 3, kind: input, shape index: {}]   ;;  %s4086_s4 = inlined_call_operand.vmem [shape: f32[64,16], index: 4, kind: input, shape index: {}]   ;;  %s4087_s5 = inlined_call_operand.hbm [shape: f32[2,32,256], index: 5, kind: input, shape index: {}]   ;;  %s4088_s6 = inlined_call_operand.vmem [shape: f32[1,2,32], index: 6, kind: input, shape index: {}]   ;;  %s4089_s7 = inlined_call_operand.hbm [shape: f32[2,32,256], index: 7, kind: output, shape index: {}]  }
   0x1   :  { %13 = vsyncpa [#allocation4], 0  ;;  %s28_s26 = sshll.u32 %s4087_s5, 4  ;;  %s2525_s27 = smov [#allocation2]   ;;  %s29_s26 = int_to_ptr.hbm [resolvable:$true] %s28_s26 }
   0x2   :  { %s30_s28 = sshll.u32 %s2525_s27, 4  ;;  %s2526_s29 = smov 256   ;;  %s31_s28 = int_to_ptr.vmem [resolvable:$true] %s30_s28 }
   0x3   :  { %s2527_s30 = smov 16  }
   0x4   :  { %36 = dma.hbm_to_vmem [thread:$0]  %s29_s26, 2048, %s31_s28, [#allocation3], %s2526_s29, %s2526_s29, %s2527_s30  }
   0x5   :  { %2521 = dma.done.wait [#allocation3], 2048  }
   0x6   :  { %2522 = vsyncadd [#allocation3], 4294965248  ;;  %v2528_v0 = vmov 0   ;;  %v47_v1 = vld [vmem:[%s4084_s2 + $0x8] sm:$0xff]  ;;  %v46_v3 = vld [vmem:[%s4084_s2] sm:$0xff]  ;;  %v2529_v5 = vmov 1  }
   0x7   :  { %2455 = vset.pattern.permute.xlu1 %v2528_v0  ;;  %2454 = vset.pattern.permute.xlu0 %v2528_v0  ;;  %v45_v2 = vld [vmem:[%s4083_s1 + $0x8] sm:$0xff]  ;;  %v44_v4 = vld [vmem:[%s4083_s1] sm:$0xff]  ;;  %v2530_v6 = vmov 2   ;;  %s2358_s25 = sshll.u32 %s4089_s7, 4  ;;  %s2359_s25 = int_to_ptr.hbm [resolvable:$true] %s2358_s25 }
   0x8   :  { %2457 = vset.pattern.permute.xlu2 %v2528_v0  ;;  %76 = vperm.xlu1 %2455, %v47_v1   ;;  %v43_v9 = vld [vmem:[%s4082_s0] sm:$0x77] }
   0x9   :  { %55 = vperm.xlu0 %2454, %v45_v2   ;;  %71 = vperm.xlu2 %2457, %v46_v3   ;;  %v92_v11 = vperm.slane %v43_v9, 5  ;;  %v60_v12 = vperm.slane %v43_v9, 4  ;;  %v59_v13 = vperm.slane %v43_v9, 0  ;;  %v91_v15 = vperm.slane %v43_v9, 1 }
   0xa   :  { %v113_v24 = vperm.slane %v43_v9, 2  ;;  %v114_v25 = vperm.slane %v43_v9, 6 }
   0xb   :  { %v96_v14 = vperm.slane %v92_v11, 1  ;;  %v64_v17 = vperm.slane %v60_v12, 0  ;;  %v63_v18 = vperm.slane %v59_v13, 0  ;;  %v95_v23 = vperm.slane %v91_v15, 1 }
   0xc   :  { %v117_v33 = vperm.slane %v113_v24, 2  ;;  %v118_v34 = vperm.slane %v114_v25, 2  ;;  %v2533_v24 = vmov 2131351028  }
  0x10   :  { %2456 = vset.pattern.permute.xlu1 %v2529_v5 }
  0x11   :  { %50 = vperm.xlu0 %2454, %v44_v4   ;;  %88 = vperm.xlu1 %2456, %v45_v2  }
  0x12   :  { %2458 = vset.pattern.permute.xlu2 %v2529_v5 }
  0x13   :  { %84 = vperm.xlu2 %2458, %v44_v4  }
  0x19   :  { %2459 = vset.pattern.permute.xlu0 %v2530_v6  ;;  %2460 = vset.pattern.permute.xlu1 %v2530_v6 }
  0x1a   :  { %110 = vperm.xlu0 %2459, %v45_v2   ;;  %106 = vperm.xlu1 %2460, %v44_v4  }
  0x1b   :  { %2461 = vset.pattern.permute.xlu2 %v2528_v0 }
  0x22   :  { %2463 = vset.pattern.permute.xlu0 %v2528_v0  ;;  %2462 = vset.pattern.permute.xlu1 %v2528_v0 }
  0x63   :  { %v72_v7 = vpop.permute.xlu2 %71 }
  0x6d   :  { %v85_v16 = vpop.permute.xlu2 %84 }
  0x6e   :  { %v98_v22 = vmul.f32 %v96_v14, %v85_v16  ;;  %v97_v36 = vmul.f32 %v95_v23, %v85_v16 }
  0x7a   :  { %v77_v10 = vpop.permute.xlu1 %76 }
  0x7b   :  { %v56_v8 = vpop.permute.xlu0 %55 }
  0x7c   :  { %v67_v28 = vmul.f32 %v63_v18, %v56_v8  ;;  %v68_v29 = vmul.f32 %v64_v17, %v56_v8 }
  0x7e   :  { %v81_v37 = vadd.f32 %v77_v10, %v67_v28  ;;  %v82_v38 = vadd.f32 %v77_v10, %v68_v29  ;;  %v2534_v28 = vmov 2102212464  }
  0x83   :  { %v51_v19 = vpop.permute.xlu0 %50  ;;  %v89_v21 = vpop.permute.xlu1 %88 }
  0x84   :  { %v66_v20 = vmul.f32 %v64_v17, %v51_v19  ;;  %v65_v26 = vmul.f32 %v63_v18, %v51_v19  ;;  %v99_v31 = vmul.f32 %v95_v23, %v89_v21  ;;  %v100_v32 = vmul.f32 %v96_v14, %v89_v21 }
  0x85   :  { %v2531_v19 = vmov 683565275   ;;  %v2532_v21 = vmov 2475754826  }
  0x86   :  { %v80_v27 = vadd.f32 %v72_v7, %v66_v20  ;;  %v79_v35 = vadd.f32 %v72_v7, %v65_v26  ;;  %v103_v40 = vadd.f32 %v99_v31, %v81_v37  ;;  %v104_v41 = vadd.f32 %v100_v32, %v82_v38 }
  0x88   :  { %v102_v30 = vadd.f32 %v98_v22, %v80_v27  ;;  %v101_v45 = vadd.f32 %v97_v36, %v79_v35 }
  0x8c   :  { %v111_v39 = vpop.permute.xlu0 %110  ;;  %v107_v44 = vpop.permute.xlu1 %106 }
  0x8d   :  { %v121_v42 = vmul.f32 %v117_v33, %v111_v39  ;;  %v122_v43 = vmul.f32 %v118_v34, %v111_v39  ;;  %v119_v46 = vmul.f32 %v117_v33, %v107_v44  ;;  %v120_v47 = vmul.f32 %v118_v34, %v107_v44 }
  0x8e   :  { %v2535_v34 = vmov 920167782   ;;  %v2536_v39 = vmov 1326507024  }
  0x8f   :  { %v2605_v48 = vadd.f32 %v121_v42, %v103_v40  ;;  %v2607_v49 = vadd.f32 %v122_v43, %v104_v41  ;;  %v2609_v50 = vadd.f32 %v119_v46, %v101_v45  ;;  %v2611_v51 = vadd.f32 %v120_v47, %v102_v30 }
  0x91   :  { %v440_v52 = vand.u32 2139095040, %v2605_v48  ;;  %v595_v53 = vand.u32 2139095040, %v2607_v49  ;;  %v437_v54 = vand.u32 2147483647, %v2605_v48  ;;  %v130_v55 = vand.u32 2139095040, %v2609_v50 }
  0x92   :  { %v285_v56 = vand.u32 2139095040, %v2611_v51  ;;  %v592_v63 = vand.u32 2147483647, %v2607_v49 }
  0x93   :  { %v441_v57 = vshrl.u32 %v440_v52, 23  ;;  %v596_v58 = vshrl.u32 %v595_v53, 23  ;;  %v444_v59 = vand.u32 8388607, %v437_v54  ;;  %v131_v60 = vshrl.u32 %v130_v55, 23 }
  0x94   :  { %v286_v2 = vshrl.u32 %v285_v56, 23  ;;  %v599_v7 = vand.u32 8388607, %v592_v63 }
  0x95   :  { %v2377_v61 = vadd.s32 4294967169, %v441_v57  ;;  %v2380_v62 = vadd.s32 4294967169, %v596_v58  ;;  %v2371_v1 = vadd.s32 4294967169, %v131_v60  ;;  %v445_v3 = vor.u32 8388608, %v444_v59 }
  0x96   :  { %v2374_v9 = vadd.s32 4294967169, %v286_v2  ;;  %v600_v14 = vor.u32 8388608, %v599_v7 }
  0x97   :  { %v447_v4 = vadd.s32 1, %v2377_v61  ;;  %v602_v5 = vadd.s32 1, %v2380_v62  ;;  %v137_v6 = vadd.s32 1, %v2371_v1  ;;  %v2623_v10 = vshll.u32 %v445_v3, 8 }
  0x98   :  { %v2627_v17 = vadd.s32 1, %v2374_v9  ;;  %v2652_v61 = vshll.u32 %v600_v14, 8 }
  0x99   :  { %vm448_vm0 = vcmp.gt.s32.totalorder %v447_v4, 0  ;;  %vm603_vm1 = vcmp.gt.s32.totalorder %v602_v5, 0  ;;  %vm138_vm2 = vcmp.gt.s32.totalorder %v137_v6, 0  ;;  %v486_v18 = vand.u32 65535, %v2623_v10 }
  0x9a   :  { %v449_v8 = vsel %vm448_vm0, %v447_v4, 0  ;;  %v604_v12 = vsel %vm603_vm1, %v602_v5, 0  ;;  %v2634_v26 = vsel %vm138_vm2, %v137_v6, 0  ;;  %v487_v30 = vshrl.u32 %v2623_v10, 16 }
  0x9b   :  { %v451_v11 = vand.u32 31, %v449_v8  ;;  %v450_v15 = vshrl.u32 %v449_v8, 5  ;;  %v2625_v16 = vand.u32 31, %v604_v12  ;;  %v2649_v58 = vshrl.u32 %v604_v12, 5 }
  0x9c   :  { %v2658_v4 = vand.u32 31, %v2634_v26  ;;  %vm293_vm0 = vcmp.gt.s32.totalorder %v2627_v17, 0 }
  0x9d   :  { %v452_v13 = vsub.s32 32, %v451_v11  ;;  %v454_v20 = vshll.u32 %v2531_v19, %v451_v11  ;;  %v457_v23 = vshll.u32 %v2532_v21, %v451_v11  ;;  %v460_v27 = vshll.u32 %v2533_v24, %v451_v11 }
  0x9e   :  { %v463_v33 = vshll.u32 %v2534_v28, %v451_v11  ;;  %v2642_v36 = vsub.s32 32, %v2625_v16  ;;  %v466_v38 = vshll.u32 %v2535_v34, %v451_v11  ;;  %vm469_vm3 = vcmp.lt.s32.totalorder %v450_v15, 1 }
  0x9f   :  { %v455_v22 = vshrl.u32 %v2532_v21, %v452_v13  ;;  %v458_v25 = vshrl.u32 %v2533_v24, %v452_v13  ;;  %v461_v29 = vshrl.u32 %v2534_v28, %v452_v13  ;;  %v464_v35 = vshrl.u32 %v2535_v34, %v452_v13 }
  0xa0   :  { %v467_v40 = vshrl.u32 %v2536_v39, %v452_v13  ;;  %v453_v41 = vshrl.u32 %v2531_v19, %v452_v13  ;;  %vm472_vm4 = vcmp.lt.s32.totalorder %v450_v15, 4  ;;  %vm470_vm5 = vcmp.lt.s32.totalorder %v450_v15, 2 }
  0xa1   :  { %v456_v31 = vor.u32 %v455_v22, %v454_v20  ;;  %v459_v32 = vor.u32 %v458_v25, %v457_v23  ;;  %v462_v37 = vor.u32 %v461_v29, %v460_v27  ;;  %v465_v42 = vor.u32 %v464_v35, %v463_v33 }
  0xa2   :  { %v468_v43 = vor.u32 %v467_v40, %v466_v38  ;;  %vm471_vm6 = vcmp.lt.s32.totalorder %v450_v15, 3  ;;  %v610_v57 = vshrl.u32 %v2532_v21, %v2642_v36  ;;  %v609_v3 = vshll.u32 %v2531_v19, %v2625_v16 }
  0xa3   :  { %v474_v44 = vsel %vm472_vm4, %v462_v37, 2102212464  ;;  %v477_v45 = vsel %vm469_vm3, %v456_v31, %v459_v32  ;;  %v473_v46 = vsel %vm469_vm3, %v453_v41, %v456_v31  ;;  %v478_v47 = vsel %vm472_vm4, %v465_v42, 920167782 }
  0xa4   :  { %v481_v52 = vsel %vm469_vm3, %v459_v32, %v462_v37  ;;  %v475_v53 = vsel %vm471_vm6, %v459_v32, %v474_v44  ;;  %v479_v55 = vsel %vm471_vm6, %v462_v37, %v478_v47  ;;  %v482_v56 = vsel %vm472_vm4, %v468_v43, 1326507024 }
  0xa5   :  { %v480_v59 = vsel %vm470_vm5, %v477_v45, %v479_v55  ;;  %v483_v60 = vsel %vm471_vm6, %v465_v42, %v482_v56  ;;  %v2661_v5 = vsel %vm470_vm5, %v473_v46, %v475_v53  ;;  %v2663_v11 = vor.u32 %v610_v57, %v609_v3 }
  0xa6   :  { %v484_v62 = vsel %vm470_vm5, %v481_v52, %v483_v60  ;;  %v510_v1 = vand.u32 65535, %v480_v59  ;;  %v511_v2 = vshrl.u32 %v480_v59, 16  ;;  %v612_v12 = vshll.u32 %v2532_v21, %v2625_v16 }
  0xa7   :  { %v488_v6 = vand.u32 65535, %v484_v62  ;;  %v489_v7 = vshrl.u32 %v484_v62, 16  ;;  %v613_v20 = vshrl.u32 %v2533_v24, %v2642_v36  ;;  %v615_v22 = vshll.u32 %v2533_v24, %v2625_v16 }
  0xa8   :  { %v513_v8 = vmul.u32 %v511_v2, %v486_v18  ;;  %v514_v9 = vmul.u32 %v510_v1, %v487_v30  ;;  %v512_v23 = vmul.u32 %v510_v1, %v486_v18  ;;  %v515_v25 = vmul.u32 %v511_v2, %v487_v30 }
  0xa9   :  { %v491_v13 = vmul.u32 %v489_v7, %v486_v18  ;;  %v492_v14 = vmul.u32 %v488_v6, %v487_v30  ;;  %v490_v15 = vmul.u32 %v488_v6, %v486_v18  ;;  %v493_v29 = vmul.u32 %v489_v7, %v487_v30 }
  0xaa   :  { %v516_v27 = vshll.u32 %v513_v8, 16  ;;  %v517_v32 = vshrl.u32 %v513_v8, 16  ;;  %v518_v33 = vshll.u32 %v514_v9, 16  ;;  %v519_v37 = vshrl.u32 %v514_v9, 16 }
  0xab   :  { %v494_v31 = vshll.u32 %v491_v13, 16  ;;  %v496_v35 = vshll.u32 %v492_v14, 16  ;;  %v616_v42 = vshrl.u32 %v2534_v28, %v2642_v36  ;;  %v495_v43 = vshrl.u32 %v491_v13, 16 }
  0xac   :  { %vm520_vm7 = vc.u32 %v512_v23, %v516_v27  ;;  %v522_v38 = vadd.s32 %v516_v27, %v512_v23  ;;  %v2676_v46 = vor.u32 %v613_v20, %v612_v12  ;;  %v618_v53 = vshll.u32 %v2534_v28, %v2625_v16 }
  0xad   :  { %vm498_vm8 = vc.u32 %v490_v15, %v494_v31  ;;  %v500_v40 = vadd.s32 %v494_v31, %v490_v15  ;;  %v521_v41 = vsel %vm520_vm7, 1, %v2528_v0  ;;  %v619_v55 = vshrl.u32 %v2535_v34, %v2642_v36 }
  0xae   :  { %v499_v18 = vsel %vm498_vm8, 1, %v2528_v0  ;;  %v523_v44 = vadd.s32 %v521_v41, %v515_v25  ;;  %vm524_vm9 = vc.u32 %v522_v38, %v518_v33  ;;  %v617_v57 = vor.u32 %v616_v42, %v615_v22 }
  0xaf   :  { %v501_v30 = vadd.s32 %v499_v18, %v493_v29  ;;  %vm502_vm10 = vc.u32 %v500_v40, %v496_v35  ;;  %v525_v45 = vsel %vm524_vm9, 1, %v2528_v0  ;;  %v621_v59 = vshll.u32 %v2535_v34, %v2625_v16 }
  0xb0   :  { %v503_v47 = vsel %vm502_vm10, 1, %v2528_v0  ;;  %v527_v52 = vadd.s32 %v525_v45, %v523_v44  ;;  %v622_v60 = vshrl.u32 %v2536_v39, %v2642_v36  ;;  %v497_v62 = vshrl.u32 %v492_v14, 16 }
  0xb1   :  { %v505_v56 = vadd.s32 %v503_v47, %v501_v30  ;;  %v2687_v1 = vadd.s32 %v522_v38, %v518_v33  ;;  %v620_v3 = vor.u32 %v619_v55, %v618_v53  ;;  %vm624_vm11 = vcmp.lt.s32.totalorder %v2649_v58, 1 }
  0xb2   :  { %v528_v2 = vadd.s32 %v527_v52, %v517_v32  ;;  %v623_v7 = vor.u32 %v622_v60, %v621_v59  ;;  %vm627_vm12 = vcmp.lt.s32.totalorder %v2649_v58, 4  ;;  %vm626_vm13 = vcmp.lt.s32.totalorder %v2649_v58, 3 }
  0xb3   :  { %v506_v6 = vadd.s32 %v505_v56, %v495_v43  ;;  %v632_v16 = vsel %vm624_vm11, %v2663_v11, %v2676_v46  ;;  %v633_v9 = vsel %vm627_vm12, %v620_v3, 920167782  ;;  %vm625_vm14 = vcmp.lt.s32.totalorder %v2649_v58, 2 }
  0xb4   :  { %v529_v8 = vadd.s32 %v528_v2, %v519_v37  ;;  %v634_v13 = vsel %vm626_vm13, %v617_v57, %v633_v9  ;;  %v636_v14 = vsel %vm624_vm11, %v2676_v46, %v617_v57  ;;  %v530_v20 = vmul.u32 %v2623_v10, %v2661_v5 }
  0xb5   :  { %v2698_v12 = vadd.s32 %v506_v6, %v497_v62  ;;  %v635_v15 = vsel %vm625_vm14, %v632_v16, %v634_v13  ;;  %v637_v23 = vsel %vm627_vm12, %v623_v7, 1326507024  ;;  %v641_v27 = vand.u32 65535, %v2652_v61 }
  0xb6   :  { %v533_v22 = vadd.s32 1, %v529_v8  ;;  %v638_v25 = vsel %vm626_vm13, %v620_v3, %v637_v23  ;;  %v642_v29 = vshrl.u32 %v2652_v61, 16  ;;  %v665_v5 = vand.u32 65535, %v635_v15 }
  0xb7   :  { %vm532_vm15 = vc.u32 %v2698_v12, %v2687_v1  ;;  %v639_v10 = vsel %vm625_vm14, %v636_v14, %v638_v25  ;;  %v666_v32 = vshrl.u32 %v635_v15, 16  ;;  %v127_v41 = vand.u32 2147483647, %v2609_v50 }
  0xb8   :  { %v534_v31 = vsel %vm532_vm15, %v533_v22, %v529_v8  ;;  %v643_v35 = vand.u32 65535, %v639_v10  ;;  %v644_v37 = vshrl.u32 %v639_v10, 16  ;;  %v669_v40 = vmul.u32 %v665_v5, %v642_v29 }
  0xb9   :  { %v535_v33 = vadd.s32 %v534_v31, %v530_v20  ;;  %v668_v38 = vmul.u32 %v666_v32, %v641_v27  ;;  %v2723_v44 = vsub.s32 32, %v2658_v4  ;;  %v608_v30 = vshrl.u32 %v2531_v19, %v2642_v36 }
  0xba   :  { %v646_v43 = vmul.u32 %v644_v37, %v641_v27  ;;  %v647_v18 = vmul.u32 %v643_v35, %v642_v29  ;;  %v667_v45 = vmul.u32 %v665_v5, %v641_v27  ;;  %v629_v53 = vsel %vm627_vm12, %v617_v57, 2102212464 }
  0xbb   :  { %v536_v42 = vadd.s32 536870912, %v535_v33  ;;  %v671_v47 = vshll.u32 %v668_v38, 16  ;;  %v645_v55 = vmul.u32 %v643_v35, %v641_v27  ;;  %v648_v59 = vmul.u32 %v644_v37, %v642_v29 }
  0xbc   :  { %v649_v56 = vshll.u32 %v646_v43, 16  ;;  %v673_v60 = vshll.u32 %v669_v40, 16  ;;  %v651_v3 = vshll.u32 %v647_v18, 16  ;;  %v670_v7 = vmul.u32 %v666_v32, %v642_v29 }
  0xbd   :  { %v2727_v52 = vshrl.u32 %v536_v42, 30  ;;  %vm675_vm1 = vc.u32 %v667_v45, %v671_v47  ;;  %v677_v62 = vadd.s32 %v671_v47, %v667_v45  ;;  %v628_v57 = vsel %vm624_vm11, %v608_v30, %v2663_v11 }
  0xbe   :  { %vm653_vm2 = vc.u32 %v645_v55, %v649_v56  ;;  %v655_v6 = vadd.s32 %v649_v56, %v645_v55  ;;  %v676_v8 = vsel %vm675_vm1, 1, %v2528_v0  ;;  %v630_v13 = vsel %vm626_vm13, %v2676_v46, %v629_v53 }
  0xbf   :  { %v538_v2 = vshll.u32 %v2727_v52, 30  ;;  %v654_v36 = vsel %vm653_vm2, 1, %v2528_v0  ;;  %vm679_vm3 = vc.u32 %v677_v62, %v673_v60  ;;  %v678_v20 = vadd.s32 %v676_v8, %v670_v7 }
  0xc0   :  { %v656_v9 = vadd.s32 %v654_v36, %v648_v59  ;;  %vm657_vm4 = vc.u32 %v655_v6, %v651_v3  ;;  %v680_v22 = vsel %vm679_vm3, 1, %v2528_v0  ;;  %v650_v23 = vshrl.u32 %v646_v43, 16 }
  0xc1   :  { %v2734_v16 = vsub.s32 %v535_v33, %v538_v2  ;;  %v658_v14 = vsel %vm657_vm4, 1, %v2528_v0  ;;  %v294_v11 = vsel %vm293_vm0, %v2627_v17, 0  ;;  %v672_v27 = vshrl.u32 %v668_v38, 16 }
  0xc2   :  { %v660_v25 = vadd.s32 %v658_v14, %v656_v9  ;;  %v682_v29 = vadd.s32 %v680_v22, %v678_v20  ;;  %v134_v46 = vand.u32 8388607, %v127_v41  ;;  %v631_v10 = vsel %vm625_vm14, %v628_v57, %v630_v13 }
  0xc3   :  { %vm540_vm5 = vcmp.lt.s32.totalorder %v2734_v16, 0  ;;  %v541_v15 = vsub.s32 0, %v2734_v16  ;;  %v652_v5 = vshrl.u32 %v647_v18, 16  ;;  %v2755_v33 = vshrl.u32 %v2634_v26, 5 }
  0xc4   :  { %v661_v32 = vadd.s32 %v660_v25, %v650_v23  ;;  %v674_v37 = vshrl.u32 %v669_v40, 16  ;;  %v683_v42 = vadd.s32 %v682_v29, %v672_v27  ;;  %v531_v17 = vadd.s32 %v2687_v1, %v2698_v12 }
  0xc5   :  { %v542_v31 = vsel %vm540_vm5, %v541_v15, %v2734_v16  ;;  %v2761_v43 = vadd.s32 %v677_v62, %v673_v60  ;;  %v145_v30 = vshrl.u32 %v2532_v21, %v2723_v44  ;;  %v561_v18 = vsub.s32 4, %v2727_v52 }
  0xc6   :  { %v543_v35 = vclz %v542_v31  ;;  %v2759_v38 = vadd.s32 %v661_v32, %v652_v5  ;;  %v684_v45 = vadd.s32 %v683_v42, %v674_v37  ;;  %v685_v26 = vmul.u32 %v2652_v61, %v631_v10 }
  0xc7   :  { %v144_v40 = vshll.u32 %v2531_v19, %v2658_v4  ;;  %v147_v1 = vshll.u32 %v2532_v21, %v2658_v4  ;;  %v148_v12 = vshrl.u32 %v2533_v24, %v2723_v44  ;;  %vm439_vm7 = vcmp.lt.s32.totalorder %v2605_v48, 0 }
  0xc8   :  { %v2378_v58 = vadd.s32 4294967294, %v543_v35  ;;  %vm687_vm6 = vc.u32 %v2759_v38, %v2761_v43  ;;  %v688_v47 = vadd.s32 1, %v684_v45  ;;  %v151_v53 = vshrl.u32 %v2534_v28, %v2723_v44 }
  0xc9   :  { %v154_v61 = vshrl.u32 %v2535_v34, %v2723_v44  ;;  %v2780_v56 = vor.u32 %v145_v30, %v144_v40  ;;  %v153_v59 = vshll.u32 %v2534_v28, %v2658_v4  ;;  %v157_v60 = vshrl.u32 %v2536_v39, %v2723_v44 }
  0xca   :  { %vm2379_vm8 = vcmp.lt.s32.totalorder %v2378_v58, 0  ;;  %v689_v3 = vsel %vm687_vm6, %v688_v47, %v684_v45  ;;  %v150_v6 = vshll.u32 %v2533_v24, %v2658_v4  ;;  %vm2790_vm9 = vcmp.le.f32.partialorder %v437_v54, 0.7853982 }
  0xcb   :  { %v546_v55 = vsel %vm2379_vm8, 0, %v2378_v58  ;;  %v690_v7 = vadd.s32 %v689_v3, %v685_v26  ;;  %v149_v8 = vor.u32 %v148_v12, %v147_v1  ;;  %v155_v57 = vor.u32 %v154_v61, %v153_v59 }
  0xcc   :  { %v547_v62 = vsub.s32 32, %v546_v55  ;;  %v551_v2 = vsub.s32 4294967266, %v546_v55  ;;  %v156_v9 = vshll.u32 %v2535_v34, %v2658_v4  ;;  %v548_v13 = vshll.u32 %v2734_v16, %v546_v55 }
  0xcd   :  { %v152_v22 = vor.u32 %v151_v53, %v150_v6  ;;  %v691_v15 = vadd.s32 536870912, %v690_v7  ;;  %v135_v23 = vor.u32 8388608, %v134_v46  ;;  %vm162_vm10 = vcmp.lt.s32.totalorder %v2755_v33, 4 }
  0xce   :  { %v549_v14 = vshrl.u32 %v531_v17, %v547_v62  ;;  %v552_v20 = vadd.s32 127, %v551_v2  ;;  %v158_v25 = vor.u32 %v157_v60, %v156_v9  ;;  %v2798_v54 = vshrl.u32 %v294_v11, 5 }
  0xcf   :  { %v168_v31 = vsel %vm162_vm10, %v155_v57, 920167782  ;;  %v2802_v10 = vand.u32 31, %v294_v11  ;;  %v2804_v4 = vshrl.u32 %v691_v15, 30  ;;  %vm159_vm11 = vcmp.lt.s32.totalorder %v2755_v33, 1 }
  0xd0   :  { %v550_v27 = vor.u32 %v549_v14, %v548_v13  ;;  %v553_v29 = vshll.u32 %v552_v20, 23  ;;  %vm161_vm12 = vcmp.lt.s32.totalorder %v2755_v33, 3  ;;  %v167_v46 = vsel %vm159_vm11, %v2780_v56, %v149_v8 }
  0xd1   :  { %v169_v5 = vsel %vm161_vm12, %v152_v22, %v168_v31  ;;  %v171_v32 = vsel %vm159_vm11, %v149_v8, %v152_v22  ;;  %v562_v11 = vsel %vm439_vm7, %v561_v18, %v2727_v52  ;;  %v693_v35 = vshll.u32 %v2804_v4, 30 }
  0xd2   :  { %v554_v16 = vor.u32 4788187, %v553_v29  ;;  %v172_v37 = vsel %vm162_vm10, %v158_v25, 1326507024  ;;  %v2821_v42 = vshll.u32 %v135_v23, 8  ;;  %v557_v30 = vcvt.s32.f32 %v550_v27 }
  0xd3   :  { %vm160_vm13 = vcmp.lt.s32.totalorder %v2755_v33, 2  ;;  %v173_v58 = vsel %vm161_vm12, %v155_v57, %v172_v37  ;;  %v2827_v45 = vsub.s32 32, %v2802_v10  ;;  %v2829_v26 = vsub.s32 %v690_v7, %v693_v35 }
  0xd4   :  { %v555_v17 = vand.u32 2147483647, %v554_v16  ;;  %v170_v52 = vsel %vm160_vm13, %v167_v46, %v169_v5  ;;  %v174_v18 = vsel %vm160_vm13, %v171_v32, %v173_v58  ;;  %v564_v1 = vsel %vm2790_vm9, 0, %v562_v11 }
  0xd5   :  { %v176_v12 = vand.u32 65535, %v2821_v42  ;;  %v178_v47 = vand.u32 65535, %v174_v18  ;;  %vm695_vm14 = vcmp.lt.s32.totalorder %v2829_v26, 0  ;;  %v696_v53 = vsub.s32 0, %v2829_v26 }
  0xd6   :  { %v558_v40 = vmul.f32 %v557_v30, %v555_v17  ;;  %v177_v61 = vshrl.u32 %v2821_v42, 16  ;;  %v179_v55 = vshrl.u32 %v174_v18, 16  ;;  %v143_v60 = vshrl.u32 %v2531_v19, %v2723_v44 }
  0xd7   :  { %v164_v62 = vsel %vm162_vm10, %v152_v22, 2102212464  ;;  %v200_v2 = vand.u32 65535, %v170_v52  ;;  %v697_v3 = vsel %vm695_vm14, %v696_v53, %v2829_v26  ;;  %v201_v57 = vshrl.u32 %v170_v52, 16 }
  0xd8   :  { %v559_v59 = vxor.u32 2147483648, %v558_v40  ;;  %v181_v6 = vmul.u32 %v179_v55, %v176_v12  ;;  %v2846_v7 = vmul.u32 %v178_v47, %v177_v61  ;;  %v581_v13 = vadd.s32 3, %v564_v1 }
  0xd9   :  { %v686_v14 = vadd.s32 %v2761_v43, %v2759_v38  ;;  %v698_v20 = vclz %v697_v3  ;;  %v716_v22 = vsub.s32 4, %v2804_v4  ;;  %v163_v15 = vsel %vm159_vm11, %v143_v60, %v2780_v56 }
  0xda   :  { %v560_v9 = vsel %vm439_vm7, %v559_v59, %v558_v40  ;;  %v165_v23 = vsel %vm161_vm12, %v149_v8, %v164_v62  ;;  %v180_v38 = vmul.u32 %v178_v47, %v176_v12  ;;  %v184_v43 = vshll.u32 %v181_v6, 16 }
  0xdb   :  { %v2855_v44 = vsel %vm2790_vm9, %v2605_v48, %v560_v9  ;;  %v2381_v27 = vadd.s32 4294967294, %v698_v20  ;;  %v183_v29 = vmul.u32 %v179_v55, %v177_v61  ;;  %v186_v36 = vshll.u32 %v2846_v7, 16 }
  0xdc   :  { %v565_v25 = vmul.f32 %v2855_v44, %v2855_v44  ;;  %v202_v31 = vmul.u32 %v200_v2, %v176_v12  ;;  %v203_v16 = vmul.u32 %v201_v57, %v176_v12  ;;  %vm188_vm0 = vc.u32 %v180_v38, %v184_v43 }
  0xdd   :  { %vm2382_vm15 = vcmp.lt.s32.totalorder %v2381_v27, 0  ;;  %v189_v56 = vsel %vm188_vm0, 1, %v2528_v0  ;;  %v190_v11 = vadd.s32 %v184_v43, %v180_v38  ;;  %v204_v8 = vmul.u32 %v200_v2, %v177_v61 }
  0xde   :  { %v566_v46 = vmul.f32 -0.001358992, %v565_v25  ;;  %v573_v5 = vmul.f32 -0.00019511016, %v565_v25  ;;  %v701_v32 = vsel %vm2382_vm15, 0, %v2381_v27  ;;  %v206_v30 = vshll.u32 %v203_v16, 16 }
  0xdf   :  { %v702_v17 = vsub.s32 32, %v701_v32  ;;  %vm594_vm1 = vcmp.lt.s32.totalorder %v2607_v49, 0  ;;  %v706_v58 = vsub.s32 4294967266, %v701_v32  ;;  %v185_v52 = vshrl.u32 %v181_v6, 16 }
  0xe0   :  { %v567_v35 = vadd.f32 0.041655596, %v566_v46  ;;  %v574_v37 = vadd.f32 0.008332121, %v573_v5  ;;  %v191_v18 = vadd.s32 %v189_v56, %v183_v29  ;;  %vm192_vm2 = vc.u32 %v190_v11, %v186_v36 }
  0xe1   :  { %v704_v12 = vshrl.u32 %v686_v14, %v702_v17  ;;  %v193_v47 = vsel %vm192_vm2, 1, %v2528_v0  ;;  %v703_v53 = vshll.u32 %v2829_v26, %v701_v32  ;;  %v707_v55 = vadd.s32 127, %v706_v58 }
  0xe2   :  { %v568_v40 = vmul.f32 %v567_v35, %v565_v25  ;;  %v575_v1 = vmul.f32 %v574_v37, %v565_v25  ;;  %v195_v59 = vadd.s32 %v193_v47, %v191_v18  ;;  %v205_v60 = vmul.u32 %v201_v57, %v177_v61 }
  0xe3   :  { %vm2872_vm3 = vcmp.le.f32.partialorder %v592_v63, 0.7853982  ;;  %v208_v6 = vshll.u32 %v204_v8, 16  ;;  %vm210_vm4 = vc.u32 %v202_v31, %v206_v30  ;;  %v705_v9 = vor.u32 %v704_v12, %v703_v53 }
  0xe4   :  { %v569_v62 = vadd.f32 -0.4999988, %v568_v40  ;;  %v576_v2 = vadd.f32 -0.16666654, %v575_v1  ;;  %v708_v20 = vshll.u32 %v707_v55, 23  ;;  %v211_v14 = vsel %vm210_vm4, 1, %v2528_v0 }
  0xe5   :  { %v212_v27 = vadd.s32 %v206_v30, %v202_v31  ;;  %v196_v43 = vadd.s32 %v195_v59, %v185_v52  ;;  %v213_v29 = vadd.s32 %v211_v14, %v205_v60  ;;  %vm580_vm5 = vweird.f32 %v2605_v48 }
  0xe6   :  { %v570_v38 = vmul.f32 %v569_v62, %v565_v25  ;;  %v577_v26 = vmul.f32 %v576_v2, %v565_v25  ;;  %v582_v61 = vand.u32 3, %v581_v13  ;;  %v709_v57 = vor.u32 4788187, %v708_v20 }
  0xe7   :  { %v166_v63 = vsel %vm160_vm13, %v163_v15, %v165_v23  ;;  %vm214_vm6 = vc.u32 %v212_v27, %v208_v6  ;;  %v187_v5 = vshrl.u32 %v2846_v7, 16  ;;  %v712_v31 = vcvt.s32.f32 %v705_v9 }
  0xe8   :  { %v571_v36 = vadd.f32 1.0, %v570_v38  ;;  %v578_v46 = vadd.f32 1.0, %v577_v26  ;;  %v215_v32 = vsel %vm214_vm6, 1, %v2528_v0  ;;  %v710_v56 = vand.u32 2147483647, %v709_v57 }
  0xe9   :  { %v207_v11 = vshrl.u32 %v203_v16, 16  ;;  %v217_v25 = vadd.s32 %v215_v32, %v213_v29  ;;  %v717_v33 = vsel %vm594_vm1, %v716_v22, %v2804_v4  ;;  %v2888_v13 = vadd.s32 %v196_v43, %v187_v5 }
  0xea   :  { %v579_v35 = vmul.f32 %v578_v46, %v2855_v44  ;;  %v588_v37 = vxor.u32 2147483648, %v571_v36  ;;  %v713_v15 = vmul.f32 %v712_v31, %v710_v56  ;;  %v209_v23 = vshrl.u32 %v204_v8, 16 }
  0xeb   :  { %v218_v7 = vadd.s32 %v217_v25, %v207_v11  ;;  %v282_v17 = vand.u32 2147483647, %v2611_v51  ;;  %vm583_vm7 = vcmp.lt.s32.totalorder %v582_v61, 2  ;;  %vm584_vm8 = vcmp.eq.s32.totalorder %v582_v61, 0 }
  0xec   :  { %v585_v16 = vxor.u32 2147483648, %v579_v35  ;;  %v2891_v30 = vadd.s32 %v212_v27, %v208_v6  ;;  %vm587_vm9 = vcmp.eq.s32.totalorder %v582_v61, 2  ;;  %v714_v44 = vxor.u32 2147483648, %v713_v15 }
  0xed   :  { %v719_v58 = vsel %vm2872_vm3, 0, %v717_v33  ;;  %v219_v52 = vadd.s32 %v218_v7, %v209_v23  ;;  %v589_v4 = vsel %vm587_vm9, %v588_v37, %v579_v35  ;;  %v220_v22 = vmul.u32 %v2821_v42, %v166_v63 }
  0xee   :  { %v586_v18 = vsel %vm584_vm8, %v571_v36, %v585_v16  ;;  %vm222_vm10 = vc.u32 %v2888_v13, %v2891_v30  ;;  %v715_v40 = vsel %vm594_vm1, %v714_v44, %v713_v15  ;;  %v289_v12 = vand.u32 8388607, %v282_v17 }
  0xef   :  { %v590_v8 = vsel %vm583_vm7, %v586_v18, %v589_v4  ;;  %v223_v1 = vadd.s32 1, %v219_v52  ;;  %v718_v53 = vsel %vm2872_vm3, %v2607_v49, %v715_v40  ;;  %v300_v42 = vshrl.u32 %v2532_v21, %v2827_v45 }
  0xf0   :  { %v591_v47 = vsel %vm580_vm5, nan, %v590_v8  ;;  %v303_v55 = vshrl.u32 %v2533_v24, %v2827_v45  ;;  %v720_v59 = vmul.f32 %v718_v53, %v718_v53  ;;  %v306_v62 = vshrl.u32 %v2534_v28, %v2827_v45 }
  0xf1   :  { %783 = vmatpush.msra.mxu0 %v591_v47  ;;  %v224_v60 = vsel %vm222_vm10, %v223_v1, %v219_v52  ;;  %v309_v48 = vshrl.u32 %v2535_v34, %v2827_v45  ;;  %v302_v3 = vshll.u32 %v2532_v21, %v2802_v10  ;;  %v308_v6 = vshll.u32 %v2534_v28, %v2802_v10 }
  0xf2   :  { %v225_v2 = vadd.s32 %v224_v60, %v220_v22  ;;  %v312_v9 = vshrl.u32 %v2536_v39, %v2827_v45  ;;  %v721_v20 = vmul.f32 -0.001358992, %v720_v59  ;;  %v728_v14 = vmul.f32 -0.00019511016, %v720_v59 }
  0xf3   :  { %v305_v27 = vshll.u32 %v2533_v24, %v2802_v10  ;;  %v311_v38 = vshll.u32 %v2535_v34, %v2802_v10  ;;  %v299_v43 = vshll.u32 %v2531_v19, %v2802_v10  ;;  %v2927_v29 = vor.u32 %v303_v55, %v302_v3 }
  0xf4   :  { %v226_v26 = vadd.s32 536870912, %v225_v2  ;;  %v310_v61 = vor.u32 %v309_v48, %v308_v6  ;;  %v722_v57 = vadd.f32 0.041655596, %v721_v20  ;;  %v729_v63 = vadd.f32 0.008332121, %v728_v14 }
  0xf5   :  { %v2929_v36 = vor.u32 %v306_v62, %v305_v27  ;;  %v313_v46 = vor.u32 %v312_v9, %v311_v38  ;;  %v736_v5 = vadd.s32 3, %v719_v58  ;;  %v290_v56 = vor.u32 8388608, %v289_v12 }
  0xf6   :  { %v2931_v32 = vshrl.u32 %v226_v26, 30  ;;  %v2933_v31 = vor.u32 %v300_v42, %v299_v43  ;;  %v723_v11 = vmul.f32 %v722_v57, %v720_v59  ;;  %v730_v25 = vmul.f32 %v729_v63, %v720_v59 }
  0xf7   :  { %vm314_vm11 = vcmp.lt.s32.totalorder %v2798_v54, 1  ;;  %vm317_vm12 = vcmp.lt.s32.totalorder %v2798_v54, 4  ;;  %vm315_vm13 = vcmp.lt.s32.totalorder %v2798_v54, 2  ;;  %vm316_vm14 = vcmp.lt.s32.totalorder %v2798_v54, 3 }
  0xf8   :  { %v228_v10 = vshll.u32 %v2931_v32, 30  ;;  %v323_v35 = vsel %vm317_vm12, %v310_v61, 920167782  ;;  %v724_v37 = vadd.f32 -0.4999988, %v723_v11  ;;  %v326_v15 = vsel %vm314_vm11, %v2927_v29, %v2929_v36 }
  0xf9   :  { %v731_v33 = vadd.f32 -0.16666654, %v730_v25  ;;  %v327_v23 = vsel %vm317_vm12, %v313_v46, 1326507024  ;;  %v322_v16 = vsel %vm314_vm11, %v2933_v31, %v2927_v29  ;;  %v2954_v58 = vshll.u32 %v290_v56, 8 }
  0xfa   :  { %v229_v7 = vsub.s32 %v225_v2, %v228_v10  ;;  %v328_v44 = vsel %vm316_vm14, %v310_v61, %v327_v23  ;;  %v725_v52 = vmul.f32 %v724_v37, %v720_v59  ;;  %v324_v4 = vsel %vm316_vm14, %v2929_v36, %v323_v35 }
  0xfb   :  { %v732_v18 = vmul.f32 %v731_v33, %v720_v59  ;;  %v329_v22 = vsel %vm315_vm13, %v326_v15, %v328_v44  ;;  %v737_v8 = vand.u32 3, %v736_v5  ;;  %vm735_vm0 = vweird.f32 %v2607_v49 }
  0xfc   :  { %vm230_vm15 = vcmp.lt.s32.totalorder %v229_v7, 0  ;;  %v231_v40 = vsub.s32 0, %v229_v7  ;;  %v726_v1 = vadd.f32 1.0, %v725_v52  ;;  %v333_v47 = vand.u32 65535, %v329_v22 }
  0xfd   :  { %v733_v12 = vadd.f32 1.0, %v732_v18  ;;  %v325_v55 = vsel %vm315_vm13, %v322_v16, %v324_v4  ;;  %v331_v59 = vand.u32 65535, %v2954_v58  ;;  %v334_v60 = vshrl.u32 %v329_v22, 16 }
  0xfe   :  { %v232_v42 = vsel %vm230_vm15, %v231_v40, %v229_v7  ;;  %v743_v48 = vxor.u32 2147483648, %v726_v1  ;;  %v332_v3 = vshrl.u32 %v2954_v58, 16  ;;  %vm738_vm1 = vcmp.lt.s32.totalorder %v737_v8, 2 }
  0xff   :  { %v734_v62 = vmul.f32 %v733_v12, %v718_v53  ;;  %v233_v2 = vclz %v232_v42  ;;  %vm739_vm2 = vcmp.eq.s32.totalorder %v737_v8, 0  ;;  %vm742_vm3 = vcmp.eq.s32.totalorder %v737_v8, 2 }
 0x100   :  { %v336_v6 = vmul.u32 %v334_v60, %v331_v59  ;;  %v221_v20 = vadd.s32 %v2891_v30, %v2888_v13  ;;  %v337_v27 = vmul.u32 %v333_v47, %v332_v3  ;;  %v335_v38 = vmul.u32 %v333_v47, %v331_v59 }
 0x101   :  { %v740_v9 = vxor.u32 2147483648, %v734_v62  ;;  %v2372_v14 = vadd.s32 4294967294, %v233_v2  ;;  %v355_v43 = vand.u32 65535, %v325_v55  ;;  %v356_v61 = vshrl.u32 %v325_v55, 16 }
 0x102   :  { %v339_v26 = vshll.u32 %v336_v6, 16  ;;  %v744_v53 = vsel %vm742_vm3, %v743_v48, %v734_v62  ;;  %v341_v63 = vshll.u32 %v337_v27, 16  ;;  %v338_v30 = vmul.u32 %v334_v60, %v332_v3 }
 0x103   :  { %v741_v57 = vsel %vm739_vm2, %v726_v1, %v740_v9  ;;  %vm2373_vm4 = vcmp.lt.s32.totalorder %v2372_v14, 0  ;;  %v358_v37 = vmul.u32 %v356_v61, %v331_v59  ;;  %v357_v44 = vmul.u32 %v355_v43, %v331_v59 }
 0x104   :  { %v745_v46 = vsel %vm738_vm1, %v741_v57, %v744_v53  ;;  %v236_v5 = vsel %vm2373_vm4, 0, %v2372_v14  ;;  %vm343_vm5 = vc.u32 %v335_v38, %v339_v26  ;;  %v345_v56 = vadd.s32 %v339_v26, %v335_v38 }
 0x105   :  { %v746_v11 = vsel %vm735_vm0, nan, %v745_v46  ;;  %v237_v25 = vsub.s32 32, %v236_v5  ;;  %v241_v13 = vsub.s32 4294967266, %v236_v5  ;;  %v238_v10 = vshll.u32 %v229_v7, %v236_v5 }
 0x106   :  { %806 = vmatpush.msra.mxu1 %v746_v11  ;;  %v344_v35 = vsel %vm343_vm5, 1, %v2528_v0  ;;  %vm347_vm6 = vc.u32 %v345_v56, %v341_v63  ;;  %v359_v52 = vmul.u32 %v355_v43, %v332_v3  ;;  %v361_v18 = vshll.u32 %v358_v37, 16 }
 0x107   :  { %v239_v33 = vshrl.u32 %v221_v20, %v237_v25  ;;  %v242_v15 = vadd.s32 127, %v241_v13  ;;  %v346_v23 = vadd.s32 %v344_v35, %v338_v30  ;;  %v348_v16 = vsel %vm347_vm6, 1, %v2528_v0 }
 0x108   :  { %v340_v22 = vshrl.u32 %v336_v6, 16  ;;  %v360_v40 = vmul.u32 %v356_v61, %v332_v3  ;;  %v363_v1 = vshll.u32 %v359_v52, 16  ;;  %vm365_vm7 = vc.u32 %v357_v44, %v361_v18 }
 0x109   :  { %v240_v4 = vor.u32 %v239_v33, %v238_v10  ;;  %v243_v49 = vshll.u32 %v242_v15, 23  ;;  %v350_v8 = vadd.s32 %v348_v16, %v346_v23  ;;  %v367_v7 = vadd.s32 %v361_v18, %v357_v44 }
 0x10a   :  { %v366_v42 = vsel %vm365_vm7, 1, %v2528_v0  ;;  %v298_v55 = vshrl.u32 %v2531_v19, %v2827_v45  ;;  %v319_v59 = vsel %vm317_vm12, %v2929_v36, 2102212464  ;;  %v342_v2 = vshrl.u32 %v337_v27, 16 }
 0x10b   :  { %v244_v12 = vor.u32 4788187, %v243_v49  ;;  %v351_v47 = vadd.s32 %v350_v8, %v340_v22  ;;  %v368_v60 = vadd.s32 %v366_v42, %v360_v40  ;;  %vm369_vm8 = vc.u32 %v367_v7, %v363_v1 }
 0x10c   :  { %v247_v48 = vcvt.s32.f32 %v240_v4  ;;  %v370_v3 = vsel %vm369_vm8, 1, %v2528_v0  ;;  %v362_v6 = vshrl.u32 %v358_v37, 16  ;;  %v318_v14 = vsel %vm314_vm11, %v298_v55, %v2933_v31 }
 0x10d   :  { %v245_v62 = vand.u32 2147483647, %v244_v12  ;;  %v372_v9 = vadd.s32 %v370_v3, %v368_v60  ;;  %v320_v45 = vsel %vm316_vm14, %v2927_v29, %v319_v59  ;;  %v352_v38 = vadd.s32 %v351_v47, %v342_v2 }
 0x10e   :  { %v364_v36 = vshrl.u32 %v359_v52, 16  ;;  %v371_v61 = vadd.s32 %v367_v7, %v363_v1  ;;  %vm129_vm9 = vcmp.lt.s32.totalorder %v2609_v50, 0  ;;  %v321_v27 = vsel %vm315_vm13, %v318_v14, %v320_v45 }
 0x10f   :  { %v248_v20 = vmul.f32 %v247_v48, %v245_v62  ;;  %v373_v26 = vadd.s32 %v372_v9, %v362_v6  ;;  %vm2991_vm10 = vcmp.le.f32.partialorder %v127_v41, 0.7853982  ;;  %v251_v29 = vsub.s32 4, %v2931_v32 }
 0x110   :  { %vm377_vm11 = vc.u32 %v352_v38, %v371_v61  ;;  %v375_v54 = vmul.u32 %v2954_v58, %v321_v27  ;;  %vm270_vm0 = vweird.f32 %v2609_v50  ;;  %v376_v3 = vadd.s32 %v371_v61, %v352_v38  ;;  %v748_v38 = vld [vmem:[%s4085_s3 + $0x8] sm:$0xff] }
 0x111   :  { %v249_v43 = vxor.u32 2147483648, %v248_v20  ;;  %v374_v57 = vadd.s32 %v373_v26, %v364_v36  ;;  %v252_v41 = vsel %vm129_vm9, %v251_v29, %v2931_v32  ;;  %vm762_vm2 = vcmask 130048  }
 0x112   :  { %v254_v37 = vsel %vm2991_vm10, 0, %v252_v41  ;;  %vm284_vm3 = vcmp.lt.s32.totalorder %v2611_v51, 0  ;;  %vm3014_vm4 = vcmp.le.f32.partialorder %v282_v17, 0.7853982  ;;  %vm425_vm8 = vweird.f32 %v2611_v51 }
 0x113   :  { %v250_v31 = vsel %vm129_vm9, %v249_v43, %v248_v20  ;;  %v378_v46 = vadd.s32 1, %v374_v57  ;;  %v271_v18 = vadd.s32 3, %v254_v37  ;;  %v747_v43 = vld [vmem:[%s4085_s3] sm:$0xff] }
 0x114   :  { %v253_v63 = vsel %vm2991_vm10, %v2609_v50, %v250_v31 }
 0x115   :  { %v255_v5 = vmul.f32 %v253_v63, %v253_v63  ;;  %v379_v56 = vsel %vm377_vm11, %v378_v46, %v374_v57  ;;  %v272_v40 = vand.u32 3, %v271_v18  ;;  %v2384_v46 = vld [vmem:[%s4084_s2 + $0x18] sm:$0xff] }
 0x116   :  { %v380_v13 = vadd.s32 %v379_v56, %v375_v54  ;;  %759 = vperm.xlu2 %2461, %v2384_v46  }
 0x117   :  { %v256_v11 = vmul.f32 -0.001358992, %v255_v5  ;;  %v263_v25 = vmul.f32 -0.00019511016, %v255_v5  ;;  %vm274_vm13 = vcmp.eq.s32.totalorder %v272_v40, 0  ;;  %vm277_vm14 = vcmp.eq.s32.totalorder %v272_v40, 2 }
 0x118   :  { %v381_v35 = vadd.s32 536870912, %v380_v13  ;;  %vm273_vm15 = vcmp.lt.s32.totalorder %v272_v40, 2 }
 0x119   :  { %v257_v30 = vadd.f32 0.041655596, %v256_v11  ;;  %v264_v10 = vadd.f32 0.008332121, %v263_v25 }
 0x11a   :  { %v382_v23 = vshrl.u32 %v381_v35, 30 }
 0x11b   :  { %v258_v33 = vmul.f32 %v257_v30, %v255_v5  ;;  %v265_v15 = vmul.f32 %v264_v10, %v255_v5  ;;  %v2404_v30 = vld [vmem:[%s4084_s2 + $0x28] sm:$0xff] }
 0x11c   :  { %v383_v52 = vshll.u32 %v382_v23, 30 }
 0x11d   :  { %v259_v16 = vadd.f32 -0.4999988, %v258_v33  ;;  %v266_v44 = vadd.f32 -0.16666654, %v265_v15 }
 0x11e   :  { %v384_v49 = vsub.s32 %v380_v13, %v383_v52  ;;  %1448 = vperm.xlu2 %2461, %v2404_v30  }
 0x11f   :  { %v260_v58 = vmul.f32 %v259_v16, %v255_v5  ;;  %v267_v4 = vmul.f32 %v266_v44, %v255_v5  ;;  %v406_v5 = vsub.s32 4, %v382_v23 }
 0x120   :  { %vm385_vm12 = vcmp.lt.s32.totalorder %v384_v49, 0  ;;  %v386_v32 = vsub.s32 0, %v384_v49 }
 0x121   :  { %v261_v22 = vadd.f32 1.0, %v260_v58  ;;  %v268_v8 = vadd.f32 1.0, %v267_v4  ;;  %v407_v25 = vsel %vm284_vm3, %v406_v5, %v382_v23 }
 0x122   :  { %v387_v12 = vsel %vm385_vm12, %v386_v32, %v384_v49  ;;  %v409_v10 = vsel %vm3014_vm4, 0, %v407_v25 }
 0x123   :  { %v269_v1 = vmul.f32 %v268_v8, %v253_v63  ;;  %v278_v7 = vxor.u32 2147483648, %v261_v22  ;;  %v388_v47 = vclz %v387_v12  ;;  %v2383_v63 = vld [vmem:[%s4084_s2 + $0x10] sm:$0xff]  ;;  %v426_v16 = vadd.s32 3, %v409_v10 }
 0x124   :  { %754 = vperm.xlu1 %2462, %v2383_v63  }
 0x125   :  { %v275_v42 = vxor.u32 2147483648, %v269_v1  ;;  %v2375_v55 = vadd.s32 4294967294, %v388_v47  ;;  %v279_v60 = vsel %vm277_vm14, %v278_v7, %v269_v1  ;;  %v427_v23 = vand.u32 3, %v426_v16 }
 0x127   :  { %v276_v59 = vsel %vm274_vm13, %v261_v22, %v275_v42  ;;  %vm2376_vm1 = vcmp.lt.s32.totalorder %v2375_v55, 0  ;;  %vm429_vm5 = vcmp.eq.s32.totalorder %v427_v23, 0  ;;  %vm432_vm6 = vcmp.eq.s32.totalorder %v427_v23, 2 }
 0x128   :  { %v280_v62 = vsel %vm273_vm15, %v276_v59, %v279_v60  ;;  %v391_v2 = vsel %vm2376_vm1, 0, %v2375_v55  ;;  %vm428_vm7 = vcmp.lt.s32.totalorder %v427_v23, 2 }
 0x129   :  { %v281_v48 = vsel %vm270_vm0, nan, %v280_v62  ;;  %v392_v6 = vsub.s32 32, %v391_v2  ;;  %v396_v9 = vsub.s32 4294967266, %v391_v2  ;;  %v393_v20 = vshll.u32 %v384_v49, %v391_v2 }
 0x12a   :  { %784 = vmatpush.msra.mxu0 %v281_v48 }
 0x12b   :  { %v394_v14 = vshrl.u32 %v376_v3, %v392_v6  ;;  %v397_v45 = vadd.s32 127, %v396_v9  ;;  %2385 = vmatmul.msk.f32.vlgmr.msra.gmra.mxu0 %vm762_vm2, %v747_v43 }
 0x12d   :  { %v395_v36 = vor.u32 %v394_v14, %v393_v20  ;;  %v398_v26 = vshll.u32 %v397_v45, 23 }
 0x12f   :  { %v399_v27 = vor.u32 4788187, %v398_v26  ;;  %v402_v57 = vcvt.s32.f32 %v395_v36 }
 0x131   :  { %v400_v50 = vand.u32 2147483647, %v399_v27 }
 0x133   :  { %v403_v53 = vmul.f32 %v402_v57, %v400_v50  ;;  %2386 = vmatmul.msk.f32.gmra.mxu0 %vm762_vm2, %v748_v38 }
 0x135   :  { %v404_v61 = vxor.u32 2147483648, %v403_v53 }
 0x137   :  { %v405_v29 = vsel %vm284_vm3, %v404_v61, %v403_v53 }
 0x138   :  { %v408_v54 = vsel %vm3014_vm4, %v2611_v51, %v405_v29 }
 0x139   :  { %v410_v17 = vmul.f32 %v408_v54, %v408_v54 }
 0x13b   :  { %v411_v56 = vmul.f32 -0.001358992, %v410_v17  ;;  %v418_v11 = vmul.f32 -0.00019511016, %v410_v17 }
 0x13d   :  { %v412_v13 = vadd.f32 0.041655596, %v411_v56  ;;  %v419_v41 = vadd.f32 0.008332121, %v418_v11 }
 0x13f   :  { %v413_v35 = vmul.f32 %v412_v13, %v410_v17  ;;  %v420_v37 = vmul.f32 %v419_v41, %v410_v17 }
 0x141   :  { %v414_v33 = vadd.f32 -0.4999988, %v413_v35  ;;  %v421_v15 = vadd.f32 -0.16666654, %v420_v37 }
 0x143   :  { %v415_v44 = vmul.f32 %v414_v33, %v410_v17  ;;  %v422_v52 = vmul.f32 %v421_v15, %v410_v17 }
 0x145   :  { %v416_v18 = vadd.f32 1.0, %v415_v44  ;;  %v423_v58 = vadd.f32 1.0, %v422_v52 }
 0x147   :  { %v424_v4 = vmul.f32 %v423_v58, %v408_v54  ;;  %v433_v49 = vxor.u32 2147483648, %v416_v18 }
 0x149   :  { %v430_v22 = vxor.u32 2147483648, %v424_v4  ;;  %v434_v32 = vsel %vm432_vm6, %v433_v49, %v424_v4 }
 0x14b   :  { %v431_v8 = vsel %vm429_vm5, %v416_v18, %v430_v22 }
 0x14c   :  { %v435_v40 = vsel %vm428_vm7, %v431_v8, %v434_v32 }
 0x14d   :  { %v436_v1 = vsel %vm425_vm8, nan, %v435_v40 }
 0x14e   :  { %807 = vmatpush.msra.mxu1 %v436_v1 }
 0x14f   :  { %2387 = vmatmul.msk.f32.vlgmr.msra.gmra.mxu1 %vm762_vm2, %v747_v43 }
 0x157   :  { %2388 = vmatmul.msk.f32.gmra.mxu1 %vm762_vm2, %v748_v38 }
 0x170   :  { %v760_v60 = vpop.permute.xlu2 %759 }
 0x196   :  { %v755_v7 = vpop.permute.xlu1 %754 }
 0x1a8   :  { %v786_v12 = vpop.f32.mrf.mxu0 }
 0x1a9   :  { %v3036_v47 = vadd.f32 %v786_v12, %v755_v7 }
 0x1ab   :  { %v818_v42 = vand.u32 2139095040, %v3036_v47 }
 0x1ad   :  { %v819_v55 = vshrl.u32 %v818_v42, 23 }
 0x1af   :  { %v2389_v59 = vadd.s32 4294967169, %v819_v55 }
 0x1b0   :  { %v789_v62 = vpop.f32.mrf.mxu0 }
 0x1b1   :  { %v825_v48 = vadd.s32 1, %v2389_v59  ;;  %v3039_v2 = vadd.f32 %v789_v62, %v760_v60 }
 0x1b3   :  { %v1128_v51 = vand.u32 2139095040, %v3039_v2  ;;  %vm826_vm9 = vcmp.gt.s32.totalorder %v825_v48, 0  ;;  %v1125_v43 = vand.u32 2147483647, %v3039_v2 }
 0x1b4   :  { %v827_v9 = vsel %vm826_vm9, %v825_v48, 0 }
 0x1b5   :  { %v1129_v3 = vshrl.u32 %v1128_v51, 23  ;;  %v3042_v14 = vand.u32 31, %v827_v9  ;;  %v1132_v63 = vand.u32 8388607, %v1125_v43  ;;  %v3085_v1 = vshrl.u32 %v827_v9, 5 }
 0x1b7   :  { %v2395_v6 = vadd.s32 4294967169, %v1129_v3  ;;  %v3049_v57 = vsub.s32 32, %v3042_v14  ;;  %v1133_v52 = vor.u32 8388608, %v1132_v63  ;;  %v841_v4 = vshll.u32 %v2534_v28, %v3042_v14 }
 0x1b8   :  { %v844_v59 = vshll.u32 %v2535_v34, %v3042_v14  ;;  %vm850_vm0 = vcmp.lt.s32.totalorder %v3085_v1, 4 }
 0x1b9   :  { %v1135_v20 = vadd.s32 1, %v2395_v6  ;;  %v842_v18 = vshrl.u32 %v2535_v34, %v3049_v57  ;;  %v3091_v42 = vshll.u32 %v1133_v52, 8 }
 0x1bb   :  { %vm1136_vm10 = vcmp.gt.s32.totalorder %v1135_v20, 0  ;;  %v3093_v55 = vor.u32 %v842_v18, %v841_v4  ;;  %v1174_v6 = vand.u32 65535, %v3091_v42 }
 0x1bc   :  { %v1137_v26 = vsel %vm1136_vm10, %v1135_v20, 0 }
 0x1bd   :  { %v1139_v27 = vand.u32 31, %v1137_v26  ;;  %v3051_v53 = vshrl.u32 %v1137_v26, 5 }
 0x1bf   :  { %v1140_v38 = vsub.s32 32, %v1139_v27  ;;  %v1151_v31 = vshll.u32 %v2534_v28, %v1139_v27  ;;  %v1154_v29 = vshll.u32 %v2535_v34, %v1139_v27  ;;  %v1142_v54 = vshll.u32 %v2531_v19, %v1139_v27 }
 0x1c0   :  { %v1145_v56 = vshll.u32 %v2532_v21, %v1139_v27  ;;  %v1148_v25 = vshll.u32 %v2533_v24, %v1139_v27  ;;  %vm1160_vm11 = vcmp.lt.s32.totalorder %v3051_v53, 4  ;;  %vm1157_vm12 = vcmp.lt.s32.totalorder %v3051_v53, 1 }
 0x1c1   :  { %v1152_v46 = vshrl.u32 %v2535_v34, %v1140_v38  ;;  %v1155_v5 = vshrl.u32 %v2536_v39, %v1140_v38  ;;  %v1143_v17 = vshrl.u32 %v2532_v21, %v1140_v38  ;;  %v1146_v11 = vshrl.u32 %v2533_v24, %v1140_v38 }
 0x1c2   :  { %v1149_v13 = vshrl.u32 %v2534_v28, %v1140_v38  ;;  %vm1159_vm13 = vcmp.lt.s32.totalorder %v3051_v53, 3  ;;  %vm1158_vm14 = vcmp.lt.s32.totalorder %v3051_v53, 2  ;;  %v1175_v27 = vshrl.u32 %v3091_v42, 16 }
 0x1c3   :  { %v1153_v30 = vor.u32 %v1152_v46, %v1151_v31  ;;  %v1156_v10 = vor.u32 %v1155_v5, %v1154_v29  ;;  %v1144_v33 = vor.u32 %v1143_v17, %v1142_v54  ;;  %v1147_v15 = vor.u32 %v1146_v11, %v1145_v56 }
 0x1c4   :  { %v1150_v16 = vor.u32 %v1149_v13, %v1148_v25  ;;  %v815_v13 = vand.u32 2147483647, %v3036_v47 }
 0x1c5   :  { %v1166_v44 = vsel %vm1160_vm11, %v1153_v30, 920167782  ;;  %v1170_v58 = vsel %vm1160_vm11, %v1156_v10, 1326507024  ;;  %v1165_v8 = vsel %vm1157_vm12, %v1144_v33, %v1147_v15 }
 0x1c6   :  { %v1167_v32 = vsel %vm1159_vm13, %v1150_v16, %v1166_v44  ;;  %v1169_v40 = vsel %vm1157_vm12, %v1147_v15, %v1150_v16  ;;  %v1171_v12 = vsel %vm1159_vm13, %v1153_v30, %v1170_v58  ;;  %v1162_v3 = vsel %vm1160_vm11, %v1150_v16, 2102212464 }
 0x1c7   :  { %v1168_v48 = vsel %vm1158_vm14, %v1165_v8, %v1167_v32  ;;  %v1172_v51 = vsel %vm1158_vm14, %v1169_v40, %v1171_v12  ;;  %v1163_v63 = vsel %vm1159_vm13, %v1147_v15, %v1162_v3 }
 0x1c8   :  { %v1176_v9 = vand.u32 65535, %v1172_v51  ;;  %v1177_v20 = vshrl.u32 %v1172_v51, 16  ;;  %v1199_v31 = vshrl.u32 %v1168_v48, 16  ;;  %v1198_v56 = vand.u32 65535, %v1168_v48 }
 0x1ca   :  { %v1180_v46 = vmul.u32 %v1176_v9, %v1175_v27  ;;  %v1178_v54 = vmul.u32 %v1176_v9, %v1174_v6  ;;  %v1201_v10 = vmul.u32 %v1199_v31, %v1174_v6  ;;  %v1181_v16 = vmul.u32 %v1177_v20, %v1175_v27 }
 0x1cb   :  { %v1200_v52 = vmul.u32 %v1198_v56, %v1174_v6  ;;  %v1202_v18 = vmul.u32 %v1198_v56, %v1175_v27 }
 0x1cc   :  { %v809_v45 = vpop.f32.mrf.mxu1  ;;  %v1185_v53 = vshrl.u32 %v1180_v46, 16  ;;  %v1204_v32 = vshll.u32 %v1201_v10, 16  ;;  %v1205_v9 = vshrl.u32 %v1201_v10, 16 }
 0x1cd   :  { %v3044_v36 = vadd.f32 %v809_v45, %v755_v7  ;;  %v845_v7 = vshrl.u32 %v2536_v39, %v3049_v57 }
 0x1ce   :  { %vm1208_vm5 = vc.u32 %v1200_v52, %v1204_v32  ;;  %v1210_v48 = vadd.s32 %v1204_v32, %v1200_v52 }
 0x1cf   :  { %v973_v50 = vand.u32 2139095040, %v3044_v36  ;;  %v846_v45 = vor.u32 %v845_v7, %v844_v59 }
 0x1d1   :  { %v974_v61 = vshrl.u32 %v973_v50, 23  ;;  %v3111_v50 = vsel %vm850_vm0, %v3093_v55, 920167782  ;;  %v3122_v11 = vsel %vm850_vm0, %v846_v45, 1326507024 }
 0x1d3   :  { %v2392_v41 = vadd.s32 4294967169, %v974_v61  ;;  %v1179_v61 = vmul.u32 %v1177_v20, %v1174_v6  ;;  %v1209_v6 = vsel %vm1208_vm5, 1, %v2528_v0  ;;  %v1207_v20 = vshrl.u32 %v1202_v18, 16 }
 0x1d4   :  { %v812_v35 = vpop.f32.mrf.mxu1  ;;  %vm849_vm5 = vcmp.lt.s32.totalorder %v3085_v1, 3 }
 0x1d5   :  { %v3066_v37 = vadd.f32 %v812_v35, %v760_v60  ;;  %v980_v49 = vadd.s32 1, %v2392_v41  ;;  %v1141_v60 = vshrl.u32 %v2531_v19, %v1140_v38  ;;  %v1182_v17 = vshll.u32 %v1179_v61, 16 }
 0x1d6   :  { %v1184_v41 = vshll.u32 %v1180_v46, 16  ;;  %v1183_v8 = vshrl.u32 %v1179_v61, 16 }
 0x1d7   :  { %v1283_v23 = vand.u32 2139095040, %v3066_v37  ;;  %vm981_vm15 = vcmp.gt.s32.totalorder %v980_v49, 0  ;;  %v1161_v38 = vsel %vm1157_vm12, %v1141_v60, %v1144_v33  ;;  %vm1186_vm3 = vc.u32 %v1178_v54, %v1182_v17 }
 0x1d8   :  { %v3116_v29 = vsel %vm981_vm15, %v980_v49, 0  ;;  %v1188_v30 = vadd.s32 %v1182_v17, %v1178_v54  ;;  %v3132_v15 = vsel %vm1158_vm14, %v1161_v38, %v1163_v63  ;;  %v1187_v44 = vsel %vm1186_vm3, 1, %v2528_v0 }
 0x1d9   :  { %v1284_v22 = vshrl.u32 %v1283_v23, 23  ;;  %v3126_v35 = vand.u32 31, %v3116_v29  ;;  %v1189_v4 = vadd.s32 %v1187_v44, %v1181_v16  ;;  %v1280_v59 = vand.u32 2147483647, %v3066_v37 }
 0x1da   :  { %vm1190_vm4 = vc.u32 %v1188_v30, %v1184_v41  ;;  %v1203_v60 = vmul.u32 %v1199_v31, %v1175_v27  ;;  %vm1127_vm3 = vcmp.lt.s32.totalorder %v3039_v2, 0 }
 0x1db   :  { %v2398_v62 = vadd.s32 4294967169, %v1284_v22  ;;  %v1191_v49 = vsel %vm1190_vm4, 1, %v2528_v0  ;;  %v1287_v61 = vand.u32 8388607, %v1280_v59  ;;  %vm847_vm4 = vcmp.lt.s32.totalorder %v3085_v1, 1 }
 0x1dc   :  { %v1193_v12 = vadd.s32 %v1191_v49, %v1189_v4  ;;  %v1211_v45 = vadd.s32 %v1209_v6, %v1203_v60 }
 0x1dd   :  { %v1290_v26 = vadd.s32 1, %v2398_v62  ;;  %v1206_v62 = vshll.u32 %v1202_v18, 16  ;;  %v1288_v56 = vor.u32 8388608, %v1287_v61 }
 0x1de   :  { %v1194_v3 = vadd.s32 %v1193_v12, %v1183_v8  ;;  %v1218_v12 = vmul.u32 %v3091_v42, %v3132_v15  ;;  %v3206_v42 = vshll.u32 %v2534_v28, %v3126_v35  ;;  %v3210_v15 = vshll.u32 %v2535_v34, %v3126_v35 }
 0x1df   :  { %vm1291_vm1 = vcmp.gt.s32.totalorder %v1290_v26, 0  ;;  %vm1212_vm7 = vc.u32 %v1210_v48, %v1206_v62  ;;  %v3167_v18 = vadd.s32 %v1210_v48, %v1206_v62 }
 0x1e0   :  { %v1292_v5 = vsel %vm1291_vm1, %v1290_v26, 0  ;;  %v1213_v38 = vsel %vm1212_vm7, 1, %v2528_v0  ;;  %v3158_v17 = vadd.s32 %v1194_v3, %v1185_v53  ;;  %v3185_v53 = vand.u32 8388607, %v815_v13 }
 0x1e1   :  { %v1294_v25 = vand.u32 31, %v1292_v5  ;;  %v3135_v58 = vshrl.u32 %v1292_v5, 5  ;;  %v1215_v31 = vadd.s32 %v1213_v38, %v1211_v45 }
 0x1e2   :  { %vm1220_vm10 = vc.u32 %v3158_v17, %v3167_v18 }
 0x1e3   :  { %v3128_v33 = vsub.s32 32, %v1294_v25  ;;  %v1306_v22 = vshll.u32 %v2534_v28, %v1294_v25  ;;  %v1309_v7 = vshll.u32 %v2535_v34, %v1294_v25  ;;  %vm1315_vm6 = vcmp.lt.s32.totalorder %v3135_v58, 4 }
 0x1e4   :  { %v1297_v27 = vshll.u32 %v2531_v19, %v1294_v25  ;;  %v1300_v46 = vshll.u32 %v2532_v21, %v1294_v25  ;;  %v1303_v41 = vshll.u32 %v2533_v24, %v1294_v25  ;;  %v1216_v30 = vadd.s32 %v1215_v31, %v1205_v9 }
 0x1e5   :  { %v1310_v23 = vshrl.u32 %v2536_v39, %v3128_v33  ;;  %v1307_v40 = vshrl.u32 %v2535_v34, %v3128_v33  ;;  %v1298_v63 = vshrl.u32 %v2532_v21, %v3128_v33  ;;  %v1301_v5 = vshrl.u32 %v2533_v24, %v3128_v33 }
 0x1e6   :  { %v1304_v44 = vshrl.u32 %v2534_v28, %v3128_v33  ;;  %vm1312_vm8 = vcmp.lt.s32.totalorder %v3135_v58, 1  ;;  %v1217_v4 = vadd.s32 %v1216_v30, %v1207_v20  ;;  %vm1314_vm9 = vcmp.lt.s32.totalorder %v3135_v58, 3 }
 0x1e7   :  { %v1311_v51 = vor.u32 %v1310_v23, %v1309_v7  ;;  %v1308_v26 = vor.u32 %v1307_v40, %v1306_v22  ;;  %v1299_v10 = vor.u32 %v1298_v63, %v1297_v27  ;;  %v3161_v16 = vor.u32 %v1301_v5, %v1300_v46 }
 0x1e8   :  { %v3170_v23 = vshll.u32 %v1288_v56, 8  ;;  %v1305_v49 = vor.u32 %v1304_v44, %v1303_v41  ;;  %v3177_v22 = vsub.s32 32, %v3126_v35  ;;  %v1221_v32 = vadd.s32 1, %v1217_v4 }
 0x1e9   :  { %v1325_v54 = vsel %vm1315_vm6, %v1311_v51, 1326507024  ;;  %v1321_v52 = vsel %vm1315_vm6, %v1308_v26, 920167782  ;;  %v1320_v25 = vsel %vm1312_vm8, %v1299_v10, %v3161_v16  ;;  %vm1313_vm11 = vcmp.lt.s32.totalorder %v3135_v58, 2 }
 0x1ea   :  { %v1326_v8 = vsel %vm1314_vm9, %v1308_v26, %v1325_v54  ;;  %v1322_v40 = vsel %vm1314_vm9, %v1305_v49, %v1321_v52  ;;  %v1324_v7 = vsel %vm1312_vm8, %v3161_v16, %v1305_v49  ;;  %v1329_v48 = vand.u32 65535, %v3170_v23 }
 0x1eb   :  { %v1323_v60 = vsel %vm1313_vm11, %v1320_v25, %v1322_v40  ;;  %v1327_v62 = vsel %vm1313_vm11, %v1324_v7, %v1326_v8  ;;  %v1222_v51 = vsel %vm1220_vm10, %v1221_v32, %v1217_v4  ;;  %v1330_v3 = vshrl.u32 %v3170_v23, 16 }
 0x1ec   :  { %v1331_v6 = vand.u32 65535, %v1327_v62  ;;  %v1332_v9 = vshrl.u32 %v1327_v62, 16  ;;  %v3202_v20 = vshrl.u32 %v3116_v29, 5  ;;  %v1223_v45 = vadd.s32 %v1222_v51, %v1218_v12 }
 0x1ed   :  { %v1353_v26 = vand.u32 65535, %v1323_v60  ;;  %v1354_v38 = vshrl.u32 %v1323_v60, 16  ;;  %v3214_v31 = vshrl.u32 %v2535_v34, %v3177_v22  ;;  %v1296_v5 = vshrl.u32 %v2531_v19, %v3128_v33 }
 0x1ee   :  { %v1334_v61 = vmul.u32 %v1332_v9, %v1329_v48  ;;  %v1335_v27 = vmul.u32 %v1331_v6, %v1330_v3  ;;  %v1224_v63 = vadd.s32 536870912, %v1223_v45  ;;  %v1317_v54 = vsel %vm1315_vm6, %v1305_v49, 2102212464 }
 0x1ef   :  { %v1356_v29 = vmul.u32 %v1354_v38, %v1329_v48  ;;  %v1357_v46 = vmul.u32 %v1353_v26, %v1330_v3  ;;  %v1333_v56 = vmul.u32 %v1331_v6, %v1329_v48  ;;  %v1336_v44 = vmul.u32 %v1332_v9, %v1330_v3 }
 0x1f0   :  { %v1337_v41 = vshll.u32 %v1334_v61, 16  ;;  %v3220_v30 = vshrl.u32 %v1224_v63, 30  ;;  %v1355_v52 = vmul.u32 %v1353_v26, %v1329_v48  ;;  %v1339_v25 = vshll.u32 %v1335_v27, 16 }
 0x1f1   :  { %v1359_v4 = vshll.u32 %v1356_v29, 16  ;;  %v1358_v32 = vmul.u32 %v1354_v38, %v1330_v3  ;;  %v1361_v12 = vshll.u32 %v1357_v46, 16  ;;  %v1316_v48 = vsel %vm1312_vm8, %v1296_v5, %v1299_v10 }
 0x1f2   :  { %vm1341_vm12 = vc.u32 %v1333_v56, %v1337_v41  ;;  %v1343_v8 = vadd.s32 %v1337_v41, %v1333_v56  ;;  %v1226_v40 = vshll.u32 %v3220_v30, 30  ;;  %v1318_v3 = vsel %vm1314_vm9, %v3161_v16, %v1317_v54 }
 0x1f3   :  { %v1342_v7 = vsel %vm1341_vm12, 1, %v2528_v0  ;;  %vm1363_vm13 = vc.u32 %v1355_v52, %v1359_v4  ;;  %v1365_v60 = vadd.s32 %v1359_v4, %v1355_v52  ;;  %v1338_v9 = vshrl.u32 %v1334_v61, 16 }
 0x1f4   :  { %v1344_v33 = vadd.s32 %v1342_v7, %v1336_v44  ;;  %vm1345_vm14 = vc.u32 %v1343_v8, %v1339_v25  ;;  %v1364_v49 = vsel %vm1363_vm13, 1, %v2528_v0  ;;  %v1227_v62 = vsub.s32 %v1223_v45, %v1226_v40 }
 0x1f5   :  { %v1346_v51 = vsel %vm1345_vm14, 1, %v2528_v0  ;;  %v1366_v6 = vadd.s32 %v1364_v49, %v1358_v32  ;;  %vm1367_vm15 = vc.u32 %v1365_v60, %v1361_v12  ;;  %v1340_v63 = vshrl.u32 %v1335_v27, 16 }
 0x1f6   :  { %v1348_v26 = vadd.s32 %v1346_v51, %v1344_v33  ;;  %vm1228_vm1 = vcmp.lt.s32.totalorder %v1227_v62, 0  ;;  %v1229_v38 = vsub.s32 0, %v1227_v62  ;;  %v1368_v56 = vsel %vm1367_vm15, 1, %v2528_v0 }
 0x1f7   :  { %v1360_v45 = vshrl.u32 %v1356_v29, 16  ;;  %v1370_v44 = vadd.s32 %v1368_v56, %v1366_v6  ;;  %v833_v10 = vshrl.u32 %v2532_v21, %v3049_v57  ;;  %v1362_v52 = vshrl.u32 %v1357_v46, 16 }
 0x1f8   :  { %v1349_v41 = vadd.s32 %v1348_v26, %v1338_v9  ;;  %v1230_v5 = vsel %vm1228_vm1, %v1229_v38, %v1227_v62  ;;  %v835_v4 = vshll.u32 %v2532_v21, %v3042_v14  ;;  %v836_v16 = vshrl.u32 %v2533_v24, %v3049_v57 }
 0x1f9   :  { %v1231_v61 = vclz %v1230_v5  ;;  %v1371_v27 = vadd.s32 %v1370_v44, %v1360_v45  ;;  %v832_v25 = vshll.u32 %v2531_v19, %v3042_v14  ;;  %v1219_v29 = vadd.s32 %v3167_v18, %v3158_v17 }
 0x1fa   :  { %v3238_v54 = vadd.s32 %v1349_v41, %v1340_v63  ;;  %v3244_v8 = vor.u32 %v836_v16, %v835_v4  ;;  %v838_v46 = vshll.u32 %v2533_v24, %v3042_v14  ;;  %v839_v32 = vshrl.u32 %v2534_v28, %v3049_v57 }
 0x1fb   :  { %v2396_v40 = vadd.s32 4294967294, %v1231_v61  ;;  %v3251_v7 = vadd.s32 %v1365_v60, %v1361_v12  ;;  %v1372_v33 = vadd.s32 %v1371_v27, %v1362_v52  ;;  %v3253_v49 = vor.u32 %v833_v10, %v832_v25 }
 0x1fc   :  { %v1319_v51 = vsel %vm1313_vm11, %v1316_v48, %v1318_v3  ;;  %v840_v17 = vor.u32 %v839_v32, %v838_v46  ;;  %v861_v18 = vsel %vm849_vm5, %v3093_v55, %v3122_v11  ;;  %v823_v60 = vor.u32 8388608, %v3185_v53 }
 0x1fd   :  { %vm2397_vm6 = vcmp.lt.s32.totalorder %v2396_v40, 0  ;;  %vm1375_vm7 = vc.u32 %v3238_v54, %v3251_v7  ;;  %v1376_v14 = vadd.s32 1, %v1372_v33  ;;  %vm848_vm8 = vcmp.lt.s32.totalorder %v3085_v1, 2 }
 0x1fe   :  { %v1234_v12 = vsel %vm2397_vm6, 0, %v2396_v40  ;;  %v859_v58 = vsel %vm847_vm4, %v3244_v8, %v840_v17  ;;  %v855_v3 = vsel %vm847_vm4, %v3253_v49, %v3244_v8  ;;  %v857_v55 = vsel %vm849_vm5, %v840_v17, %v3111_v50 }
 0x1ff   :  { %v1235_v48 = vsub.s32 32, %v1234_v12  ;;  %v1239_v6 = vsub.s32 4294967266, %v1234_v12  ;;  %v1249_v11 = vsub.s32 4, %v3220_v30  ;;  %v1373_v53 = vmul.u32 %v3170_v23, %v1319_v51 }
 0x200   :  { %v1377_v9 = vsel %vm1375_vm7, %v1376_v14, %v1372_v33  ;;  %v862_v26 = vsel %vm848_vm8, %v859_v58, %v861_v18  ;;  %v1000_v38 = vshrl.u32 %v2536_v39, %v3177_v22  ;;  %v1236_v63 = vshll.u32 %v1227_v62, %v1234_v12 }
 0x201   :  { %v1237_v56 = vshrl.u32 %v1219_v29, %v1235_v48  ;;  %v1240_v41 = vadd.s32 127, %v1239_v6  ;;  %v3285_v45 = vor.u32 %v3214_v31, %v3206_v42  ;;  %v1378_v44 = vadd.s32 %v1377_v9, %v1373_v53 }
 0x202   :  { %v3289_v50 = vsel %vm848_vm8, %v855_v3, %v857_v55  ;;  %v3291_v23 = vshll.u32 %v823_v60, 8  ;;  %v866_v52 = vand.u32 65535, %v862_v26  ;;  %v867_v4 = vshrl.u32 %v862_v26, 16 }
 0x203   :  { %v1238_v10 = vor.u32 %v1237_v56, %v1236_v63  ;;  %v1241_v5 = vshll.u32 %v1240_v41, 23  ;;  %vm3295_vm9 = vcmp.le.f32.partialorder %v1125_v43, 0.7853982  ;;  %v1250_v42 = vsel %vm1127_vm3, %v1249_v11, %v3220_v30 }
 0x204   :  { %v1379_v31 = vadd.s32 536870912, %v1378_v44  ;;  %v864_v16 = vand.u32 65535, %v3291_v23  ;;  %v1001_v61 = vor.u32 %v1000_v38, %v3210_v15  ;;  %vm1005_vm10 = vcmp.lt.s32.totalorder %v3202_v20, 4 }
 0x205   :  { %v1242_v27 = vor.u32 4788187, %v1241_v5  ;;  %v865_v25 = vshrl.u32 %v3291_v23, 16  ;;  %v3309_v43 = vsel %vm1005_vm10, %v3285_v45, 920167782  ;;  %v889_v30 = vshrl.u32 %v3289_v50, 16 }
 0x206   :  { %v3311_v29 = vshrl.u32 %v1379_v31, 30  ;;  %v869_v46 = vmul.u32 %v867_v4, %v864_v16  ;;  %v1245_v40 = vcvt.s32.f32 %v1238_v10  ;;  %v1252_v15 = vsel %vm3295_vm9, 0, %v1250_v42 }
 0x207   :  { %v1243_v32 = vand.u32 2147483647, %v1242_v27  ;;  %v870_v33 = vmul.u32 %v866_v52, %v865_v25  ;;  %v831_v14 = vshrl.u32 %v2531_v19, %v3049_v57  ;;  %v868_v18 = vmul.u32 %v866_v52, %v864_v16 }
 0x208   :  { %v1381_v51 = vshll.u32 %v3311_v29, 30  ;;  %v872_v12 = vshll.u32 %v869_v46, 16  ;;  %v852_v58 = vsel %vm850_vm0, %v840_v17, 2102212464  ;;  %v871_v48 = vmul.u32 %v867_v4, %v865_v25 }
 0x209   :  { %v1246_v60 = vmul.f32 %v1245_v40, %v1243_v32  ;;  %v888_v6 = vand.u32 65535, %v3289_v50  ;;  %v3324_v11 = vmul.u32 %v889_v30, %v864_v16  ;;  %v851_v57 = vsel %vm847_vm4, %v831_v14, %v3253_v49 }
 0x20a   :  { %v3322_v3 = vsub.s32 %v1378_v44, %v1381_v51  ;;  %vm876_vm11 = vc.u32 %v868_v18, %v872_v12  ;;  %v878_v55 = vadd.s32 %v872_v12, %v868_v18  ;;  %v874_v9 = vshll.u32 %v870_v33, 16 }
 0x20b   :  { %v1247_v53 = vxor.u32 2147483648, %v1246_v60  ;;  %v877_v26 = vsel %vm876_vm11, 1, %v2528_v0  ;;  %v1269_v38 = vadd.s32 3, %v1252_v15  ;;  %v853_v41 = vsel %vm849_vm5, %v3244_v8, %v852_v58 }
 0x20c   :  { %vm1383_vm0 = vcmp.lt.s32.totalorder %v3322_v3, 0  ;;  %v1384_v17 = vsub.s32 0, %v3322_v3  ;;  %v879_v63 = vadd.s32 %v877_v26, %v871_v48  ;;  %vm880_vm12 = vc.u32 %v878_v55, %v874_v9 }
 0x20d   :  { %v1248_v56 = vsel %vm1127_vm3, %v1247_v53, %v1246_v60  ;;  %v3337_v44 = vmul.u32 %v888_v6, %v865_v25  ;;  %v881_v10 = vsel %vm880_vm12, 1, %v2528_v0  ;;  %v894_v5 = vshll.u32 %v3324_v11, 16 }
 0x20e   :  { %v3342_v49 = vsel %vm3295_vm9, %v3039_v2, %v1248_v56  ;;  %v1385_v50 = vsel %vm1383_vm0, %v1384_v17, %v3322_v3  ;;  %v3349_v52 = vsel %vm1005_vm10, %v1001_v61, 1326507024  ;;  %v883_v42 = vadd.s32 %v881_v10, %v879_v63 }
 0x20f   :  { %v1253_v8 = vmul.f32 %v3342_v49, %v3342_v49  ;;  %v1386_v4 = vclz %v1385_v50  ;;  %v3353_v31 = vand.u32 3, %v1269_v38  ;;  %v1374_v62 = vadd.s32 %v3251_v7, %v3238_v54 }
 0x210   :  { %v873_v27 = vshrl.u32 %v869_v46, 16  ;;  %v890_v32 = vmul.u32 %v888_v6, %v864_v16  ;;  %v3359_v14 = vsel %vm848_vm8, %v851_v57, %v853_v41  ;;  %v896_v18 = vshll.u32 %v3337_v44, 16 }
 0x211   :  { %v1254_v40 = vmul.f32 -0.001358992, %v1253_v8  ;;  %v1261_v15 = vmul.f32 -0.00019511016, %v1253_v8  ;;  %v2399_v51 = vadd.s32 4294967294, %v1386_v4  ;;  %v875_v48 = vshrl.u32 %v870_v33, 16 }
 0x212   :  { %v884_v61 = vadd.s32 %v883_v42, %v873_v27  ;;  %vm898_vm13 = vc.u32 %v890_v32, %v894_v5  ;;  %v900_v12 = vadd.s32 %v894_v5, %v890_v32  ;;  %v893_v54 = vmul.u32 %v889_v30, %v865_v25 }
 0x213   :  { %v1255_v60 = vadd.f32 0.041655596, %v1254_v40  ;;  %v1262_v58 = vadd.f32 0.008332121, %v1261_v15  ;;  %vm2400_vm14 = vcmp.lt.s32.totalorder %v2399_v51, 0  ;;  %v899_v7 = vsel %vm898_vm13, 1, %v2528_v0 }
 0x214   :  { %v1389_v55 = vsel %vm2400_vm14, 0, %v2399_v51  ;;  %vm902_vm15 = vc.u32 %v900_v12, %v896_v18  ;;  %v970_v1 = vand.u32 2147483647, %v3044_v36  ;;  %vm1282_vm1 = vcmp.lt.s32.totalorder %v3066_v37, 0 }
 0x215   :  { %v1256_v16 = vmul.f32 %v1255_v60, %v1253_v8  ;;  %v1263_v46 = vmul.f32 %v1262_v58, %v1253_v8  ;;  %v1390_v6 = vsub.s32 32, %v1389_v55  ;;  %v1394_v53 = vsub.s32 4294967266, %v1389_v55 }
 0x216   :  { %v3365_v57 = vadd.s32 %v884_v61, %v875_v48  ;;  %v901_v9 = vadd.s32 %v899_v7, %v893_v54  ;;  %v903_v26 = vsel %vm902_vm15, 1, %v2528_v0  ;;  %v1391_v25 = vshll.u32 %v3322_v3, %v1389_v55 }
 0x217   :  { %v1257_v38 = vadd.f32 -0.4999988, %v1256_v16  ;;  %v1264_v33 = vadd.f32 -0.16666654, %v1263_v46  ;;  %v1392_v30 = vshrl.u32 %v1374_v62, %v1390_v6  ;;  %vm1272_vm3 = vcmp.eq.s32.totalorder %v3353_v31, 0 }
 0x218   :  { %vm1275_vm4 = vcmp.eq.s32.totalorder %v3353_v31, 2  ;;  %v1395_v17 = vadd.s32 127, %v1394_v53  ;;  %v895_v63 = vshrl.u32 %v3324_v11, 16  ;;  %v3372_v56 = vadd.s32 %v900_v12, %v896_v18 }
 0x219   :  { %v905_v41 = vadd.s32 %v903_v26, %v901_v9  ;;  %v1258_v50 = vmul.f32 %v1257_v38, %v1253_v8  ;;  %v1265_v10 = vmul.f32 %v1264_v33, %v1253_v8  ;;  %vm1271_vm5 = vcmp.lt.s32.totalorder %v3353_v31, 2 }
 0x21a   :  { %vm3377_vm6 = vcmp.le.f32.partialorder %v1280_v59, 0.7853982  ;;  %v1393_v3 = vor.u32 %v1392_v30, %v1391_v25  ;;  %v1404_v4 = vsub.s32 4, %v3311_v29  ;;  %vm1268_vm7 = vweird.f32 %v3039_v2 }
 0x21b   :  { %v1396_v42 = vshll.u32 %v1395_v17, 23  ;;  %v897_v11 = vshrl.u32 %v3337_v44, 16  ;;  %v906_v62 = vadd.s32 %v905_v41, %v895_v63  ;;  %vm910_vm8 = vc.u32 %v3365_v57, %v3372_v56 }
 0x21c   :  { %v1259_v8 = vadd.f32 1.0, %v1258_v50  ;;  %v1266_v27 = vadd.f32 1.0, %v1265_v10  ;;  %v977_v59 = vand.u32 8388607, %v970_v1  ;;  %v987_v32 = vshll.u32 %v2531_v19, %v3126_v35 }
 0x21d   :  { %v1397_v40 = vor.u32 4788187, %v1396_v42  ;;  %v1400_v15 = vcvt.s32.f32 %v1393_v3  ;;  %v907_v51 = vadd.s32 %v906_v62, %v897_v11  ;;  %v988_v61 = vshrl.u32 %v2532_v21, %v3177_v22 }
 0x21e   :  { %v1267_v44 = vmul.f32 %v1266_v27, %v3342_v49  ;;  %v1276_v18 = vxor.u32 2147483648, %v1259_v8  ;;  %v990_v12 = vshll.u32 %v2532_v21, %v3126_v35  ;;  %v991_v60 = vshrl.u32 %v2533_v24, %v3177_v22 }
 0x21f   :  { %v1398_v58 = vand.u32 2147483647, %v1397_v40  ;;  %v911_v48 = vadd.s32 1, %v907_v51  ;;  %v993_v55 = vshll.u32 %v2533_v24, %v3126_v35  ;;  %v994_v54 = vshrl.u32 %v2534_v28, %v3177_v22 }
 0x220   :  { %v1273_v7 = vxor.u32 2147483648, %v1267_v44  ;;  %v1405_v49 = vsel %vm1282_vm1, %v1404_v4, %v3311_v29  ;;  %v908_v16 = vmul.u32 %v3291_v23, %v3359_v14  ;;  %v3406_v46 = vor.u32 %v988_v61, %v987_v32 }
 0x221   :  { %v1401_v6 = vmul.f32 %v1400_v15, %v1398_v58  ;;  %v912_v53 = vsel %vm910_vm8, %v911_v48, %v907_v51  ;;  %v3411_v9 = vor.u32 %v991_v60, %v990_v12  ;;  %v995_v35 = vor.u32 %v994_v54, %v993_v55 }
 0x222   :  { %v1274_v26 = vsel %vm1272_vm3, %v1259_v8, %v1273_v7  ;;  %v1277_v38 = vsel %vm1275_vm4, %v1276_v18, %v1267_v44  ;;  %v913_v29 = vadd.s32 %v912_v53, %v908_v16  ;;  %v978_v33 = vor.u32 8388608, %v977_v59 }
 0x223   :  { %v1278_v23 = vsel %vm1271_vm5, %v1274_v26, %v1277_v38  ;;  %v1402_v14 = vxor.u32 2147483648, %v1401_v6  ;;  %v1407_v25 = vsel %vm3377_vm6, 0, %v1405_v49  ;;  %vm1002_vm9 = vcmp.lt.s32.totalorder %v3202_v20, 1 }
 0x224   :  { %v1279_v30 = vsel %vm1268_vm7, nan, %v1278_v23  ;;  %v914_v17 = vadd.s32 536870912, %v913_v29  ;;  %vm1003_vm11 = vcmp.lt.s32.totalorder %v3202_v20, 2  ;;  %vm1004_vm0 = vcmp.lt.s32.totalorder %v3202_v20, 3 }
 0x225   :  { %1471 = vmatpush.msra.mxu2 %v1279_v30  ;;  %v1403_v63 = vsel %vm1282_vm1, %v1402_v14, %v1401_v6  ;;  %v1010_v31 = vsel %vm1002_vm9, %v3406_v46, %v3411_v9  ;;  %v1012_v41 = vsel %vm1004_vm0, %v995_v35, %v3309_v43  ;;  %v1014_v2 = vsel %vm1002_vm9, %v3411_v9, %v995_v35 }
 0x226   :  { %v1406_v50 = vsel %vm3377_vm6, %v3066_v37, %v1403_v63  ;;  %v3441_v10 = vshrl.u32 %v914_v17, 30  ;;  %v1016_v3 = vsel %vm1004_vm0, %v3285_v45, %v3349_v52  ;;  %v3447_v4 = vshll.u32 %v978_v33, 8 }
 0x227   :  { %v1408_v42 = vmul.f32 %v1406_v50, %v1406_v50  ;;  %v1424_v11 = vadd.s32 3, %v1407_v25  ;;  %v1017_v43 = vsel %vm1003_vm11, %v1014_v2, %v1016_v3  ;;  %v1013_v5 = vsel %vm1003_vm11, %v1010_v31, %v1012_v41 }
 0x228   :  { %v916_v62 = vshll.u32 %v3441_v10, 30  ;;  %v1022_v59 = vshrl.u32 %v1017_v43, 16  ;;  %v1019_v40 = vand.u32 65535, %v3447_v4  ;;  %v1021_v45 = vand.u32 65535, %v1017_v43 }
 0x229   :  { %v1409_v8 = vmul.f32 -0.001358992, %v1408_v42  ;;  %v1416_v27 = vmul.f32 -0.00019511016, %v1408_v42  ;;  %v1425_v51 = vand.u32 3, %v1424_v11  ;;  %v1044_v61 = vshrl.u32 %v1013_v5, 16 }
 0x22a   :  { %v3454_v32 = vsub.s32 %v913_v29, %v916_v62  ;;  %v1020_v18 = vshrl.u32 %v3447_v4, 16  ;;  %v1024_v12 = vmul.u32 %v1022_v59, %v1019_v40  ;;  %v1043_v7 = vand.u32 65535, %v1013_v5 }
 0x22b   :  { %v1410_v52 = vadd.f32 0.041655596, %v1409_v8  ;;  %v1417_v15 = vadd.f32 0.008332121, %v1416_v27  ;;  %vm1430_vm13 = vcmp.eq.s32.totalorder %v1425_v51, 2  ;;  %v1023_v53 = vmul.u32 %v1021_v45, %v1019_v40 }
 0x22c   :  { %vm918_vm12 = vcmp.lt.s32.totalorder %v3454_v32, 0  ;;  %v919_v44 = vsub.s32 0, %v3454_v32  ;;  %v3461_v55 = vmul.u32 %v1021_v45, %v1020_v18  ;;  %v1027_v54 = vshll.u32 %v1024_v12, 16 }
 0x22d   :  { %v1411_v60 = vmul.f32 %v1410_v52, %v1408_v42  ;;  %v1418_v58 = vmul.f32 %v1417_v15, %v1408_v42  ;;  %vm1427_vm14 = vcmp.eq.s32.totalorder %v1425_v51, 0  ;;  %v909_v26 = vadd.s32 %v3372_v56, %v3365_v57 }
 0x22e   :  { %v920_v48 = vsel %vm918_vm12, %v919_v44, %v3454_v32  ;;  %v1007_v38 = vsel %vm1005_vm10, %v995_v35, 2102212464  ;;  %v1026_v29 = vmul.u32 %v1022_v59, %v1020_v18  ;;  %v1046_v33 = vmul.u32 %v1044_v61, %v1019_v40 }
 0x22f   :  { %v1412_v49 = vadd.f32 -0.4999988, %v1411_v60  ;;  %v1419_v16 = vadd.f32 -0.16666654, %v1418_v58  ;;  %v921_v6 = vclz %v920_v48  ;;  %vm1426_vm15 = vcmp.lt.s32.totalorder %v1425_v51, 2 }
 0x230   :  { %vm1031_vm1 = vc.u32 %v1023_v53, %v1027_v54  ;;  %vm1423_vm3 = vweird.f32 %v3066_v37  ;;  %v1029_v30 = vshll.u32 %v3461_v55, 16  ;;  %v1033_v63 = vadd.s32 %v1027_v54, %v1023_v53 }
 0x231   :  { %v1413_v23 = vmul.f32 %v1412_v49, %v1408_v42  ;;  %v1420_v14 = vmul.f32 %v1419_v16, %v1408_v42  ;;  %v2390_v25 = vadd.s32 4294967294, %v921_v6  ;;  %v1032_v17 = vsel %vm1031_vm1, 1, %v2528_v0 }
 0x232   :  { %v1047_v31 = vmul.u32 %v1043_v7, %v1020_v18  ;;  %v1034_v56 = vadd.s32 %v1032_v17, %v1026_v29  ;;  %vm1035_vm10 = vc.u32 %v1033_v63, %v1029_v30  ;;  %v1045_v2 = vmul.u32 %v1043_v7, %v1019_v40 }
 0x233   :  { %v1414_v41 = vadd.f32 1.0, %v1413_v23  ;;  %v1421_v57 = vadd.f32 1.0, %v1420_v14  ;;  %vm2391_vm4 = vcmp.lt.s32.totalorder %v2390_v25, 0  ;;  %v1049_v3 = vshll.u32 %v1046_v33, 16 }
 0x234   :  { %v924_v35 = vsel %vm2391_vm4, 0, %v2390_v25  ;;  %v1028_v62 = vshrl.u32 %v1024_v12, 16  ;;  %v1036_v27 = vsel %vm1035_vm10, 1, %v2528_v0  ;;  %v1048_v59 = vmul.u32 %v1044_v61, %v1020_v18 }
 0x235   :  { %v1422_v42 = vmul.f32 %v1421_v57, %v1406_v50  ;;  %v1431_v11 = vxor.u32 2147483648, %v1414_v41  ;;  %v925_v43 = vsub.s32 32, %v924_v35  ;;  %v926_v5 = vshll.u32 %v3454_v32, %v924_v35 }
 0x236   :  { %v929_v8 = vsub.s32 4294967266, %v924_v35  ;;  %v1038_v15 = vadd.s32 %v1036_v27, %v1034_v56  ;;  %v1051_v44 = vshll.u32 %v1047_v31, 16  ;;  %vm1053_vm5 = vc.u32 %v1045_v2, %v1049_v3 }
 0x237   :  { %v1428_v45 = vxor.u32 2147483648, %v1422_v42  ;;  %v927_v52 = vshrl.u32 %v909_v26, %v925_v43  ;;  %v1432_v60 = vsel %vm1430_vm13, %v1431_v11, %v1422_v42  ;;  %v1055_v40 = vadd.s32 %v1049_v3, %v1045_v2 }
 0x238   :  { %v930_v58 = vadd.s32 127, %v929_v8  ;;  %v1039_v54 = vadd.s32 %v1038_v15, %v1028_v62  ;;  %v1054_v12 = vsel %vm1053_vm5, 1, %v2528_v0  ;;  %v986_v18 = vshrl.u32 %v2531_v19, %v3177_v22 }
 0x239   :  { %v1429_v50 = vsel %vm1427_vm14, %v1414_v41, %v1428_v45  ;;  %v928_v48 = vor.u32 %v927_v52, %v926_v5  ;;  %v1056_v49 = vadd.s32 %v1054_v12, %v1048_v59  ;;  %vm1057_vm6 = vc.u32 %v1055_v40, %v1051_v44 }
 0x23a   :  { %v1433_v32 = vsel %vm1426_vm15, %v1429_v50, %v1432_v60  ;;  %v931_v7 = vshll.u32 %v930_v58, 23  ;;  %v1030_v16 = vshrl.u32 %v3461_v55, 16  ;;  %v1058_v6 = vsel %vm1057_vm6, 1, %v2528_v0 }
 0x23b   :  { %v1434_v61 = vsel %vm1423_vm3, nan, %v1433_v32  ;;  %v1050_v26 = vshrl.u32 %v1046_v33, 16  ;;  %v1060_v29 = vadd.s32 %v1058_v6, %v1056_v49  ;;  %v1006_v51 = vsel %vm1002_vm9, %v986_v18, %v3406_v46 }
 0x23c   :  { %1494 = vmatpush.msra.mxu3 %v1434_v61  ;;  %v932_v53 = vor.u32 4788187, %v931_v7  ;;  %v1008_v37 = vsel %vm1004_vm0, %v3411_v9, %v1007_v38  ;;  %v1040_v23 = vadd.s32 %v1039_v54, %v1030_v16  ;;  %v935_v25 = vcvt.s32.f32 %v928_v48 }
 0x23d   :  { %v1052_v22 = vshrl.u32 %v1047_v31, 16  ;;  %v1061_v30 = vadd.s32 %v1060_v29, %v1050_v26  ;;  %v1059_v55 = vadd.s32 %v1055_v40, %v1051_v44  ;;  %v1009_v63 = vsel %vm1003_vm11, %v1006_v51, %v1008_v37 }
 0x23e   :  { %v933_v14 = vand.u32 2147483647, %v932_v53  ;;  %vm817_vm8 = vcmp.lt.s32.totalorder %v3036_v47, 0  ;;  %v1063_v46 = vmul.u32 %v3447_v4, %v1009_v63  ;;  %vm3494_vm9 = vcmp.le.f32.partialorder %v815_v13, 0.7853982  ;;  %v2401_v63 = vld [vmem:[%s4085_s3 + $0x10] sm:$0xff] }
 0x23f   :  { %v1062_v33 = vadd.s32 %v1061_v30, %v1052_v22  ;;  %vm1065_vm7 = vc.u32 %v1040_v23, %v1059_v55  ;;  %v939_v31 = vsub.s32 4, %v3441_v10  ;;  %v1064_v18 = vadd.s32 %v1059_v55, %v1040_v23 }
 0x240   :  { %v936_v17 = vmul.f32 %v935_v25, %v933_v14  ;;  %vm958_vm15 = vweird.f32 %v3036_v47  ;;  %vm972_vm1 = vcmp.lt.s32.totalorder %v3044_v36, 0  ;;  %vm3519_vm3 = vcmp.le.f32.partialorder %v970_v1, 0.7853982 }
 0x241   :  { %v1066_v57 = vadd.s32 1, %v1062_v33  ;;  %v940_v42 = vsel %vm817_vm8, %v939_v31, %v3441_v10  ;;  %vm1113_vm6 = vweird.f32 %v3044_v36 }
 0x242   :  { %v937_v41 = vxor.u32 2147483648, %v936_v17  ;;  %v942_v5 = vsel %vm3494_vm9, 0, %v940_v42 }
 0x243   :  { %v1067_v56 = vsel %vm1065_vm7, %v1066_v57, %v1062_v33  ;;  %v959_v44 = vadd.s32 3, %v942_v5 }
 0x244   :  { %v938_v38 = vsel %vm817_vm8, %v937_v41, %v936_v17  ;;  %v1068_v35 = vadd.s32 %v1067_v56, %v1063_v46 }
 0x245   :  { %v941_v20 = vsel %vm3494_vm9, %v3036_v47, %v938_v38  ;;  %v960_v54 = vand.u32 3, %v959_v44  ;;  %v2402_v47 = vld [vmem:[%s4085_s3 + $0x18] sm:$0xff]  ;;  %v2403_v38 = vld [vmem:[%s4084_s2 + $0x20] sm:$0xff] }
 0x246   :  { %v943_v2 = vmul.f32 %v941_v20, %v941_v20  ;;  %v1069_v3 = vadd.s32 536870912, %v1068_v35  ;;  %1443 = vperm.xlu0 %2463, %v2403_v38  }
 0x247   :  { %vm961_vm0 = vcmp.lt.s32.totalorder %v960_v54, 2  ;;  %vm962_vm13 = vcmp.eq.s32.totalorder %v960_v54, 0  ;;  %vm965_vm14 = vcmp.eq.s32.totalorder %v960_v54, 2 }
 0x248   :  { %v944_v4 = vmul.f32 -0.001358992, %v943_v2  ;;  %v951_v11 = vmul.f32 -0.00019511016, %v943_v2  ;;  %v3503_v43 = vshrl.u32 %v1069_v3, 30 }
 0x24a   :  { %v945_v13 = vadd.f32 0.041655596, %v944_v4  ;;  %v952_v62 = vadd.f32 0.008332121, %v951_v11  ;;  %v1071_v8 = vshll.u32 %v3503_v43, 30  ;;  %v1094_v31 = vsub.s32 4, %v3503_v43 }
 0x24c   :  { %v946_v27 = vmul.f32 %v945_v13, %v943_v2  ;;  %v953_v59 = vmul.f32 %v952_v62, %v943_v2  ;;  %v1072_v45 = vsub.s32 %v1068_v35, %v1071_v8 }
 0x24e   :  { %v947_v52 = vadd.f32 -0.4999988, %v946_v27  ;;  %v954_v15 = vadd.f32 -0.16666654, %v953_v59  ;;  %vm1073_vm11 = vcmp.lt.s32.totalorder %v1072_v45, 0  ;;  %v1074_v60 = vsub.s32 0, %v1072_v45 }
 0x250   :  { %v948_v10 = vmul.f32 %v947_v52, %v943_v2  ;;  %v955_v58 = vmul.f32 %v954_v15, %v943_v2  ;;  %v1075_v40 = vsel %vm1073_vm11, %v1074_v60, %v1072_v45  ;;  %v1095_v2 = vsel %vm972_vm1, %v1094_v31, %v3503_v43 }
 0x251   :  { %v1076_v12 = vclz %v1075_v40  ;;  %v1097_v4 = vsel %vm3519_vm3, 0, %v1095_v2 }
 0x252   :  { %v949_v50 = vadd.f32 1.0, %v948_v10  ;;  %v956_v48 = vadd.f32 1.0, %v955_v58  ;;  %v1114_v8 = vadd.s32 3, %v1097_v4 }
 0x253   :  { %v2393_v49 = vadd.s32 4294967294, %v1076_v12 }
 0x254   :  { %v957_v32 = vmul.f32 %v956_v48, %v941_v20  ;;  %v966_v7 = vxor.u32 2147483648, %v949_v50  ;;  %v1115_v15 = vand.u32 3, %v1114_v8 }
 0x255   :  { %vm2394_vm12 = vcmp.lt.s32.totalorder %v2393_v49, 0 }
 0x256   :  { %v963_v61 = vxor.u32 2147483648, %v957_v32  ;;  %v1079_v16 = vsel %vm2394_vm12, 0, %v2393_v49  ;;  %v967_v53 = vsel %vm965_vm14, %v966_v7, %v957_v32  ;;  %vm1117_vm4 = vcmp.eq.s32.totalorder %v1115_v15, 0  ;;  %v1449_v7 = vpop.permute.xlu2 %1448 }
 0x257   :  { %v1080_v26 = vsub.s32 32, %v1079_v16  ;;  %v1084_v29 = vsub.s32 4294967266, %v1079_v16  ;;  %v1081_v14 = vshll.u32 %v1072_v45, %v1079_v16  ;;  %vm1120_vm10 = vcmp.eq.s32.totalorder %v1115_v15, 2 }
 0x258   :  { %v964_v6 = vsel %vm962_vm13, %v949_v50, %v963_v61  ;;  %vm1116_vm5 = vcmp.lt.s32.totalorder %v1115_v15, 2 }
 0x259   :  { %v968_v51 = vsel %vm961_vm0, %v964_v6, %v967_v53  ;;  %v1082_v25 = vshrl.u32 %v1064_v18, %v1080_v26  ;;  %v1085_v22 = vadd.s32 127, %v1084_v29 }
 0x25a   :  { %v969_v37 = vsel %vm958_vm15, nan, %v968_v51  ;;  %v2239_v51 = vlaneseq }
 0x25b   :  { %1472 = vmatpush.msra.mxu2 %v969_v37  ;;  %v1083_v30 = vor.u32 %v1082_v25, %v1081_v14  ;;  %v1086_v17 = vshll.u32 %v1085_v22, 23 }
 0x25c   :  { %2405 = vmatmul.msk.f32.vlgmr.msra.gmra.mxu2 %vm762_vm2, %v2401_v63  ;;  %v3543_v14 = vshrl.u32 %v2239_v51, 7 }
 0x25d   :  { %v1087_v23 = vor.u32 4788187, %v1086_v17  ;;  %v1090_v33 = vcvt.s32.f32 %v1083_v30 }
 0x25e   :  { %2464 = vset.pattern.permute.xlu1 %v3543_v14  ;;  %2468 = vset.pattern.permute.xlu0 %v3543_v14 }
 0x25f   :  { %v1088_v55 = vand.u32 2147483647, %v1087_v23 }
 0x261   :  { %v1091_v41 = vmul.f32 %v1090_v33, %v1088_v55 }
 0x263   :  { %v1092_v57 = vxor.u32 2147483648, %v1091_v41 }
 0x264   :  { %2406 = vmatmul.msk.f32.gmra.mxu2 %vm762_vm2, %v2402_v47 }
 0x265   :  { %v1093_v9 = vsel %vm972_vm1, %v1092_v57, %v1091_v41 }
 0x266   :  { %v1096_v56 = vsel %vm3519_vm3, %v3044_v36, %v1093_v9 }
 0x267   :  { %v1098_v20 = vmul.f32 %v1096_v56, %v1096_v56 }
 0x269   :  { %v1099_v35 = vmul.f32 -0.001358992, %v1098_v20  ;;  %v1106_v1 = vmul.f32 -0.00019511016, %v1098_v20 }
 0x26b   :  { %v1100_v3 = vadd.f32 0.041655596, %v1099_v35  ;;  %v1107_v42 = vadd.f32 0.008332121, %v1106_v1 }
 0x26d   :  { %v1101_v11 = vmul.f32 %v1100_v3, %v1098_v20  ;;  %v1108_v13 = vmul.f32 %v1107_v42, %v1098_v20 }
 0x26f   :  { %v1102_v62 = vadd.f32 -0.4999988, %v1101_v11  ;;  %v1109_v5 = vadd.f32 -0.16666654, %v1108_v13 }
 0x271   :  { %v1103_v27 = vmul.f32 %v1102_v62, %v1098_v20  ;;  %v1110_v59 = vmul.f32 %v1109_v5, %v1098_v20 }
 0x273   :  { %v1104_v45 = vadd.f32 1.0, %v1103_v27  ;;  %v1111_v52 = vadd.f32 1.0, %v1110_v59 }
 0x275   :  { %v1112_v44 = vmul.f32 %v1111_v52, %v1096_v56  ;;  %v1121_v60 = vxor.u32 2147483648, %v1104_v45 }
 0x277   :  { %v1118_v10 = vxor.u32 2147483648, %v1112_v44  ;;  %v1122_v58 = vsel %vm1120_vm10, %v1121_v60, %v1112_v44 }
 0x279   :  { %v1119_v43 = vsel %vm1117_vm4, %v1104_v45, %v1118_v10 }
 0x27a   :  { %v1123_v40 = vsel %vm1116_vm5, %v1119_v43, %v1122_v58 }
 0x27b   :  { %v1124_v50 = vsel %vm1113_vm6, nan, %v1123_v40 }
 0x27c   :  { %1495 = vmatpush.msra.mxu3 %v1124_v50 }
 0x27d   :  { %2407 = vmatmul.msk.f32.vlgmr.msra.gmra.mxu3 %vm762_vm2, %v2401_v63 }
 0x285   :  { %2408 = vmatmul.msk.f32.gmra.mxu3 %vm762_vm2, %v2402_v47 }
 0x2b8   :  { %v1444_v48 = vpop.permute.xlu0 %1443 }
 0x2df   :  { %v1474_v54 = vpop.f32.mrf.mxu2 }
 0x2e0   :  { %v3537_v12 = vadd.f32 %v1474_v54, %v1444_v48 }
 0x2e2   :  { %v1506_v32 = vand.u32 2139095040, %v3537_v12 }
 0x2e4   :  { %v1507_v49 = vshrl.u32 %v1506_v32, 23 }
 0x2e6   :  { %v2409_v16 = vadd.s32 4294967169, %v1507_v49 }
 0x2e7   :  { %v1477_v61 = vpop.f32.mrf.mxu2 }
 0x2e8   :  { %v3540_v18 = vadd.f32 %v1477_v61, %v1449_v7  ;;  %v1513_v26 = vadd.s32 1, %v2409_v16 }
 0x2ea   :  { %v1816_v36 = vand.u32 2139095040, %v3540_v18  ;;  %vm1514_vm8 = vcmp.gt.s32.totalorder %v1513_v26, 0  ;;  %v1813_v30 = vand.u32 2147483647, %v3540_v18 }
 0x2eb   :  { %v1515_v63 = vsel %vm1514_vm8, %v1513_v26, 0 }
 0x2ec   :  { %v1817_v6 = vshrl.u32 %v1816_v36, 23  ;;  %v1820_v57 = vand.u32 8388607, %v1813_v30  ;;  %v3565_v2 = vand.u32 31, %v1515_v63 }
 0x2ee   :  { %v2415_v53 = vadd.s32 4294967169, %v1817_v6  ;;  %v1821_v59 = vor.u32 8388608, %v1820_v57  ;;  %v3576_v15 = vsub.s32 32, %v3565_v2  ;;  %v1529_v61 = vshll.u32 %v2534_v28, %v3565_v2 }
 0x2f0   :  { %v1823_v29 = vadd.s32 1, %v2415_v53  ;;  %v3588_v50 = vshll.u32 %v1821_v59, 8  ;;  %v1530_v54 = vshrl.u32 %v2535_v34, %v3576_v15  ;;  %v3604_v53 = vshll.u32 %v2535_v34, %v3565_v2 }
 0x2f2   :  { %vm1824_vm7 = vcmp.gt.s32.totalorder %v1823_v29, 0  ;;  %v1862_v36 = vand.u32 65535, %v3588_v50  ;;  %v1863_v51 = vshrl.u32 %v3588_v50, 16 }
 0x2f3   :  { %v1825_v22 = vsel %vm1824_vm7, %v1823_v29, 0 }
 0x2f4   :  { %v1827_v17 = vand.u32 31, %v1825_v22  ;;  %v3550_v23 = vshrl.u32 %v1825_v22, 5 }
 0x2f6   :  { %v1828_v55 = vsub.s32 32, %v1827_v17  ;;  %v1839_v41 = vshll.u32 %v2534_v28, %v1827_v17  ;;  %v1842_v47 = vshll.u32 %v2535_v34, %v1827_v17  ;;  %v1830_v38 = vshll.u32 %v2531_v19, %v1827_v17 }
 0x2f7   :  { %v1833_v56 = vshll.u32 %v2532_v21, %v1827_v17  ;;  %v1836_v35 = vshll.u32 %v2533_v24, %v1827_v17  ;;  %vm1848_vm9 = vcmp.lt.s32.totalorder %v3550_v23, 4  ;;  %vm1845_vm11 = vcmp.lt.s32.totalorder %v3550_v23, 1 }
 0x2f8   :  { %v1840_v46 = vshrl.u32 %v2535_v34, %v1828_v55  ;;  %v1843_v9 = vshrl.u32 %v2536_v39, %v1828_v55  ;;  %v1831_v31 = vshrl.u32 %v2532_v21, %v1828_v55  ;;  %v1834_v20 = vshrl.u32 %v2533_v24, %v1828_v55 }
 0x2f9   :  { %v1837_v1 = vshrl.u32 %v2534_v28, %v1828_v55  ;;  %vm1847_vm0 = vcmp.lt.s32.totalorder %v3550_v23, 3  ;;  %vm1846_vm12 = vcmp.lt.s32.totalorder %v3550_v23, 2 }
 0x2fa   :  { %v1841_v3 = vor.u32 %v1840_v46, %v1839_v41  ;;  %v1844_v42 = vor.u32 %v1843_v9, %v1842_v47  ;;  %v1832_v13 = vor.u32 %v1831_v31, %v1830_v38  ;;  %v1835_v62 = vor.u32 %v1834_v20, %v1833_v56 }
 0x2fb   :  { %v1838_v5 = vor.u32 %v1837_v1, %v1836_v35  ;;  %v1829_v41 = vshrl.u32 %v2531_v19, %v1828_v55 }
 0x2fc   :  { %v1854_v27 = vsel %vm1848_vm9, %v1841_v3, 920167782  ;;  %v1858_v45 = vsel %vm1848_vm9, %v1844_v42, 1326507024  ;;  %v1853_v60 = vsel %vm1845_vm11, %v1832_v13, %v1835_v62 }
 0x2fd   :  { %v1855_v10 = vsel %vm1847_vm0, %v1838_v5, %v1854_v27  ;;  %v1857_v43 = vsel %vm1845_vm11, %v1835_v62, %v1838_v5  ;;  %v1859_v40 = vsel %vm1847_vm0, %v1841_v3, %v1858_v45  ;;  %v1850_v22 = vsel %vm1848_vm9, %v1838_v5, 2102212464 }
 0x2fe   :  { %v1860_v49 = vsel %vm1846_vm12, %v1857_v43, %v1859_v40  ;;  %v1849_v56 = vsel %vm1845_vm11, %v1829_v41, %v1832_v13  ;;  %v1851_v20 = vsel %vm1847_vm0, %v1835_v62, %v1850_v22 }
 0x2ff   :  { %v1864_v16 = vand.u32 65535, %v1860_v49  ;;  %v1865_v6 = vshrl.u32 %v1860_v49, 16  ;;  %v3636_v27 = vsel %vm1846_vm12, %v1849_v56, %v1851_v20 }
 0x300   :  { %v1497_v37 = vpop.f32.mrf.mxu3 }
 0x301   :  { %v3545_v25 = vadd.f32 %v1497_v37, %v1444_v48  ;;  %v3590_v48 = vshrl.u32 %v1515_v63, 5  ;;  %v3609_v37 = vshrl.u32 %v2536_v39, %v3576_v15  ;;  %v1867_v17 = vmul.u32 %v1865_v6, %v1862_v36 }
 0x302   :  { %v1868_v47 = vmul.u32 %v1864_v16, %v1863_v51  ;;  %v1866_v46 = vmul.u32 %v1864_v16, %v1862_v36 }
 0x303   :  { %v1661_v33 = vand.u32 2139095040, %v3545_v25  ;;  %v1870_v9 = vshll.u32 %v1867_v17, 16  ;;  %v1534_v55 = vor.u32 %v3609_v37, %v3604_v53  ;;  %vm1538_vm1 = vcmp.lt.s32.totalorder %v3590_v48, 4 }
 0x304   :  { %v1872_v35 = vshll.u32 %v1868_v47, 16 }
 0x305   :  { %v1662_v8 = vshrl.u32 %v1661_v33, 23  ;;  %v3613_v33 = vor.u32 %v1530_v54, %v1529_v61  ;;  %vm1874_vm15 = vc.u32 %v1866_v46, %v1870_v9  ;;  %v1876_v1 = vadd.s32 %v1870_v9, %v1866_v46 }
 0x306   :  { %v1875_v13 = vsel %vm1874_vm15, 1, %v2528_v0  ;;  %vm1815_vm15 = vcmp.lt.s32.totalorder %v3540_v18, 0 }
 0x307   :  { %v2412_v58 = vadd.s32 4294967169, %v1662_v8  ;;  %v3628_v5 = vsel %vm1538_vm1, %v3613_v33, 920167782  ;;  %vm1878_vm3 = vc.u32 %v1876_v1, %v1872_v35 }
 0x308   :  { %v1500_v4 = vpop.f32.mrf.mxu3  ;;  %v1879_v45 = vsel %vm1878_vm3, 1, %v2528_v0 }
 0x309   :  { %v3568_v11 = vadd.f32 %v1500_v4, %v1449_v7  ;;  %v1856_v7 = vsel %vm1846_vm12, %v1853_v60, %v1855_v10  ;;  %v1668_v26 = vadd.s32 1, %v2412_v58  ;;  %v1869_v4 = vmul.u32 %v1865_v6, %v1863_v51 }
 0x30a   :  { %v1887_v63 = vshrl.u32 %v1856_v7, 16  ;;  %v1886_v38 = vand.u32 65535, %v1856_v7  ;;  %v1873_v6 = vshrl.u32 %v1868_v47, 16 }
 0x30b   :  { %v1971_v52 = vand.u32 2139095040, %v3568_v11  ;;  %vm1669_vm14 = vcmp.gt.s32.totalorder %v1668_v26, 0  ;;  %v1877_v59 = vadd.s32 %v1875_v13, %v1869_v4  ;;  %v1968_v7 = vand.u32 2147483647, %v3568_v11 }
 0x30c   :  { %v1889_v3 = vmul.u32 %v1887_v63, %v1862_v36  ;;  %v1890_v62 = vmul.u32 %v1886_v38, %v1863_v51  ;;  %v3632_v8 = vsel %vm1669_vm14, %v1668_v26, 0  ;;  %v1888_v60 = vmul.u32 %v1886_v38, %v1862_v36 }
 0x30d   :  { %v1972_v44 = vshrl.u32 %v1971_v52, 23  ;;  %v1881_v40 = vadd.s32 %v1879_v45, %v1877_v59  ;;  %v1891_v54 = vmul.u32 %v1887_v63, %v1863_v51  ;;  %v1975_v37 = vand.u32 8388607, %v1968_v7 }
 0x30e   :  { %v1892_v10 = vshll.u32 %v1889_v3, 16  ;;  %v1895_v63 = vshrl.u32 %v1890_v62, 16 }
 0x30f   :  { %v2418_v32 = vadd.s32 4294967169, %v1972_v44  ;;  %v1871_v44 = vshrl.u32 %v1867_v17, 16  ;;  %v1893_v17 = vshrl.u32 %v1889_v3, 16 }
 0x310   :  { %vm1896_vm4 = vc.u32 %v1888_v60, %v1892_v10  ;;  %v1898_v23 = vadd.s32 %v1892_v10, %v1888_v60  ;;  %v3677_v60 = vand.u32 31, %v3632_v8  ;;  %v1906_v10 = vmul.u32 %v3588_v50, %v3636_v27 }
 0x311   :  { %v1978_v29 = vadd.s32 1, %v2418_v32  ;;  %v1894_v32 = vshll.u32 %v1890_v62, 16  ;;  %v1882_v16 = vadd.s32 %v1881_v40, %v1871_v44  ;;  %v1897_v36 = vsel %vm1896_vm4, 1, %v2528_v0 }
 0x312   :  { %v1899_v53 = vadd.s32 %v1897_v36, %v1891_v54  ;;  %v3674_v44 = vsel %vm1538_vm1, %v1534_v55, 1326507024  ;;  %vm3762_vm4 = vcmp.le.f32.partialorder %v1813_v30, 0.7853982 }
 0x313   :  { %vm1979_vm13 = vcmp.gt.s32.totalorder %v1978_v29, 0  ;;  %vm1900_vm5 = vc.u32 %v1898_v23, %v1894_v32  ;;  %v3653_v22 = vadd.s32 %v1882_v16, %v1873_v6  ;;  %v3668_v4 = vadd.s32 %v1898_v23, %v1894_v32 }
 0x314   :  { %v1980_v57 = vsel %vm1979_vm13, %v1978_v29, 0  ;;  %v1901_v51 = vsel %vm1900_vm5, 1, %v2528_v0  ;;  %v3701_v6 = vshrl.u32 %v3632_v8, 5 }
 0x315   :  { %v1982_v31 = vand.u32 31, %v1980_v57  ;;  %v3639_v52 = vshrl.u32 %v1980_v57, 5  ;;  %v1903_v41 = vadd.s32 %v1901_v51, %v1899_v53  ;;  %v1976_v57 = vor.u32 8388608, %v1975_v37 }
 0x316   :  { %vm1908_vm6 = vc.u32 %v3653_v22, %v3668_v4  ;;  %vm1693_vm5 = vcmp.lt.s32.totalorder %v3701_v6, 4 }
 0x317   :  { %v3623_v42 = vsub.s32 32, %v1982_v31  ;;  %v1994_v49 = vshll.u32 %v2534_v28, %v1982_v31  ;;  %v1997_v61 = vshll.u32 %v2535_v34, %v1982_v31  ;;  %vm2003_vm10 = vcmp.lt.s32.totalorder %v3639_v52, 4 }
 0x318   :  { %v1985_v46 = vshll.u32 %v2531_v19, %v1982_v31  ;;  %v1988_v9 = vshll.u32 %v2532_v21, %v1982_v31  ;;  %v1991_v47 = vshll.u32 %v2533_v24, %v1982_v31  ;;  %v1904_v38 = vadd.s32 %v1903_v41, %v1893_v17 }
 0x319   :  { %v1995_v43 = vshrl.u32 %v2535_v34, %v3623_v42  ;;  %v1998_v58 = vshrl.u32 %v2536_v39, %v3623_v42  ;;  %v1986_v56 = vshrl.u32 %v2532_v21, %v3623_v42  ;;  %v1989_v20 = vshrl.u32 %v2533_v24, %v3623_v42 }
 0x31a   :  { %v1992_v35 = vshrl.u32 %v2534_v28, %v3623_v42  ;;  %v3670_v13 = vshll.u32 %v1976_v57, 8  ;;  %v1905_v31 = vadd.s32 %v1904_v38, %v1895_v63  ;;  %vm2000_vm7 = vcmp.lt.s32.totalorder %v3639_v52, 1 }
 0x31b   :  { %v1996_v26 = vor.u32 %v1995_v43, %v1994_v49  ;;  %v1999_v29 = vor.u32 %v1998_v58, %v1997_v61  ;;  %v1987_v62 = vor.u32 %v1986_v56, %v1985_v46  ;;  %v1990_v59 = vor.u32 %v1989_v20, %v1988_v9 }
 0x31c   :  { %v1993_v45 = vor.u32 %v1992_v35, %v1991_v47  ;;  %v1909_v43 = vadd.s32 1, %v1905_v31  ;;  %vm2002_vm8 = vcmp.lt.s32.totalorder %v3639_v52, 3  ;;  %vm2001_vm9 = vcmp.lt.s32.totalorder %v3639_v52, 2 }
 0x31d   :  { %v2009_v1 = vsel %vm2003_vm10, %v1996_v26, 920167782  ;;  %v2013_v3 = vsel %vm2003_vm10, %v1999_v29, 1326507024  ;;  %v2008_v58 = vsel %vm2000_vm7, %v1987_v62, %v1990_v59  ;;  %v2017_v23 = vand.u32 65535, %v3670_v13 }
 0x31e   :  { %v2010_v55 = vsel %vm2002_vm8, %v1993_v45, %v2009_v1  ;;  %v2012_v40 = vsel %vm2000_vm7, %v1990_v59, %v1993_v45  ;;  %v2014_v54 = vsel %vm2002_vm8, %v1996_v26, %v2013_v3  ;;  %v1910_v32 = vsel %vm1908_vm6, %v1909_v43, %v1905_v31 }
 0x31f   :  { %v2011_v50 = vsel %vm2001_vm9, %v2008_v58, %v2010_v55  ;;  %v2015_v27 = vsel %vm2001_vm9, %v2012_v40, %v2014_v54  ;;  %v1911_v49 = vadd.s32 %v1910_v32, %v1906_v10  ;;  %v2018_v61 = vshrl.u32 %v3670_v13, 16 }
 0x320   :  { %v2019_v16 = vand.u32 65535, %v2015_v27  ;;  %v2020_v36 = vshrl.u32 %v2015_v27, 16  ;;  %v1984_v53 = vshrl.u32 %v2531_v19, %v3623_v42  ;;  %v2041_v26 = vand.u32 65535, %v2011_v50 }
 0x321   :  { %v2042_v29 = vshrl.u32 %v2011_v50, 16  ;;  %v1912_v51 = vadd.s32 536870912, %v1911_v49  ;;  %v1503_v63 = vand.u32 2147483647, %v3537_v12  ;;  %v3707_v41 = vsub.s32 32, %v3677_v60 }
 0x322   :  { %v2022_v37 = vmul.u32 %v2020_v36, %v2017_v23  ;;  %v2023_v17 = vmul.u32 %v2019_v16, %v2018_v61  ;;  %v3711_v57 = vshll.u32 %v2534_v28, %v3677_v60  ;;  %v2004_v8 = vsel %vm2000_vm7, %v1984_v53, %v1987_v62 }
 0x323   :  { %v2044_v46 = vmul.u32 %v2042_v29, %v2017_v23  ;;  %v3715_v9 = vshrl.u32 %v1912_v51, 30  ;;  %v2005_v42 = vsel %vm2003_vm10, %v1993_v45, 2102212464  ;;  %v2021_v47 = vmul.u32 %v2019_v16, %v2017_v23 }
 0x324   :  { %v2025_v38 = vshll.u32 %v2022_v37, 16  ;;  %v2024_v56 = vmul.u32 %v2020_v36, %v2018_v61  ;;  %v2043_v20 = vmul.u32 %v2041_v26, %v2017_v23  ;;  %v2045_v35 = vmul.u32 %v2041_v26, %v2018_v61 }
 0x325   :  { %v2047_v1 = vshll.u32 %v2044_v46, 16  ;;  %v1914_v3 = vshll.u32 %v3715_v9, 30  ;;  %v2027_v31 = vshll.u32 %v2023_v17, 16  ;;  %v2006_v62 = vsel %vm2002_vm8, %v1990_v59, %v2005_v42 }
 0x326   :  { %vm2029_vm11 = vc.u32 %v2021_v47, %v2025_v38  ;;  %v2031_v10 = vadd.s32 %v2025_v38, %v2021_v47  ;;  %v2026_v43 = vshrl.u32 %v2022_v37, 16  ;;  %v2046_v40 = vmul.u32 %v2042_v29, %v2018_v61 }
 0x327   :  { %v2030_v58 = vsel %vm2029_vm11, 1, %v2528_v0  ;;  %vm2051_vm0 = vc.u32 %v2043_v20, %v2047_v1  ;;  %v3723_v55 = vsub.s32 %v1911_v49, %v1914_v3  ;;  %v2049_v32 = vshll.u32 %v2045_v35, 16 }
 0x328   :  { %v2032_v45 = vadd.s32 %v2030_v58, %v2024_v56  ;;  %vm2033_vm12 = vc.u32 %v2031_v10, %v2027_v31  ;;  %v2052_v50 = vsel %vm2051_vm0, 1, %v2528_v0  ;;  %v2053_v27 = vadd.s32 %v2047_v1, %v2043_v20 }
 0x329   :  { %v2034_v54 = vsel %vm2033_vm12, 1, %v2528_v0  ;;  %vm1916_vm13 = vcmp.lt.s32.totalorder %v3723_v55, 0  ;;  %v1917_v23 = vsub.s32 0, %v3723_v55  ;;  %v2054_v16 = vadd.s32 %v2052_v50, %v2046_v40 }
 0x32a   :  { %v2036_v59 = vadd.s32 %v2034_v54, %v2032_v45  ;;  %v3731_v36 = vshrl.u32 %v2535_v34, %v3707_v41  ;;  %v3735_v49 = vshll.u32 %v2535_v34, %v3677_v60  ;;  %v2007_v61 = vsel %vm2001_vm9, %v2004_v8, %v2006_v62 }
 0x32b   :  { %vm2055_vm14 = vc.u32 %v2053_v27, %v2049_v32  ;;  %v1918_v53 = vsel %vm1916_vm13, %v1917_v23, %v3723_v55  ;;  %v2028_v26 = vshrl.u32 %v2023_v17, 16  ;;  %v2048_v42 = vshrl.u32 %v2044_v46, 16 }
 0x32c   :  { %v2037_v29 = vadd.s32 %v2036_v59, %v2026_v43  ;;  %v2056_v51 = vsel %vm2055_vm14, 1, %v2528_v0  ;;  %v1919_v37 = vclz %v1918_v53  ;;  %v1524_v38 = vshrl.u32 %v2533_v24, %v3576_v15 }
 0x32d   :  { %v2058_v47 = vadd.s32 %v2056_v51, %v2054_v16  ;;  %v2050_v56 = vshrl.u32 %v2045_v35, 16  ;;  %v1521_v34 = vshrl.u32 %v2532_v21, %v3576_v15  ;;  %v1523_v52 = vshll.u32 %v2532_v21, %v3565_v2 }
 0x32e   :  { %v1527_v8 = vshrl.u32 %v2534_v28, %v3576_v15  ;;  %v2416_v17 = vadd.s32 4294967294, %v1919_v37  ;;  %v2038_v20 = vadd.s32 %v2037_v29, %v2028_v26  ;;  %v1526_v46 = vshll.u32 %v2533_v24, %v3565_v2 }
 0x32f   :  { %v2059_v1 = vadd.s32 %v2058_v47, %v2048_v42  ;;  %v1688_v35 = vshrl.u32 %v2536_v39, %v3707_v41  ;;  %v2057_v3 = vadd.s32 %v2053_v27, %v2049_v32  ;;  %v1510_v31 = vand.u32 8388607, %v1503_v63 }
 0x330   :  { %v1520_v10 = vshll.u32 %v2531_v19, %v3565_v2  ;;  %vm2417_vm3 = vcmp.lt.s32.totalorder %v2416_v17, 0  ;;  %v3758_v43 = vor.u32 %v1524_v38, %v1523_v52  ;;  %v1528_v58 = vor.u32 %v1527_v8, %v1526_v46 }
 0x331   :  { %v2060_v62 = vadd.s32 %v2059_v1, %v2050_v56  ;;  %v1907_v39 = vadd.s32 %v3668_v4, %v3653_v22  ;;  %v1922_v40 = vsel %vm2417_vm3, 0, %v2416_v17  ;;  %v2061_v54 = vmul.u32 %v3670_v13, %v2007_v61 }
 0x332   :  { %v1522_v32 = vor.u32 %v1521_v34, %v1520_v10  ;;  %v1923_v50 = vsub.s32 32, %v1922_v40  ;;  %v1927_v2 = vsub.s32 4294967266, %v1922_v40  ;;  %v1937_v27 = vsub.s32 4, %v3715_v9 }
 0x333   :  { %vm2063_vm10 = vc.u32 %v2038_v20, %v2057_v3  ;;  %v2064_v23 = vadd.s32 1, %v2060_v62  ;;  %v1511_v59 = vor.u32 8388608, %v1510_v31  ;;  %vm1535_vm6 = vcmp.lt.s32.totalorder %v3590_v48, 1 }
 0x334   :  { %vm1537_vm7 = vcmp.lt.s32.totalorder %v3590_v48, 3  ;;  %v1924_v30 = vshll.u32 %v3723_v55, %v1922_v40  ;;  %v1925_v22 = vshrl.u32 %v1907_v39, %v1923_v50  ;;  %v1928_v4 = vadd.s32 127, %v1927_v2 }
 0x335   :  { %v1547_v13 = vsel %vm1535_vm6, %v3758_v43, %v1528_v58  ;;  %v2065_v16 = vsel %vm2063_vm10, %v2064_v23, %v2060_v62  ;;  %vm1536_vm8 = vcmp.lt.s32.totalorder %v3590_v48, 2  ;;  %v1543_v61 = vsel %vm1535_vm6, %v1522_v32, %v3758_v43 }
 0x336   :  { %v1545_v53 = vsel %vm1537_vm7, %v1528_v58, %v3628_v5  ;;  %v1926_v26 = vor.u32 %v1925_v22, %v1924_v30  ;;  %v1929_v29 = vshll.u32 %v1928_v4, 23  ;;  %v2066_v55 = vadd.s32 %v2065_v16, %v2061_v54 }
 0x337   :  { %v1549_v51 = vsel %vm1537_vm7, %v3613_v33, %v3674_v44  ;;  %v1689_v37 = vor.u32 %v1688_v35, %v3735_v49  ;;  %v1938_v42 = vsel %vm1815_vm15, %v1937_v27, %v3715_v9  ;;  %v3794_v38 = vshll.u32 %v1511_v59, 8 }
 0x338   :  { %v1550_v47 = vsel %vm1536_vm8, %v1547_v13, %v1549_v51  ;;  %v1930_v5 = vor.u32 4788187, %v1929_v29  ;;  %v2067_v56 = vadd.s32 536870912, %v2066_v55  ;;  %v1546_v34 = vsel %vm1536_vm8, %v1543_v61, %v1545_v53 }
 0x339   :  { %v1554_v52 = vand.u32 65535, %v1550_v47  ;;  %v3800_v33 = vor.u32 %v3731_v36, %v3711_v57  ;;  %v1552_v44 = vand.u32 65535, %v3794_v38  ;;  %v1553_v49 = vshrl.u32 %v3794_v38, 16 }
 0x33a   :  { %v1555_v9 = vshrl.u32 %v1550_v47, 16  ;;  %v1931_v8 = vand.u32 2147483647, %v1930_v5  ;;  %v1933_v17 = vcvt.s32.f32 %v1926_v26  ;;  %v1940_v1 = vsel %vm3762_vm4, 0, %v1938_v42 }
 0x33b   :  { %v3806_v46 = vshrl.u32 %v2067_v56, 30  ;;  %v1519_v35 = vshrl.u32 %v2531_v19, %v3576_v15  ;;  %v3810_v10 = vmul.u32 %v1554_v52, %v1553_v49  ;;  %v1577_v57 = vshrl.u32 %v1546_v34, 16 }
 0x33c   :  { %v1557_v31 = vmul.u32 %v1555_v9, %v1552_v44  ;;  %v3814_v36 = vsel %vm1693_vm5, %v1689_v37, 1326507024  ;;  %v1934_v62 = vmul.f32 %v1933_v17, %v1931_v8  ;;  %v2062_v39 = vadd.s32 %v2057_v3, %v2038_v20 }
 0x33d   :  { %v2069_v40 = vshll.u32 %v3806_v46, 30  ;;  %v1957_v54 = vadd.s32 3, %v1940_v1  ;;  %v1539_v50 = vsel %vm1535_vm6, %v1519_v35, %v1522_v32  ;;  %v1556_v2 = vmul.u32 %v1554_v52, %v1552_v44 }
 0x33e   :  { %v1560_v27 = vshll.u32 %v1557_v31, 16  ;;  %v1935_v23 = vxor.u32 2147483648, %v1934_v62  ;;  %v1540_v59 = vsel %vm1538_vm1, %v1528_v58, 2102212464  ;;  %v1576_v30 = vand.u32 65535, %v1546_v34 }
 0x33f   :  { %v3819_v15 = vsub.s32 %v2066_v55, %v2069_v40  ;;  %v1562_v22 = vshll.u32 %v3810_v10, 16  ;;  %v3824_v20 = vmul.u32 %v1577_v57, %v1552_v44  ;;  %v1559_v13 = vmul.u32 %v1555_v9, %v1553_v49 }
 0x340   :  { %vm1564_vm9 = vc.u32 %v1556_v2, %v1560_v27  ;;  %v1566_v4 = vadd.s32 %v1560_v27, %v1556_v2  ;;  %v1936_v3 = vsel %vm1815_vm15, %v1935_v23, %v1934_v62  ;;  %v1541_v58 = vsel %vm1537_vm7, %v3758_v43, %v1540_v59 }
 0x341   :  { %vm2071_vm11 = vcmp.lt.s32.totalorder %v3819_v15, 0  ;;  %v2072_v32 = vsub.s32 0, %v3819_v15  ;;  %v3833_v16 = vsel %vm3762_vm4, %v3540_v18, %v1936_v3  ;;  %v1565_v61 = vsel %vm1564_vm9, 1, %v2528_v0 }
 0x342   :  { %vm1568_vm1 = vc.u32 %v1566_v4, %v1562_v22  ;;  %v1941_v53 = vmul.f32 %v3833_v16, %v3833_v16  ;;  %v1567_v29 = vadd.s32 %v1565_v61, %v1559_v13  ;;  %v1580_v55 = vmul.u32 %v1576_v30, %v1553_v49 }
 0x343   :  { %v2073_v26 = vsel %vm2071_vm11, %v2072_v32, %v3819_v15  ;;  %v3842_v51 = vand.u32 3, %v1957_v54  ;;  %v1569_v45 = vsel %vm1568_vm1, 1, %v2528_v0  ;;  %v1582_v42 = vshll.u32 %v3824_v20, 16 }
 0x344   :  { %v2074_v37 = vclz %v2073_v26  ;;  %v1942_v47 = vmul.f32 -0.001358992, %v1941_v53  ;;  %v1949_v5 = vmul.f32 -0.00019511016, %v1941_v53  ;;  %v3848_v43 = vsel %vm1536_vm8, %v1539_v50, %v1541_v58 }
 0x345   :  { %v1578_v56 = vmul.u32 %v1576_v30, %v1552_v44  ;;  %v1561_v52 = vshrl.u32 %v1557_v31, 16  ;;  %v1571_v9 = vadd.s32 %v1569_v45, %v1567_v29  ;;  %v1581_v8 = vmul.u32 %v1577_v57, %v1553_v49 }
 0x346   :  { %v2419_v34 = vadd.s32 4294967294, %v2074_v37  ;;  %v1943_v17 = vadd.f32 0.041655596, %v1942_v47  ;;  %v1950_v1 = vadd.f32 0.008332121, %v1949_v5  ;;  %vm1970_vm0 = vcmp.lt.s32.totalorder %v3568_v11, 0 }
 0x347   :  { %v1584_v35 = vshll.u32 %v1580_v55, 16  ;;  %vm1586_vm12 = vc.u32 %v1578_v56, %v1582_v42  ;;  %v1572_v62 = vadd.s32 %v1571_v9, %v1561_v52  ;;  %v1588_v54 = vadd.s32 %v1582_v42, %v1578_v56 }
 0x348   :  { %vm2420_vm13 = vcmp.lt.s32.totalorder %v2419_v34, 0  ;;  %v1587_v40 = vsel %vm1586_vm12, 1, %v2528_v0  ;;  %v1944_v2 = vmul.f32 %v1943_v17, %v1941_v53  ;;  %v1951_v48 = vmul.f32 %v1950_v1, %v1941_v53 }
 0x349   :  { %v2077_v50 = vsel %vm2420_vm13, 0, %v2419_v34  ;;  %v1589_v27 = vadd.s32 %v1587_v40, %v1581_v8  ;;  %v2092_v31 = vsub.s32 4, %v3806_v46  ;;  %v1563_v49 = vshrl.u32 %v3810_v10, 16 }
 0x34a   :  { %v2078_v44 = vsub.s32 32, %v2077_v50  ;;  %v2082_v23 = vsub.s32 4294967266, %v2077_v50  ;;  %v1945_v57 = vadd.f32 -0.4999988, %v1944_v2  ;;  %v1952_v59 = vadd.f32 -0.16666654, %v1951_v48 }
 0x34b   :  { %v1583_v30 = vshrl.u32 %v3824_v20, 16  ;;  %vm1590_vm14 = vc.u32 %v1588_v54, %v1584_v35  ;;  %vm1960_vm15 = vcmp.eq.s32.totalorder %v3842_v51, 0  ;;  %v2079_v22 = vshll.u32 %v3819_v15, %v2077_v50 }
 0x34c   :  { %v2080_v4 = vshrl.u32 %v2062_v39, %v2078_v44  ;;  %v2083_v3 = vadd.s32 127, %v2082_v23  ;;  %v1591_v32 = vsel %vm1590_vm14, 1, %v2528_v0  ;;  %v1946_v13 = vmul.f32 %v1945_v57, %v1941_v53 }
 0x34d   :  { %v1953_v58 = vmul.f32 %v1952_v59, %v1941_v53  ;;  %vm1959_vm3 = vcmp.lt.s32.totalorder %v3842_v51, 2  ;;  %v3859_v61 = vadd.s32 %v1572_v62, %v1563_v49  ;;  %v1593_v10 = vadd.s32 %v1591_v32, %v1589_v27 }
 0x34e   :  { %vm1956_vm4 = vweird.f32 %v3540_v18  ;;  %v2081_v26 = vor.u32 %v2080_v4, %v2079_v22  ;;  %v2084_v20 = vshll.u32 %v2083_v3, 23  ;;  %v1585_v29 = vshrl.u32 %v1580_v55, 16 }
 0x34f   :  { %v1658_v37 = vand.u32 2147483647, %v3545_v25  ;;  %v1947_v45 = vadd.f32 1.0, %v1946_v13  ;;  %v1954_v15 = vadd.f32 1.0, %v1953_v58  ;;  %v3863_v39 = vadd.s32 %v1588_v54, %v1584_v35 }
 0x350   :  { %v1594_v42 = vadd.s32 %v1593_v10, %v1583_v30  ;;  %vm1963_vm10 = vcmp.eq.s32.totalorder %v3842_v51, 2  ;;  %v2085_v53 = vor.u32 4788187, %v2084_v20  ;;  %v2093_v47 = vsel %vm1970_vm0, %v2092_v31, %v3806_v46 }
 0x351   :  { %v1596_v5 = vmul.u32 %v3794_v38, %v3848_v43  ;;  %v1955_v56 = vmul.f32 %v1954_v15, %v3833_v16  ;;  %v1964_v55 = vxor.u32 2147483648, %v1947_v45  ;;  %vm1598_vm6 = vc.u32 %v3859_v61, %v3863_v39 }
 0x352   :  { %v1595_v34 = vadd.s32 %v1594_v42, %v1585_v29  ;;  %v2086_v52 = vand.u32 2147483647, %v2085_v53  ;;  %v2088_v9 = vcvt.s32.f32 %v2081_v26  ;;  %v1665_v8 = vand.u32 8388607, %v1658_v37 }
 0x353   :  { %v1679_v17 = vshrl.u32 %v2533_v24, %v3707_v41  ;;  %v1961_v1 = vxor.u32 2147483648, %v1955_v56  ;;  %v1676_v38 = vshrl.u32 %v2532_v21, %v3707_v41  ;;  %v1678_v16 = vshll.u32 %v2532_v21, %v3677_v60 }
 0x354   :  { %v1599_v46 = vadd.s32 1, %v1595_v34  ;;  %v2089_v43 = vmul.f32 %v2088_v9, %v2086_v52  ;;  %v1675_v35 = vshll.u32 %v2531_v19, %v3677_v60  ;;  %v1681_v62 = vshll.u32 %v2533_v24, %v3677_v60 }
 0x355   :  { %v1682_v40 = vshrl.u32 %v2534_v28, %v3707_v41  ;;  %v1962_v54 = vsel %vm1960_vm15, %v1947_v45, %v1961_v1  ;;  %v1965_v2 = vsel %vm1963_vm10, %v1964_v55, %v1955_v56  ;;  %v3892_v50 = vor.u32 %v1679_v17, %v1678_v16 }
 0x356   :  { %v1600_v48 = vsel %vm1598_vm6, %v1599_v46, %v1595_v34  ;;  %v1966_v21 = vsel %vm1959_vm3, %v1962_v54, %v1965_v2  ;;  %v2090_v27 = vxor.u32 2147483648, %v2089_v43  ;;  %vm3902_vm7 = vcmp.le.f32.partialorder %v1968_v7, 0.7853982 }
 0x357   :  { %v1601_v44 = vadd.s32 %v1600_v48, %v1596_v5  ;;  %v3896_v23 = vor.u32 %v1682_v40, %v1681_v62  ;;  %v1967_v24 = vsel %vm1956_vm4, nan, %v1966_v21  ;;  %v1666_v60 = vor.u32 8388608, %v1665_v8 }
 0x358   :  { %v3906_v31 = vor.u32 %v1676_v38, %v1675_v35  ;;  %2169 = vmatpush.msrb.mxu0 %v1967_v24  ;;  %2437 = vmatpush.msrb.mxu2 %v1967_v24  ;;  %v2091_v51 = vsel %vm1970_vm0, %v2090_v27, %v2089_v43  ;;  %v2095_v49 = vsel %vm3902_vm7, 0, %v2093_v47  ;;  %vm1690_vm8 = vcmp.lt.s32.totalorder %v3701_v6, 1 }
 0x359   :  { %v1602_v57 = vadd.s32 536870912, %v1601_v44  ;;  %v1699_v18 = vsel %vm1693_vm5, %v3800_v33, 920167782  ;;  %v2094_v7 = vsel %vm3902_vm7, %v3568_v11, %v2091_v51  ;;  %vm1692_vm9 = vcmp.lt.s32.totalorder %v3701_v6, 3 }
 0x35a   :  { %v1702_v59 = vsel %vm1690_vm8, %v3892_v50, %v3896_v23  ;;  %v2096_v30 = vmul.f32 %v2094_v7, %v2094_v7  ;;  %vm1691_vm11 = vcmp.lt.s32.totalorder %v3701_v6, 2  ;;  %v1704_v4 = vsel %vm1692_vm9, %v3800_v33, %v3814_v36 }
 0x35b   :  { %v3924_v22 = vshrl.u32 %v1602_v57, 30  ;;  %v2112_v3 = vadd.s32 3, %v2095_v49  ;;  %v1698_v32 = vsel %vm1690_vm8, %v3906_v31, %v3892_v50  ;;  %v1705_v13 = vsel %vm1691_vm11, %v1702_v59, %v1704_v4 }
 0x35c   :  { %v3937_v58 = vshll.u32 %v1666_v60, 8  ;;  %v2097_v10 = vmul.f32 -0.001358992, %v2096_v30  ;;  %v2104_v26 = vmul.f32 -0.00019511016, %v2096_v30  ;;  %v1700_v29 = vsel %vm1692_vm9, %v3896_v23, %v1699_v18 }
 0x35d   :  { %v1604_v20 = vshll.u32 %v3924_v22, 30  ;;  %v1709_v45 = vand.u32 65535, %v1705_v13  ;;  %v1710_v15 = vshrl.u32 %v1705_v13, 16  ;;  %v1701_v5 = vsel %vm1691_vm11, %v1698_v32, %v1700_v29 }
 0x35e   :  { %v1707_v33 = vand.u32 65535, %v3937_v58  ;;  %v1708_v36 = vshrl.u32 %v3937_v58, 16  ;;  %v2098_v42 = vadd.f32 0.041655596, %v2097_v10  ;;  %v2105_v53 = vadd.f32 0.008332121, %v2104_v26 }
 0x35f   :  { %v1605_v47 = vsub.s32 %v1601_v44, %v1604_v20  ;;  %v2113_v8 = vand.u32 3, %v2112_v3  ;;  %v1732_v43 = vshrl.u32 %v1701_v5, 16  ;;  %vm2111_vm12 = vweird.f32 %v3568_v11 }
 0x360   :  { %v3947_v56 = vmul.u32 %v1710_v15, %v1707_v33  ;;  %v3949_v55 = vmul.u32 %v1709_v45, %v1708_v36  ;;  %v2099_v34 = vmul.f32 %v2098_v42, %v2096_v30  ;;  %v2106_v52 = vmul.f32 %v2105_v53, %v2096_v30 }
 0x361   :  { %vm1606_vm1 = vcmp.lt.s32.totalorder %v1605_v47, 0  ;;  %v1607_v9 = vsub.s32 0, %v1605_v47  ;;  %v1711_v17 = vmul.u32 %v1709_v45, %v1707_v33  ;;  %v1714_v62 = vmul.u32 %v1710_v15, %v1708_v36 }
 0x362   :  { %v1715_v1 = vshll.u32 %v3947_v56, 16  ;;  %v2100_v46 = vadd.f32 -0.4999988, %v2099_v34  ;;  %v2107_v38 = vadd.f32 -0.16666654, %v2106_v52  ;;  %v1717_v40 = vshll.u32 %v3949_v55, 16 }
 0x363   :  { %v1608_v16 = vsel %vm1606_vm1, %v1607_v9, %v1605_v47  ;;  %v1731_v44 = vand.u32 65535, %v1701_v5  ;;  %vm2114_vm14 = vcmp.lt.s32.totalorder %v2113_v8, 2  ;;  %v1734_v49 = vmul.u32 %v1732_v43, %v1707_v33 }
 0x364   :  { %v1609_v35 = vclz %v1608_v16  ;;  %vm1719_vm0 = vc.u32 %v1711_v17, %v1715_v1  ;;  %v2101_v54 = vmul.f32 %v2100_v46, %v2096_v30  ;;  %v2108_v2 = vmul.f32 %v2107_v38, %v2096_v30 }
 0x365   :  { %v1720_v48 = vsel %vm1719_vm0, 1, %v2528_v0  ;;  %v1721_v21 = vadd.s32 %v1715_v1, %v1711_v17  ;;  %vm2115_vm3 = vcmp.eq.s32.totalorder %v2113_v8, 0  ;;  %vm2118_vm4 = vcmp.eq.s32.totalorder %v2113_v8, 2 }
 0x366   :  { %v2410_v27 = vadd.s32 4294967294, %v1609_v35  ;;  %v2102_v24 = vadd.f32 1.0, %v2101_v54  ;;  %v2109_v28 = vadd.f32 1.0, %v2108_v2  ;;  %v1722_v60 = vadd.s32 %v1720_v48, %v1714_v62 }
 0x367   :  { %vm1723_vm13 = vc.u32 %v1721_v21, %v1717_v40  ;;  %v1597_v30 = vadd.s32 %v3863_v39, %v3859_v61  ;;  %v1733_v10 = vmul.u32 %v1731_v44, %v1707_v33  ;;  %v1735_v26 = vmul.u32 %v1731_v44, %v1708_v36  ;;  %v2127_v21 = vld [vmem:[%s4086_s4 + $0x20] sm:$0xff] }
 0x368   :  { %vm2411_vm15 = vcmp.lt.s32.totalorder %v2410_v27, 0  ;;  %v1724_v51 = vsel %vm1723_vm13, 1, %v2528_v0  ;;  %v2110_v57 = vmul.f32 %v2109_v28, %v2094_v7  ;;  %v2119_v18 = vxor.u32 2147483648, %v2102_v24 }
 0x369   :  { %v1612_v59 = vsel %vm2411_vm15, 0, %v2410_v27  ;;  %v1726_v13 = vadd.s32 %v1724_v51, %v1722_v60  ;;  %v1737_v15 = vshll.u32 %v1734_v49, 16  ;;  %v1716_v7 = vshrl.u32 %v3947_v56, 16 }
 0x36a   :  { %v1613_v4 = vsub.s32 32, %v1612_v59  ;;  %v1617_v3 = vsub.s32 4294967266, %v1612_v59  ;;  %v2116_v32 = vxor.u32 2147483648, %v2110_v57  ;;  %v1614_v20 = vshll.u32 %v1605_v47, %v1612_v59 }
 0x36b   :  { %v2120_v53 = vsel %vm2118_vm4, %v2119_v18, %v2110_v57  ;;  %v1736_v5 = vmul.u32 %v1732_v43, %v1708_v36  ;;  %vm1741_vm10 = vc.u32 %v1733_v10, %v1737_v15  ;;  %v1739_v39 = vshll.u32 %v1735_v26, 16 }
 0x36c   :  { %v1615_v29 = vshrl.u32 %v1597_v30, %v1613_v4  ;;  %v1618_v45 = vadd.s32 127, %v1617_v3  ;;  %v2117_v42 = vsel %vm2115_vm3, %v2102_v24, %v2116_v32  ;;  %v1742_v33 = vsel %vm1741_vm10, 1, %v2528_v0 }
 0x36d   :  { %v2121_v34 = vsel %vm2114_vm14, %v2117_v42, %v2120_v53  ;;  %v1743_v47 = vadd.s32 %v1737_v15, %v1733_v10  ;;  %v1727_v1 = vadd.s32 %v1726_v13, %v1716_v7  ;;  %v1744_v46 = vadd.s32 %v1742_v33, %v1736_v5 }
 0x36e   :  { %v1616_v52 = vor.u32 %v1615_v29, %v1614_v20  ;;  %v1619_v9 = vshll.u32 %v1618_v45, 23  ;;  %v2122_v61 = vsel %vm2111_vm12, nan, %v2121_v34  ;;  %v1674_v36 = vshrl.u32 %v2531_v19, %v3707_v41 }
 0x36f   :  { %2210 = vmatpush.msrb.mxu1 %v2122_v61  ;;  %2439 = vmatpush.msrb.mxu3 %v2122_v61  ;;  %v1695_v56 = vsel %vm1693_vm5, %v3896_v23, 2102212464  ;;  %vm1745_vm6 = vc.u32 %v1743_v47, %v1739_v39  ;;  %v1718_v38 = vshrl.u32 %v3949_v55, 16  ;;  %v1738_v43 = vshrl.u32 %v1734_v49, 16 }
 0x370   :  { %v1620_v17 = vor.u32 4788187, %v1619_v9  ;;  %v1623_v11 = vcvt.s32.f32 %v1616_v52  ;;  %v1746_v16 = vsel %vm1745_vm6, 1, %v2528_v0  ;;  %v1694_v40 = vsel %vm1690_vm8, %v1674_v36, %v3906_v31 }
 0x371   :  { %v1748_v35 = vadd.s32 %v1746_v16, %v1744_v46  ;;  %v1696_v19 = vsel %vm1692_vm9, %v3892_v50, %v1695_v56  ;;  %v1728_v41 = vadd.s32 %v1727_v1, %v1718_v38  ;;  %v1740_v23 = vshrl.u32 %v1735_v26, 16 }
 0x372   :  { %v1621_v8 = vand.u32 2147483647, %v1620_v17  ;;  %v1747_v48 = vadd.s32 %v1743_v47, %v1739_v39  ;;  %vm1505_vm5 = vcmp.lt.s32.totalorder %v3537_v12, 0  ;;  %v1697_v0 = vsel %vm1691_vm11, %v1694_v40, %v1696_v19 }
 0x373   :  { %v1749_v54 = vadd.s32 %v1748_v35, %v1738_v43  ;;  %vm3981_vm7 = vcmp.le.f32.partialorder %v1503_v63, 0.7853982  ;;  %v1627_v50 = vsub.s32 4, %v3924_v22  ;;  %v1751_v6 = vmul.u32 %v3937_v58, %v1697_v0  ;;  %v4000_v35 = vld [vmem:[%s4086_s4] sm:$0xff] }
 0x374   :  { %v1624_v62 = vmul.f32 %v1623_v11, %v1621_v8  ;;  %vm1753_vm8 = vc.u32 %v1728_v41, %v1747_v48  ;;  %vm1646_vm12 = vweird.f32 %v3537_v12  ;;  %v1752_v46 = vadd.s32 %v1747_v48, %v1728_v41 }
 0x375   :  { %v1750_v55 = vadd.s32 %v1749_v54, %v1740_v23  ;;  %v1628_v63 = vsel %vm1505_vm5, %v1627_v50, %v3924_v22  ;;  %v4013_v54 = vld [vmem:[%s4086_s4 + $0x8] sm:$0xff]  ;;  %vm1660_vm14 = vcmp.lt.s32.totalorder %v3545_v25, 0  ;;  %vm4018_vm15 = vcmp.le.f32.partialorder %v1658_v37, 0.7853982 }
 0x376   :  { %v1625_v2 = vxor.u32 2147483648, %v1624_v62  ;;  %v1630_v30 = vsel %vm3981_vm7, 0, %v1628_v63  ;;  %vm1801_vm6 = vweird.f32 %v3545_v25 }
 0x377   :  { %v1754_v44 = vadd.s32 1, %v1750_v55  ;;  %v1647_v26 = vadd.s32 3, %v1630_v30 }
 0x378   :  { %v1626_v31 = vsel %vm1505_vm5, %v1625_v2, %v1624_v62  ;;  %v2237_v62 = vld [vmem:[%s4088_s6] sm:$0x3] }
 0x379   :  { %v1629_v27 = vsel %vm3981_vm7, %v3537_v12, %v1626_v31  ;;  %v1755_v28 = vsel %vm1753_vm8, %v1754_v44, %v1750_v55  ;;  %v1648_v53 = vand.u32 3, %v1647_v26  ;;  %v4007_v40 = vperm.slane %v2237_v62, 0 }
 0x37a   :  { %v1631_v24 = vmul.f32 %v1629_v27, %v1629_v27  ;;  %v1756_v49 = vadd.s32 %v1755_v28, %v1751_v6  ;;  %v4025_v55 = vadd.s32 16, %v3543_v14  ;;  %v2125_v6 = vld [vmem:[%s4086_s4 + $0x10] sm:$0xff] }
 0x37b   :  { %vm1650_vm11 = vcmp.eq.s32.totalorder %v1648_v53, 0  ;;  %vm1653_vm1 = vcmp.eq.s32.totalorder %v1648_v53, 2  ;;  %vm1649_vm0 = vcmp.lt.s32.totalorder %v1648_v53, 2  ;;  %2243 = vperm.xlu1 %2464, %v4007_v40  }
 0x37c   :  { %v1632_v60 = vmul.f32 -0.001358992, %v1631_v24  ;;  %v1639_v51 = vmul.f32 -0.00019511016, %v1631_v24  ;;  %v1757_v59 = vadd.s32 536870912, %v1756_v49 }
 0x37e   :  { %v1633_v57 = vadd.f32 0.041655596, %v1632_v60  ;;  %v1640_v18 = vadd.f32 0.008332121, %v1639_v51  ;;  %v3993_v32 = vshrl.u32 %v1757_v59, 30 }
 0x380   :  { %v1634_v4 = vmul.f32 %v1633_v57, %v1631_v24  ;;  %v1641_v3 = vmul.f32 %v1640_v18, %v1631_v24  ;;  %v1759_v58 = vshll.u32 %v3993_v32, 30  ;;  %v1782_v31 = vsub.s32 4, %v3993_v32  ;;  %v2128_v57 = vld [vmem:[%s4086_s4 + $0x28] sm:$0xff] }
 0x382   :  { %v1635_v13 = vadd.f32 -0.4999988, %v1634_v4  ;;  %v1642_v10 = vadd.f32 -0.16666654, %v1641_v3  ;;  %v1760_v45 = vsub.s32 %v1756_v49, %v1759_v58 }
 0x383   :  { %2466 = vset.pattern.permute.xlu1 %v4025_v55 }
 0x384   :  { %v1636_v20 = vmul.f32 %v1635_v13, %v1631_v24  ;;  %v1643_v29 = vmul.f32 %v1642_v10, %v1631_v24  ;;  %vm1761_vm9 = vcmp.lt.s32.totalorder %v1760_v45, 0  ;;  %v1762_v42 = vsub.s32 0, %v1760_v45 }
 0x385   :  { %v1783_v24 = vsel %vm1660_vm14, %v1782_v31, %v3993_v32  ;;  %v2126_v32 = vld [vmem:[%s4086_s4 + $0x18] sm:$0xff] }
 0x386   :  { %v1637_v15 = vadd.f32 1.0, %v1636_v20  ;;  %v1644_v22 = vadd.f32 1.0, %v1643_v29  ;;  %v1763_v34 = vsel %vm1761_vm9, %v1762_v42, %v1760_v45  ;;  %v1785_v51 = vsel %vm4018_vm15, 0, %v1783_v24  ;;  %v2297_v24 = vld [vmem:[#allocation2 + $0x48] sm:$0xff] }
 0x387   :  { %v1764_v52 = vclz %v1763_v34  ;;  %v1802_v30 = vadd.s32 3, %v1785_v51  ;;  %v2247_v29 = vadd.s32 8, %v3543_v14  ;;  %v2130_v34 = vld [vmem:[%s4086_s4 + $0x38] sm:$0xff] }
 0x388   :  { %v1645_v7 = vmul.f32 %v1644_v22, %v1629_v27  ;;  %v1654_v5 = vxor.u32 2147483648, %v1637_v15 }
 0x389   :  { %v2413_v61 = vadd.s32 4294967294, %v1764_v52  ;;  %v1803_v58 = vand.u32 3, %v1802_v30  ;;  %2465 = vset.pattern.permute.xlu2 %v2247_v29  ;;  %v2259_v52 = vadd.s32 24, %v3543_v14  ;;  %v2288_v14 = vld [vmem:[#allocation2] sm:$0xff] }
 0x38a   :  { %v1651_v9 = vxor.u32 2147483648, %v1645_v7  ;;  %v1655_v33 = vsel %vm1653_vm1, %v1654_v5, %v1645_v7 }
 0x38b   :  { %vm2414_vm13 = vcmp.lt.s32.totalorder %v2413_v61, 0  ;;  %2255 = vperm.xlu1 %2466, %v4007_v40   ;;  %vm1805_vm3 = vcmp.eq.s32.totalorder %v1803_v58, 0  ;;  %vm1808_vm4 = vcmp.eq.s32.totalorder %v1803_v58, 2  ;;  %vm1804_vm10 = vcmp.lt.s32.totalorder %v1803_v58, 2 }
 0x38c   :  { %v1652_v39 = vsel %vm1650_vm11, %v1637_v15, %v1651_v9  ;;  %v1767_v1 = vsel %vm2414_vm13, 0, %v2413_v61  ;;  %v2129_v15 = vld [vmem:[%s4086_s4 + $0x30] sm:$0xff]  ;;  %s2537_s4 = smov [#allocation5]  }
 0x38d   :  { %v1656_v47 = vsel %vm1649_vm0, %v1652_v39, %v1655_v33  ;;  %v1768_v36 = vsub.s32 32, %v1767_v1  ;;  %v1772_v56 = vsub.s32 4294967266, %v1767_v1  ;;  %v1769_v8 = vshll.u32 %v1760_v45, %v1767_v1  ;;  %s2356_s22 = sshll.u32 %s2537_s4, 4  ;;  %s2357_s22 = int_to_ptr.vmem [resolvable:$true] %s2356_s22 }
 0x38e   :  { %v1657_v17 = vsel %vm1646_vm12, nan, %v1656_v47  ;;  %v2263_v45 = vperm.slane %v2237_v62, 1  ;;  %v2290_v47 = vld [vmem:[#allocation2 + $0x10] sm:$0xff] }
 0x38f   :  { %2170 = vmatpush.msrb.mxu0 %v1657_v17  ;;  %2438 = vmatpush.msrb.mxu2 %v1657_v17  ;;  %v1770_v11 = vshrl.u32 %v1752_v46, %v1768_v36  ;;  %v1773_v38 = vadd.s32 127, %v1772_v56  ;;  %v2292_v46 = vld [vmem:[#allocation2 + $0x20] sm:$0xff]  ;;  %v2294_v62 = vld [vmem:[#allocation2 + $0x30] sm:$0xff] }
 0x390   :  { %2421 = vmatmul.msk.f32.vlgmr.msrb.gmra.mxu0 %vm762_vm2, %v4000_v35  ;;  %2425 = vmatmul.msk.f32.vlgmr.msrb.gmra.mxu2 %vm762_vm2, %v2127_v21 }
 0x391   :  { %v1771_v16 = vor.u32 %v1770_v11, %v1769_v8  ;;  %v1774_v43 = vshll.u32 %v1773_v38, 23  ;;  %2268 = vperm.xlu0 %2468, %v2263_v45   ;;  %2249 = vperm.xlu2 %2465, %v4007_v40  }
 0x393   :  { %v1775_v12 = vor.u32 4788187, %v1774_v43  ;;  %v1778_v41 = vcvt.s32.f32 %v1771_v16  ;;  %2469 = vset.pattern.permute.xlu1 %v2247_v29  ;;  %v2296_v16 = vld [vmem:[#allocation2 + $0x40] sm:$0xff] }
 0x395   :  { %v1776_v19 = vand.u32 2147483647, %v1775_v12 }
 0x397   :  { %v1779_v23 = vmul.f32 %v1778_v41, %v1776_v19  ;;  %v2298_v41 = vld [vmem:[#allocation2 + $0x50] sm:$0xff] }
 0x398   :  { %2422 = vmatmul.msk.f32.gmra.mxu0 %vm762_vm2, %v4013_v54  ;;  %2426 = vmatmul.msk.f32.gmra.mxu2 %vm762_vm2, %v2128_v57 }
 0x399   :  { %v1780_v2 = vxor.u32 2147483648, %v1779_v23  ;;  %2472 = vset.pattern.permute.xlu0 %v2259_v52  ;;  %2467 = vset.pattern.permute.xlu2 %v2259_v52 }
 0x39b   :  { %v1781_v0 = vsel %vm1660_vm14, %v1780_v2, %v1779_v23  ;;  %2274 = vperm.xlu1 %2469, %v2263_v45  }
 0x39c   :  { %v1784_v37 = vsel %vm4018_vm15, %v3545_v25, %v1781_v0 }
 0x39d   :  { %v1786_v50 = vmul.f32 %v1784_v37, %v1784_v37 }
 0x39f   :  { %v1787_v27 = vmul.f32 -0.001358992, %v1786_v50  ;;  %v1794_v44 = vmul.f32 -0.00019511016, %v1786_v50 }
 0x3a0   :  { %2423 = vmatmul.msk.f32.gmra.mxu0 %vm762_vm2, %v2125_v6  ;;  %2427 = vmatmul.msk.f32.gmra.mxu2 %vm762_vm2, %v2129_v15 }
 0x3a1   :  { %v1788_v28 = vadd.f32 0.041655596, %v1787_v27  ;;  %v1795_v60 = vadd.f32 0.008332121, %v1794_v44  ;;  %2261 = vperm.xlu2 %2467, %v4007_v40  }
 0x3a3   :  { %v1789_v49 = vmul.f32 %v1788_v28, %v1786_v50  ;;  %v1796_v63 = vmul.f32 %v1795_v60, %v1786_v50  ;;  %2471 = vset.pattern.permute.xlu1 %v2259_v52 }
 0x3a5   :  { %v1790_v18 = vadd.f32 -0.4999988, %v1789_v49  ;;  %v1797_v59 = vadd.f32 -0.16666654, %v1796_v63  ;;  %v2291_v49 = vld [vmem:[#allocation2 + $0x18] sm:$0xff] }
 0x3a7   :  { %v1791_v4 = vmul.f32 %v1790_v18, %v1786_v50  ;;  %v1798_v3 = vmul.f32 %v1797_v59, %v1786_v50  ;;  %v2302_v18 = vld [vmem:[#allocation2 + $0x70] sm:$0xff] }
 0x3a8   :  { %2424 = vmatmul.msk.f32.gmra.mxu0 %vm762_vm2, %v2126_v32  ;;  %2428 = vmatmul.msk.f32.gmra.mxu2 %vm762_vm2, %v2130_v34 }
 0x3a9   :  { %v1792_v13 = vadd.f32 1.0, %v1791_v4  ;;  %v1799_v10 = vadd.f32 1.0, %v1798_v3  ;;  %2470 = vset.pattern.permute.xlu2 %v4025_v55  ;;  %v2299_v3 = vld [vmem:[#allocation2 + $0x58] sm:$0xff] }
 0x3ab   :  { %v1800_v26 = vmul.f32 %v1799_v10, %v1784_v37  ;;  %v1809_v20 = vxor.u32 2147483648, %v1792_v13  ;;  %2286 = vperm.xlu1 %2471, %v2263_v45   ;;  %v2300_v37 = vld [vmem:[#allocation2 + $0x60] sm:$0xff] }
 0x3ad   :  { %v1806_v22 = vxor.u32 2147483648, %v1800_v26  ;;  %v1810_v53 = vsel %vm1808_vm4, %v1809_v20, %v1800_v26  ;;  %v2293_v20 = vld [vmem:[#allocation2 + $0x28] sm:$0xff] }
 0x3af   :  { %v1807_v42 = vsel %vm1805_vm3, %v1792_v13, %v1806_v22 }
 0x3b0   :  { %v1811_v7 = vsel %vm1804_vm10, %v1807_v42, %v1810_v53  ;;  %v2301_v53 = vld [vmem:[#allocation2 + $0x68] sm:$0xff] }
 0x3b1   :  { %v1812_v5 = vsel %vm1801_vm6, nan, %v1811_v7  ;;  %2280 = vperm.xlu2 %2470, %v2263_v45  }
 0x3b2   :  { %2211 = vmatpush.msrb.mxu1 %v1812_v5  ;;  %2440 = vmatpush.msrb.mxu3 %v1812_v5 }
 0x3b3   :  { %2429 = vmatmul.msk.f32.vlgmr.msrb.gmra.mxu1 %vm762_vm2, %v4000_v35  ;;  %2433 = vmatmul.msk.f32.vlgmr.msrb.gmra.mxu3 %vm762_vm2, %v2127_v21  ;;  %v2289_v21 = vld [vmem:[#allocation2 + $0x8] sm:$0xff] }
 0x3bb   :  { %2430 = vmatmul.msk.f32.gmra.mxu1 %vm762_vm2, %v4013_v54  ;;  %2434 = vmatmul.msk.f32.gmra.mxu3 %vm762_vm2, %v2128_v57 }
 0x3c3   :  { %2431 = vmatmul.msk.f32.gmra.mxu1 %vm762_vm2, %v2125_v6  ;;  %2435 = vmatmul.msk.f32.gmra.mxu3 %vm762_vm2, %v2129_v15 }
 0x3cb   :  { %2432 = vmatmul.msk.f32.gmra.mxu1 %vm762_vm2, %v2126_v32  ;;  %2436 = vmatmul.msk.f32.gmra.mxu3 %vm762_vm2, %v2130_v34  ;;  %v2295_v34 = vld [vmem:[#allocation2 + $0x38] sm:$0xff] }
 0x3eb   :  { %v2250_v17 = vpop.permute.xlu2 %2249 }
 0x3ec   :  { %v2306_v1 = vmul.f32 %v2290_v47, %v2250_v17  ;;  %v2307_v59 = vmul.f32 %v2291_v49, %v2250_v17 }
 0x3ed   :  { %v2244_v25 = vpop.permute.xlu1 %2243 }
 0x3ee   :  { %v2304_v9 = vmul.f32 %v2288_v14, %v2244_v25  ;;  %v2305_v50 = vmul.f32 %v2289_v21, %v2244_v25 }
 0x3fb   :  { %v2262_v40 = vpop.permute.xlu2 %2261 }
 0x3fc   :  { %v2310_v23 = vmul.f32 %v2294_v62, %v2262_v40  ;;  %v2311_v14 = vmul.f32 %v2295_v34, %v2262_v40 }
 0x3fd   :  { %v2256_v36 = vpop.permute.xlu1 %2255 }
 0x3fe   :  { %v2308_v8 = vmul.f32 %v2292_v46, %v2256_v36  ;;  %v2309_v15 = vmul.f32 %v2293_v20, %v2256_v36 }
 0x403   :  { %v2269_v43 = vpop.permute.xlu0 %2268 }
 0x404   :  { %v2312_v12 = vmul.f32 %v2296_v16, %v2269_v43  ;;  %v2313_v60 = vmul.f32 %v2297_v24, %v2269_v43 }
 0x40b   :  { %v2281_v27 = vpop.permute.xlu2 %2280 }
 0x40c   :  { %v2316_v6 = vmul.f32 %v2300_v37, %v2281_v27  ;;  %v2317_v5 = vmul.f32 %v2301_v53, %v2281_v27 }
 0x40d   :  { %v2172_v61 = vpop.f32.mrf.mxu0  ;;  %v2275_v54 = vpop.permute.xlu1 %2274 }
 0x40e   :  { %v2320_v39 = vmul.f32 %v2304_v9, %v2172_v61  ;;  %v2314_v48 = vmul.f32 %v2298_v41, %v2275_v54  ;;  %v2315_v58 = vmul.f32 %v2299_v3, %v2275_v54  ;;  %v2303_v61 = vld [vmem:[#allocation2 + $0x78] sm:$0xff] }
 0x410   :  { %2336 = vst [vmem:[#allocation5] sm:$0xff] %v2320_v39 }
 0x413   :  { %v2184_v35 = vpop.f32.mrf.mxu2 }
 0x414   :  { %v2328_v19 = vmul.f32 %v2312_v12, %v2184_v35 }
 0x415   :  { %v2175_v33 = vpop.f32.mrf.mxu0 }
 0x416   :  { %v2322_v56 = vmul.f32 %v2306_v1, %v2175_v33  ;;  %2344 = vst [vmem:[#allocation5 + $0x40] sm:$0xff] %v2328_v19 }
 0x418   :  { %2338 = vst [vmem:[#allocation5 + $0x10] sm:$0xff] %v2322_v56 }
 0x41b   :  { %v2187_v55 = vpop.f32.mrf.mxu2 }
 0x41c   :  { %v2330_v31 = vmul.f32 %v2314_v48, %v2187_v55 }
 0x41d   :  { %v2178_v11 = vpop.f32.mrf.mxu0  ;;  %v2287_v32 = vpop.permute.xlu1 %2286 }
 0x41e   :  { %v2324_v38 = vmul.f32 %v2308_v8, %v2178_v11  ;;  %2346 = vst [vmem:[#allocation5 + $0x50] sm:$0xff] %v2330_v31  ;;  %v2318_v10 = vmul.f32 %v2302_v18, %v2287_v32  ;;  %v2319_v33 = vmul.f32 %v2303_v61, %v2287_v32 }
 0x420   :  { %2340 = vst [vmem:[#allocation5 + $0x20] sm:$0xff] %v2324_v38 }
 0x423   :  { %v2190_v51 = vpop.f32.mrf.mxu2 }
 0x424   :  { %v2332_v63 = vmul.f32 %v2316_v6, %v2190_v51 }
 0x425   :  { %v2181_v2 = vpop.f32.mrf.mxu0 }
 0x426   :  { %v2326_v0 = vmul.f32 %v2310_v23, %v2181_v2  ;;  %2348 = vst [vmem:[#allocation5 + $0x60] sm:$0xff] %v2332_v63 }
 0x428   :  { %2342 = vst [vmem:[#allocation5 + $0x30] sm:$0xff] %v2326_v0 }
 0x42b   :  { %v2193_v26 = vpop.f32.mrf.mxu2 }
 0x42c   :  { %v2334_v29 = vmul.f32 %v2318_v10, %v2193_v26 }
 0x42e   :  { %2350 = vst [vmem:[#allocation5 + $0x70] sm:$0xff] %v2334_v29 }
 0x430   :  { %v2213_v44 = vpop.f32.mrf.mxu1 }
 0x431   :  { %v2321_v28 = vmul.f32 %v2305_v50, %v2213_v44 }
 0x433   :  { %2337 = vst [vmem:[#allocation5 + $0x8] sm:$0xff] %v2321_v28 }
 0x436   :  { %v2225_v57 = vpop.f32.mrf.mxu3 }
 0x437   :  { %v2329_v30 = vmul.f32 %v2313_v60, %v2225_v57 }
 0x438   :  { %v2216_v4 = vpop.f32.mrf.mxu1 }
 0x439   :  { %v2323_v13 = vmul.f32 %v2307_v59, %v2216_v4  ;;  %2345 = vst [vmem:[#allocation5 + $0x48] sm:$0xff] %v2329_v30 }
 0x43b   :  { %2339 = vst [vmem:[#allocation5 + $0x18] sm:$0xff] %v2323_v13 }
 0x43e   :  { %v2228_v45 = vpop.f32.mrf.mxu3 }
 0x43f   :  { %v2331_v22 = vmul.f32 %v2315_v58, %v2228_v45 }
 0x440   :  { %v2219_v42 = vpop.f32.mrf.mxu1 }
 0x441   :  { %v2325_v7 = vmul.f32 %v2309_v15, %v2219_v42  ;;  %2347 = vst [vmem:[#allocation5 + $0x58] sm:$0xff] %v2331_v22 }
 0x443   :  { %2341 = vst [vmem:[#allocation5 + $0x28] sm:$0xff] %v2325_v7 }
 0x446   :  { %v2231_v52 = vpop.f32.mrf.mxu3 }
 0x447   :  { %v2333_v25 = vmul.f32 %v2317_v5, %v2231_v52 }
 0x448   :  { %v2222_v9 = vpop.f32.mrf.mxu1 }
 0x449   :  { %v2327_v39 = vmul.f32 %v2311_v14, %v2222_v9  ;;  %2349 = vst [vmem:[#allocation5 + $0x68] sm:$0xff] %v2333_v25 }
 0x44b   :  { %2343 = vst [vmem:[#allocation5 + $0x38] sm:$0xff] %v2327_v39 }
 0x44e   :  { %v2234_v47 = vpop.f32.mrf.mxu3 }
 0x44f   :  { %v2335_v17 = vmul.f32 %v2319_v33, %v2234_v47 }
 0x451   :  { %2351 = vst [vmem:[#allocation5 + $0x78] sm:$0xff] %v2335_v17 }
 0x452   :  { %2364 = dma.vmem_to_hbm [thread:$0]  %s2357_s22, 2048, %s2359_s25, [#allocation4], %s2526_s29, %s2526_s29, %s2527_s30  }
 0x453   :  { %2523 = dma.done.wait [#allocation4], 2048  }
 0x454   :  { %2524 = vsyncadd [#allocation4], 4294965248 }
 0x455   :  { %2369 = vsyncpa [#allocation3], 1 }
 0x456   :  { %2370 = vsyncpa [#allocation4], 1 }

</bundles_post_ra>
